<compile_context>
chip_gen: v7x
topology: tpu7x:2x2x1
jax: 0.10.0
libtpu: 0.0.40
codegen_flags: <defaults>
</compile_context>

<pallas_src>
import functools
import math

import jax
import jax.numpy as jnp
from jax.experimental import pallas as pl
from jax.experimental.pallas import tpu as pltpu

_LN_EPS = 1e-5                       # torch nn.LayerNorm default
_MXU_DTYPE = jnp.bfloat16            # MXU matmul input dtype (f32 accumulation)
_PARAM_DTYPE = jnp.bfloat16          # HBM storage for matmul weights
_ACT_DTYPE = jnp.bfloat16            # HBM storage for the inter-kernel attention output


def _pick_vmem_limit():
    # ~80% of physical VMEM per core (review: never request the full 64 MiB on v7x),
    # clamped; conservative 48 MiB fallback if the query is unavailable.
    try:
        info = pltpu.get_tpu_info()
        cap = getattr(info, "vmem_capacity_bytes", None)
        if cap:
            return max(32 << 20, min(int(cap * 0.8), 112 << 20))
    except Exception:
        pass
    return 48 << 20


_VMEM_LIMIT = _pick_vmem_limit()


# ---------------------------------------------------------------------------
# In-kernel helpers
# ---------------------------------------------------------------------------
def _mm(a, b):
    # NN matmul on the MXU, bf16 inputs / f32 accumulation
    return jnp.dot(a.astype(_MXU_DTYPE), b.astype(_MXU_DTYPE),
                   preferred_element_type=jnp.float32)


def _mm_nt(a, b):
    # a @ b.T without materializing the transpose (MXU-native NT form)
    return jax.lax.dot_general(a.astype(_MXU_DTYPE), b.astype(_MXU_DTYPE),
                               (((1,), (1,)), ((), ())),
                               preferred_element_type=jnp.float32)


def _layer_norm(x, g, b):
    mu = jnp.mean(x, axis=-1, keepdims=True)
    xc = x - mu
    var = jnp.mean(xc * xc, axis=-1, keepdims=True)
    return xc * jax.lax.rsqrt(var + _LN_EPS) * g + b


def _erf(x):
    # Abramowitz & Stegun 7.1.26 polynomial, |err| < 1.5e-7 (VPU/EUP-only ops).
    a1, a2, a3, a4, a5 = (0.254829592, -0.284496736, 1.421413741,
                          -1.453152027, 1.061405429)
    pp = 0.3275911
    ax = jnp.abs(x)
    t = 1.0 / (1.0 + pp * ax)
    poly = ((((a5 * t + a4) * t + a3) * t + a2) * t + a1) * t
    y = 1.0 - poly * jnp.exp(-(ax * ax))
    return jnp.where(x >= 0, y, -y)


def _gelu_exact(x):
    # torch nn.GELU() default: 0.5*x*(1+erf(x/sqrt(2)))
    return 0.5 * x * (1.0 + _erf(x * (1.0 / math.sqrt(2.0))))


def _round_up(x, m):
    return ((x + m - 1) // m) * m


def _row_tiling(m_rows):
    # Large, sublane-aligned row tiles (512-1024 amortize the ~0.35 us/step grid
    # cost); pad M instead of degrading to tiny tiles for awkward factorizations.
    if m_rows <= 1024:
        tm = _round_up(m_rows, 8)
        return tm, tm
    m_pad = _round_up(m_rows, 256)
    for tm in (1024, 512, 256):
        if m_pad % tm == 0:
            return tm, m_pad
    return 256, _round_up(m_pad, 256)


# ---------------------------------------------------------------------------
# Kernel A: LayerNorm1 + per-head QKV + attention   (one batch per grid step)
# Output layout is (C, N) per batch == torch's (NH, Hd, N) after transpose(2,3),
# so the subsequent .view(B, D, H, W, C) is a flat-buffer reinterpretation.
# ---------------------------------------------------------------------------
def _attn_core_kernel(x_ref, g1_ref, b1_ref, wq_ref, bq_ref, wkt_ref, bkt_ref,
                      wvt_ref, bvt_ref, o_ref, *, num_heads, head_dim):
    xn = _layer_norm(x_ref[...].astype(jnp.float32), g1_ref[...], b1_ref[...])
    xn_mx = xn.astype(_MXU_DTYPE)                       # hoisted cast (reused per head)
    n_tok = xn.shape[0]
    ones_row = jnp.ones((1, n_tok), jnp.float32)

    def head_body(h, carry):
        # Per-head projections from head-blocked weights: no lane slicing anywhere.
        q_h = _mm(xn_mx, wq_ref[h]) + bq_ref[h]          # (N, Hd), scale pre-folded
        kt_h = _mm_nt(wkt_ref[h], xn_mx) + bkt_ref[h]    # (Hd, N)
        vt_h = _mm_nt(wvt_ref[h], xn_mx) + bvt_ref[h]    # (Hd, N)

        s = _mm(q_h, kt_h)                               # (N, N) logits (NN form)
        s = s - jnp.max(s, axis=-1, keepdims=True)
        p = jnp.exp(s)
        # Row-sums in transposed (1, N) form via a tiny NT matmul (MXU slot),
        # so the reciprocal is applied to the (Hd, N) output, not the (N, N) tile.
        denom_t = _mm_nt(ones_row, p)                    # (1, N)
        ot_h = _mm_nt(vt_h, p) * pl.reciprocal(denom_t, approx=True)   # (Hd, N)
        # attn_drop(p=0.0) is the identity.

        lo = pl.multiple_of(h * head_dim, head_dim)
        o_ref[pl.ds(lo, head_dim), :] = ot_h.astype(o_ref.dtype)
        return carry

    jax.lax.fori_loop(0, num_heads, head_body, 0)


def attention_core(x_tok, layer, num_heads):
    # x_tok: (B, N, C) f32  ->  (B, C, N) head-major attention output (bf16)
    B, N, C = x_tok.shape
    Hd = C // num_heads
    kernel = functools.partial(_attn_core_kernel, num_heads=num_heads, head_dim=Hd)
    rep2 = lambda b: (0, 0)
    rep3 = lambda b: (0, 0, 0)
    return pl.pallas_call(
        kernel,
        out_shape=jax.ShapeDtypeStruct((B, C, N), _ACT_DTYPE),
        grid=(B,),
        in_specs=[
            pl.BlockSpec((None, N, C), lambda b: (b, 0, 0)),
            pl.BlockSpec((1, C), rep2),
            pl.BlockSpec((1, C), rep2),
            pl.BlockSpec((num_heads, C, Hd), rep3),
            pl.BlockSpec((num_heads, 1, Hd), rep3),
            pl.BlockSpec((num_heads, Hd, C), rep3),
            pl.BlockSpec((num_heads, Hd, 1), rep3),
            pl.BlockSpec((num_heads, Hd, C), rep3),
            pl.BlockSpec((num_heads, Hd, 1), rep3),
        ],
        out_specs=pl.BlockSpec((None, C, N), lambda b: (b, 0, 0)),
        compiler_params=pltpu.CompilerParams(
            dimension_semantics=("parallel",),
            vmem_limit_bytes=_VMEM_LIMIT),
    )(x_tok, layer["ln1_g"], layer["ln1_b"], layer["wq"], layer["bq"],
      layer["wkT"], layer["bkT"], layer["wvT"], layer["bvT"])


# ---------------------------------------------------------------------------
# Kernel B: out-proj + residual + LayerNorm2 + MLP(GELU) + residual
#           (+ fused final LayerNorm on the last layer)
# Row-tiled over tokens; all weights stay resident in VMEM across the grid.
# ---------------------------------------------------------------------------
def _ffn_block_kernel(x_ref, y_ref, wp_ref, bp_ref, g2_ref, b2_ref,
                      w1_ref, b1_ref, w2_ref, b2m_ref, *rest, fuse_final_ln):
    if fuse_final_ln:
        gf_ref, bf_ref, o_ref = rest
    else:
        (o_ref,) = rest
    x = x_ref[...].astype(jnp.float32)                       # (tm, C) residual stream
    a = x + _mm(y_ref[...], wp_ref[...]) + bp_ref[...]       # x + proj(attn); drop(p=0)=id
    an = _layer_norm(a, g2_ref[...], b2_ref[...])            # norm2
    hmid = _gelu_exact(_mm(an, w1_ref[...]) + b1_ref[...])   # (tm, 4C)
    out = a + _mm(hmid, w2_ref[...]) + b2m_ref[...]          # + mlp
    if fuse_final_ln:
        out = _layer_norm(out, gf_ref[...], bf_ref[...])     # encoder-final norm, fused
    o_ref[...] = out.astype(o_ref.dtype)


def ffn_block(x_tok, y2, layer, final_ln=None):
    B, N, C = x_tok.shape
    M = B * N
    Ch = layer["mlp_w1"].shape[1]
    tm, M_pad = _row_tiling(M)
    x2 = x_tok.reshape(M, C)
    if M_pad != M:
        x2 = jnp.pad(x2, ((0, M_pad - M), (0, 0)))
        y2 = jnp.pad(y2, ((0, M_pad - M), (0, 0)))

    fuse = final_ln is not None
    row = lambda i: (i, 0)
    rep = lambda i: (0, 0)
    operands = [x2, y2, layer["proj_w"], layer["proj_b"], layer["ln2_g"],
                layer["ln2_b"], layer["mlp_w1"], layer["mlp_b1"],
                layer["mlp_w2"], layer["mlp_b2"]]
    in_specs = [
        pl.BlockSpec((tm, C), row),
        pl.BlockSpec((tm, C), row),
        pl.BlockSpec((C, C), rep),
        pl.BlockSpec((1, C), rep),
        pl.BlockSpec((1, C), rep),
        pl.BlockSpec((1, C), rep),
        pl.BlockSpec((C, Ch), rep),
        pl.BlockSpec((1, Ch), rep),
        pl.BlockSpec((Ch, C), rep),
        pl.BlockSpec((1, C), rep),
    ]
    if fuse:
        operands += [final_ln[0], final_ln[1]]
        in_specs += [pl.BlockSpec((1, C), rep), pl.BlockSpec((1, C), rep)]

    out = pl.pallas_call(
        functools.partial(_ffn_block_kernel, fuse_final_ln=fuse),
        out_shape=jax.ShapeDtypeStruct((M_pad, C), jnp.float32),
        grid=(M_pad // tm,),
        in_specs=in_specs,
        out_specs=pl.BlockSpec((tm, C), row),
        compiler_params=pltpu.CompilerParams(
            dimension_semantics=("parallel",),
            vmem_limit_bytes=_VMEM_LIMIT),
    )(*operands)
    if M_pad != M:
        out = out[:M]
    return out.reshape(B, N, C)


# ---------------------------------------------------------------------------
# Standalone final LayerNorm (only used in the degenerate num_layers == 0 case;
# otherwise the final norm is fused into the last ffn_block call).
# ---------------------------------------------------------------------------
def _layernorm_kernel(x_ref, g_ref, b_ref, o_ref):
    o_ref[...] = _layer_norm(x_ref[...], g_ref[...], b_ref[...]).astype(o_ref.dtype)


def layernorm(x_tok, g, b):
    B, N, C = x_tok.shape
    M = B * N
    tm, M_pad = _row_tiling(M)
    x2 = x_tok.reshape(M, C)
    if M_pad != M:
        x2 = jnp.pad(x2, ((0, M_pad - M), (0, 0)))
    out = pl.pallas_call(
        _layernorm_kernel,
        out_shape=jax.ShapeDtypeStruct((M_pad, C), jnp.float32),
        grid=(M_pad // tm,),
        in_specs=[pl.BlockSpec((tm, C), lambda i: (i, 0)),
                  pl.BlockSpec((1, C), lambda i: (0, 0)),
                  pl.BlockSpec((1, C), lambda i: (0, 0))],
        out_specs=pl.BlockSpec((tm, C), lambda i: (i, 0)),
        compiler_params=pltpu.CompilerParams(
            dimension_semantics=("parallel",),
            vmem_limit_bytes=_VMEM_LIMIT),
    )(x2, g, b)
    if M_pad != M:
        out = out[:M]
    return out.reshape(B, N, C)


# ---------------------------------------------------------------------------
# Full TransformerEncoder3D forward  (x: (B, C, D, H, W), like the torch module)
# ---------------------------------------------------------------------------
def transformer_encoder3d_forward(x, prepared, num_heads):
    B, C, D, H, W = x.shape
    N = D * H * W
    t = jnp.transpose(x, (0, 2, 3, 4, 1)).reshape(B, N, C)   # boundary transpose, once
    layers = prepared["layers"]
    n_layers = len(layers)
    for li, layer in enumerate(layers):
        o = attention_core(t, layer, num_heads)              # (B, C, N) bf16 head-major
        # torch: (attn@v).transpose(2,3).contiguous().view(B,D,H,W,C) -- the kernel
        # already wrote the (nh, hd, N) layout; this reshape is the one remaining XLA
        # relayout between kernels (bf16 halves its HBM traffic).
        y2 = o.reshape(B * N, C)
        fin = ((prepared["norm_g"], prepared["norm_b"])
               if li == n_layers - 1 else None)
        t = ffn_block(t, y2, layer, final_ln=fin)             # proj+res+LN2+MLP+res(+LNf)
    if n_layers == 0:
        t = layernorm(t, prepared["norm_g"], prepared["norm_b"])
    return jnp.transpose(t.reshape(B, D, H, W, C), (0, 4, 1, 2, 3))


# ---------------------------------------------------------------------------
# One-time parameter preparation (outside jit): split/transpose/head-block the
# qkv weights, fold the 1/sqrt(Hd) scale into Wq/bq, cast matmul weights to bf16.
# ---------------------------------------------------------------------------
def prepare_params(params, num_heads):
    layers = []
    for lp in params["layers"]:
        C = lp["qkv_w"].shape[0]
        Hd = C // num_heads
        scale = float(Hd) ** -0.5
        wq = lp["qkv_w"][:, :C] * scale
        bq = lp["qkv_b"][:, :C] * scale
        wk = lp["qkv_w"][:, C:2 * C]
        bk = lp["qkv_b"][:, C:2 * C]
        wv = lp["qkv_w"][:, 2 * C:]
        bv = lp["qkv_b"][:, 2 * C:]
        layers.append({
            "ln1_g": lp["ln1_g"], "ln1_b": lp["ln1_b"],
            # head-blocked: per-head access is leading-axis indexing inside the kernel
            "wq":  wq.reshape(C, num_heads, Hd).transpose(1, 0, 2).astype(_PARAM_DTYPE),
            "bq":  bq.reshape(num_heads, 1, Hd).astype(jnp.float32),
            "wkT": wk.T.reshape(num_heads, Hd, C).astype(_PARAM_DTYPE),
            "bkT": bk.reshape(num_heads, Hd, 1).astype(jnp.float32),
            "wvT": wv.T.reshape(num_heads, Hd, C).astype(_PARAM_DTYPE),
            "bvT": bv.reshape(num_heads, Hd, 1).astype(jnp.float32),
            "proj_w": lp["proj_w"].astype(_PARAM_DTYPE), "proj_b": lp["proj_b"],
            "ln2_g": lp["ln2_g"], "ln2_b": lp["ln2_b"],
            "mlp_w1": lp["mlp_w1"].astype(_PARAM_DTYPE), "mlp_b1": lp["mlp_b1"],
            "mlp_w2": lp["mlp_w2"].astype(_PARAM_DTYPE), "mlp_b2": lp["mlp_b2"],
        })
    return {"layers": layers,
            "norm_g": params["norm_g"], "norm_b": params["norm_b"]}


# ---------------------------------------------------------------------------
# Pure-JAX f32 reference replicating the torch module op-for-op
# ---------------------------------------------------------------------------
def transformer_encoder3d_reference(x, params, num_heads):
    B, C, D, H, W = x.shape
    N = D * H * W
    Hd = C // num_heads
    scale = float(Hd) ** -0.5

    def ln(v, g, b):
        mu = jnp.mean(v, axis=-1, keepdims=True)
        var = jnp.mean((v - mu) ** 2, axis=-1, keepdims=True)
        return (v - mu) / jnp.sqrt(var + _LN_EPS) * g + b

    t = jnp.transpose(x, (0, 2, 3, 4, 1)).reshape(B, N, C)
    for lp in params["layers"]:
        tn = ln(t, lp["ln1_g"], lp["ln1_b"])
        qkv = tn.reshape(B * N, C) @ lp["qkv_w"] + lp["qkv_b"]
        qkv = qkv.reshape(B, N, 3, num_heads, Hd).transpose(2, 0, 3, 1, 4)
        q, k, v = qkv[0], qkv[1], qkv[2]
        s = jnp.einsum("bhnd,bhmd->bhnm", q, k) * scale
        p = jax.nn.softmax(s, axis=-1)
        o = jnp.einsum("bhnm,bhmd->bhnd", p, v)
        o = jnp.swapaxes(o, 2, 3)                           # torch .transpose(2, 3)
        y = o.reshape(B * N, C)                             # .contiguous().view(...)
        a = t.reshape(B * N, C) + (y @ lp["proj_w"] + lp["proj_b"])
        a = a.reshape(B, N, C)
        an = ln(a, lp["ln2_g"], lp["ln2_b"])
        h = jax.nn.gelu(an.reshape(B * N, C) @ lp["mlp_w1"] + lp["mlp_b1"],
                        approximate=False)
        t = a + (h @ lp["mlp_w2"] + lp["mlp_b2"]).reshape(B, N, C)
    t = ln(t, params["norm_g"], params["norm_b"])
    return jnp.transpose(t.reshape(B, D, H, W, C), (0, 4, 1, 2, 3))


# ---------------------------------------------------------------------------
# Parameters (stored in x @ W layout, i.e. torch weight transposed at init)
# ---------------------------------------------------------------------------
def init_params(key, embed_dim, num_layers):
    C = embed_dim

    def dense(k, shape):
        return 0.02 * jax.random.normal(k, shape, jnp.float32)

    layers = []
    for _ in range(num_layers):
        key, *ks = jax.random.split(key, 13)
        layers.append({
            "ln1_g": 1.0 + 0.05 * jax.random.normal(ks[0], (1, C), jnp.float32),
            "ln1_b": 0.05 * jax.random.normal(ks[1], (1, C), jnp.float32),
            "qkv_w": dense(ks[2], (C, 3 * C)),
            "qkv_b": dense(ks[3], (1, 3 * C)),
            "proj_w": dense(ks[4], (C, C)),
            "proj_b": dense(ks[5], (1, C)),
            "ln2_g": 1.0 + 0.05 * jax.random.normal(ks[6], (1, C), jnp.float32),
            "ln2_b": 0.05 * jax.random.normal(ks[7], (1, C), jnp.float32),
            "mlp_w1": dense(ks[8], (C, 4 * C)),
            "mlp_b1": dense(ks[9], (1, 4 * C)),
            "mlp_w2": dense(ks[10], (4 * C, C)),
            "mlp_b2": dense(ks[11], (1, C)),
        })
    k1, k2 = jax.random.split(key)
    return {
        "layers": layers,
        "norm_g": 1.0 + 0.05 * jax.random.normal(k1, (1, C), jnp.float32),
        "norm_b": 0.05 * jax.random.normal(k2, (1, C), jnp.float32),
    }


if __name__ == "__main__":
    # Small shapes consistent with the module: embed_dim=128, num_heads=4,
    # num_layers=2, spatial volume 2x4x4 (N=32 tokens), batch 2.
    B, C, D, H, W = 2, 128, 2, 4, 4
    num_heads = 4
    num_layers = 2

    key = jax.random.PRNGKey(0)
    kx, kp = jax.random.split(key)
    x = jax.random.normal(kx, (B, C, D, H, W), jnp.float32)
    params = init_params(kp, C, num_layers)
    prepared = prepare_params(params, num_heads)           # once, outside jit

    fwd = jax.jit(functools.partial(transformer_encoder3d_forward,
                                    num_heads=num_heads))
    out = jax.block_until_ready(fwd(x, prepared))

    ref = transformer_encoder3d_reference(x, params, num_heads)
    assert out.shape == (B, C, D, H, W)
    max_err = float(jnp.max(jnp.abs(out - ref)))
    # bf16 weights / MXU inputs (f32 accumulation, f32 residual stream): loose tolerance.
    assert max_err < 2e-2, f"mismatch vs f32 reference, max abs err {max_err}"

    print("KERNEL_OK")
</pallas_src>

<mosaic_0001>
module attributes {stable_mosaic.version = 11 : i64} {
  func.func @_attn_core_kernel(%arg0: i32, %arg1: memref<1x32x128xf32, #tpu.memory_space<vmem>>, %arg2: memref<1x128xf32, #tpu.memory_space<vmem>>, %arg3: memref<1x128xf32, #tpu.memory_space<vmem>>, %arg4: memref<4x128x32xbf16, #tpu.memory_space<vmem>>, %arg5: memref<4x1x32xf32, #tpu.memory_space<vmem>>, %arg6: memref<4x32x128xbf16, #tpu.memory_space<vmem>>, %arg7: memref<4x32x1xf32, #tpu.memory_space<vmem>>, %arg8: memref<4x32x128xbf16, #tpu.memory_space<vmem>>, %arg9: memref<4x32x1xf32, #tpu.memory_space<vmem>>, %arg10: memref<1x128x32xbf16, #tpu.memory_space<vmem>>) attributes {dimension_semantics = [#tpu.dimension_semantics<parallel>], iteration_bounds = array<i64: 2>, scalar_prefetch = 0 : i64, scratch_operands = 0 : i64, tpu.core_type = #tpu.core_type<tc>, window_params = [{transform_indices = @transform_0, window_bounds = array<i64: 1, 32, 128>}, {pipeline_mode = #tpu.pipeline_mode<synchronous>, transform_indices = @transform_1, window_bounds = array<i64: 1, 128>}, {pipeline_mode = #tpu.pipeline_mode<synchronous>, transform_indices = @transform_2, window_bounds = array<i64: 1, 128>}, {pipeline_mode = #tpu.pipeline_mode<synchronous>, transform_indices = @transform_3, window_bounds = array<i64: 4, 128, 32>}, {pipeline_mode = #tpu.pipeline_mode<synchronous>, transform_indices = @transform_4, window_bounds = array<i64: 4, 1, 32>}, {pipeline_mode = #tpu.pipeline_mode<synchronous>, transform_indices = @transform_5, window_bounds = array<i64: 4, 32, 128>}, {pipeline_mode = #tpu.pipeline_mode<synchronous>, transform_indices = @transform_6, window_bounds = array<i64: 4, 32, 1>}, {pipeline_mode = #tpu.pipeline_mode<synchronous>, transform_indices = @transform_7, window_bounds = array<i64: 4, 32, 128>}, {pipeline_mode = #tpu.pipeline_mode<synchronous>, transform_indices = @transform_8, window_bounds = array<i64: 4, 32, 1>}, {transform_indices = @transform_9, window_bounds = array<i64: 1, 128, 32>}]} {
    %c0 = arith.constant 0 : index
    %c0_0 = arith.constant 0 : index
    %c0_1 = arith.constant 0 : index
    %0 = vector.load %arg1[%c0, %c0_0, %c0_1] : memref<1x32x128xf32, #tpu.memory_space<vmem>>, vector<1x32x128xf32>
    %1 = vector.shape_cast %0 : vector<1x32x128xf32> to vector<32x128xf32>
    %c0_2 = arith.constant 0 : index
    %c0_3 = arith.constant 0 : index
    %2 = vector.load %arg2[%c0_2, %c0_3] : memref<1x128xf32, #tpu.memory_space<vmem>>, vector<1x128xf32>
    %c0_4 = arith.constant 0 : index
    %c0_5 = arith.constant 0 : index
    %3 = vector.load %arg3[%c0_4, %c0_5] : memref<1x128xf32, #tpu.memory_space<vmem>>, vector<1x128xf32>
    %cst = arith.constant dense<0.000000e+00> : vector<32xf32>
    %4 = vector.multi_reduction <add>, %1, %cst [1] : vector<32x128xf32> to vector<32xf32>
    %5 = vector.shape_cast %4 : vector<32xf32> to vector<32x1xf32>
    %cst_6 = arith.constant 1.280000e+02 : f32
    %6 = vector.broadcast %cst_6 : f32 to vector<32x1xf32>
    %7 = arith.divf %5, %6 : vector<32x1xf32>
    %8 = vector.broadcast %7 : vector<32x1xf32> to vector<32x128xf32>
    %9 = arith.subf %1, %8 : vector<32x128xf32>
    %10 = arith.mulf %9, %9 : vector<32x128xf32>
    %cst_7 = arith.constant dense<0.000000e+00> : vector<32xf32>
    %11 = vector.multi_reduction <add>, %10, %cst_7 [1] : vector<32x128xf32> to vector<32xf32>
    %12 = vector.shape_cast %11 : vector<32xf32> to vector<32x1xf32>
    %cst_8 = arith.constant 1.280000e+02 : f32
    %13 = vector.broadcast %cst_8 : f32 to vector<32x1xf32>
    %14 = arith.divf %12, %13 : vector<32x1xf32>
    %cst_9 = arith.constant 9.99999974E-6 : f32
    %15 = vector.broadcast %cst_9 : f32 to vector<32x1xf32>
    %16 = arith.addf %14, %15 : vector<32x1xf32>
    %17 = math.rsqrt %16 : vector<32x1xf32>
    %18 = vector.broadcast %17 : vector<32x1xf32> to vector<32x128xf32>
    %19 = arith.mulf %9, %18 : vector<32x128xf32>
    %20 = vector.broadcast %2 : vector<1x128xf32> to vector<32x128xf32>
    %21 = arith.mulf %19, %20 : vector<32x128xf32>
    %22 = vector.broadcast %3 : vector<1x128xf32> to vector<32x128xf32>
    %23 = arith.addf %21, %22 : vector<32x128xf32>
    %24 = arith.truncf %23 : vector<32x128xf32> to vector<32x128xbf16>
    %cst_10 = arith.constant 1.000000e+00 : f32
    %25 = vector.broadcast %cst_10 : f32 to vector<1x32xf32>
    %c0_i32 = arith.constant 0 : i32
    %c4_i32 = arith.constant 4 : i32
    %26 = arith.addi %c0_i32, %c4_i32 : i32
    %c1_i32 = arith.constant 1 : i32
    scf.for %arg11 = %c0_i32 to %26 step %c1_i32  : i32 {
      %27 = arith.index_cast %arg11 : i32 to index
      %c0_12 = arith.constant 0 : index
      %c0_13 = arith.constant 0 : index
      %28 = vector.load %arg4[%27, %c0_12, %c0_13] : memref<4x128x32xbf16, #tpu.memory_space<vmem>>, vector<1x128x32xbf16>
      %29 = vector.shape_cast %28 : vector<1x128x32xbf16> to vector<128x32xbf16>
      %cst_14 = arith.constant dense<0.000000e+00> : vector<32x32xf32>
      %30 = tpu.matmul %24, %29, %cst_14 {dimension_numbers = #tpu.dot_dimension_numbers<[1], [0], [0], [1], [0, 0, 1, 1], [], []>} : vector<32x128xbf16>, vector<128x32xbf16>, vector<32x32xf32> -> vector<32x32xf32>
      %31 = arith.index_cast %arg11 : i32 to index
      %c0_15 = arith.constant 0 : index
      %c0_16 = arith.constant 0 : index
      %32 = vector.load %arg5[%31, %c0_15, %c0_16] : memref<4x1x32xf32, #tpu.memory_space<vmem>>, vector<1x1x32xf32>
      %33 = vector.shape_cast %32 : vector<1x1x32xf32> to vector<1x32xf32>
      %34 = vector.broadcast %33 : vector<1x32xf32> to vector<32x32xf32>
      %35 = arith.addf %30, %34 : vector<32x32xf32>
      %36 = arith.index_cast %arg11 : i32 to index
      %c0_17 = arith.constant 0 : index
      %c0_18 = arith.constant 0 : index
      %37 = vector.load %arg6[%36, %c0_17, %c0_18] : memref<4x32x128xbf16, #tpu.memory_space<vmem>>, vector<1x32x128xbf16>
      %38 = vector.shape_cast %37 : vector<1x32x128xbf16> to vector<32x128xbf16>
      %cst_19 = arith.constant dense<0.000000e+00> : vector<32x32xf32>
      %39 = tpu.matmul %38, %24, %cst_19 {dimension_numbers = #tpu.dot_dimension_numbers<[1], [1], [0], [0], [0, 0, 1, 0], [], []>} : vector<32x128xbf16>, vector<32x128xbf16>, vector<32x32xf32> -> vector<32x32xf32>
      %40 = arith.index_cast %arg11 : i32 to index
      %c0_20 = arith.constant 0 : index
      %c0_21 = arith.constant 0 : index
      %41 = vector.load %arg7[%40, %c0_20, %c0_21] : memref<4x32x1xf32, #tpu.memory_space<vmem>>, vector<1x32x1xf32>
      %42 = vector.shape_cast %41 : vector<1x32x1xf32> to vector<32x1xf32>
      %43 = vector.broadcast %42 : vector<32x1xf32> to vector<32x32xf32>
      %44 = arith.addf %39, %43 : vector<32x32xf32>
      %45 = arith.index_cast %arg11 : i32 to index
      %c0_22 = arith.constant 0 : index
      %c0_23 = arith.constant 0 : index
      %46 = vector.load %arg8[%45, %c0_22, %c0_23] : memref<4x32x128xbf16, #tpu.memory_space<vmem>>, vector<1x32x128xbf16>
      %47 = vector.shape_cast %46 : vector<1x32x128xbf16> to vector<32x128xbf16>
      %cst_24 = arith.constant dense<0.000000e+00> : vector<32x32xf32>
      %48 = tpu.matmul %47, %24, %cst_24 {dimension_numbers = #tpu.dot_dimension_numbers<[1], [1], [0], [0], [0, 0, 1, 0], [], []>} : vector<32x128xbf16>, vector<32x128xbf16>, vector<32x32xf32> -> vector<32x32xf32>
      %49 = arith.index_cast %arg11 : i32 to index
      %c0_25 = arith.constant 0 : index
      %c0_26 = arith.constant 0 : index
      %50 = vector.load %arg9[%49, %c0_25, %c0_26] : memref<4x32x1xf32, #tpu.memory_space<vmem>>, vector<1x32x1xf32>
      %51 = vector.shape_cast %50 : vector<1x32x1xf32> to vector<32x1xf32>
      %52 = vector.broadcast %51 : vector<32x1xf32> to vector<32x32xf32>
      %53 = arith.addf %48, %52 : vector<32x32xf32>
      %54 = arith.truncf %35 : vector<32x32xf32> to vector<32x32xbf16>
      %55 = arith.truncf %44 : vector<32x32xf32> to vector<32x32xbf16>
      %cst_27 = arith.constant dense<0.000000e+00> : vector<32x32xf32>
      %56 = tpu.matmul %54, %55, %cst_27 {dimension_numbers = #tpu.dot_dimension_numbers<[1], [0], [0], [1], [0, 0, 1, 1], [], []>} : vector<32x32xbf16>, vector<32x32xbf16>, vector<32x32xf32> -> vector<32x32xf32>
      %cst_28 = arith.constant dense<0xFF800000> : vector<32xf32>
      %57 = vector.multi_reduction <maximumf>, %56, %cst_28 [1] : vector<32x32xf32> to vector<32xf32>
      %58 = vector.shape_cast %57 : vector<32xf32> to vector<32x1xf32>
      %59 = vector.broadcast %58 : vector<32x1xf32> to vector<32x32xf32>
      %60 = arith.subf %56, %59 : vector<32x32xf32>
      %61 = math.exp %60 : vector<32x32xf32>
      %62 = arith.truncf %25 : vector<1x32xf32> to vector<1x32xbf16>
      %63 = arith.truncf %61 : vector<32x32xf32> to vector<32x32xbf16>
      %cst_29 = arith.constant dense<0.000000e+00> : vector<1x32xf32>
      %64 = tpu.matmul %62, %63, %cst_29 {dimension_numbers = #tpu.dot_dimension_numbers<[1], [1], [0], [0], [0, 0, 1, 0], [], []>} : vector<1x32xbf16>, vector<32x32xbf16>, vector<1x32xf32> -> vector<1x32xf32>
      %65 = arith.truncf %53 : vector<32x32xf32> to vector<32x32xbf16>
      %66 = arith.truncf %61 : vector<32x32xf32> to vector<32x32xbf16>
      %cst_30 = arith.constant dense<0.000000e+00> : vector<32x32xf32>
      %67 = tpu.matmul %65, %66, %cst_30 {dimension_numbers = #tpu.dot_dimension_numbers<[1], [1], [0], [0], [0, 0, 1, 0], [], []>} : vector<32x32xbf16>, vector<32x32xbf16>, vector<32x32xf32> -> vector<32x32xf32>
      %68 = tpu.reciprocal %64 {approx = true} : vector<1x32xf32> -> vector<1x32xf32>
      %69 = vector.broadcast %68 : vector<1x32xf32> to vector<32x32xf32>
      %70 = arith.mulf %67, %69 : vector<32x32xf32>
      %c32_i32 = arith.constant 32 : i32
      %71 = arith.muli %arg11, %c32_i32 : i32
      %72 = tpu.assume_multiple %71, 32 : i32
      %73 = arith.truncf %70 : vector<32x32xf32> to vector<32x32xbf16>
      %c0_31 = arith.constant 0 : index
      %74 = arith.index_cast %72 : i32 to index
      %c0_32 = arith.constant 0 : index
      %75 = vector.load %arg10[%c0_31, %74, %c0_32] : memref<1x128x32xbf16, #tpu.memory_space<vmem>>, vector<1x32x32xbf16>
      %76 = vector.shape_cast %75 : vector<1x32x32xbf16> to vector<32x32xbf16>
      %77 = vector.shape_cast %73 : vector<32x32xbf16> to vector<1x32x32xbf16>
      tpu.vector_store %arg10[%c0_31, %74, %c0_32], %77 {strides = array<i32>} : memref<1x128x32xbf16, #tpu.memory_space<vmem>>, vector<1x32x32xbf16>,
    }
    %c4_i32_11 = arith.constant 4 : i32
    return
  }
  func.func @transform_0(%arg0: i32) -> (i32, i32, i32) {
    %c0_i32 = arith.constant 0 : i32
    %c0_i32_0 = arith.constant 0 : i32
    %c0_i32_1 = arith.constant 0 : i32
    return %arg0, %c0_i32, %c0_i32_0 : i32, i32, i32
  }
  func.func @transform_1(%arg0: i32) -> (i32, i32) {
    %c0_i32 = arith.constant 0 : i32
    %c0_i32_0 = arith.constant 0 : i32
    %c0_i32_1 = arith.constant 0 : i32
    return %c0_i32, %c0_i32_0 : i32, i32
  }
  func.func @transform_2(%arg0: i32) -> (i32, i32) {
    %c0_i32 = arith.constant 0 : i32
    %c0_i32_0 = arith.constant 0 : i32
    %c0_i32_1 = arith.constant 0 : i32
    return %c0_i32, %c0_i32_0 : i32, i32
  }
  func.func @transform_3(%arg0: i32) -> (i32, i32, i32) {
    %c0_i32 = arith.constant 0 : i32
    %c0_i32_0 = arith.constant 0 : i32
    %c0_i32_1 = arith.constant 0 : i32
    %c0_i32_2 = arith.constant 0 : i32
    return %c0_i32, %c0_i32_0, %c0_i32_1 : i32, i32, i32
  }
  func.func @transform_4(%arg0: i32) -> (i32, i32, i32) {
    %c0_i32 = arith.constant 0 : i32
    %c0_i32_0 = arith.constant 0 : i32
    %c0_i32_1 = arith.constant 0 : i32
    %c0_i32_2 = arith.constant 0 : i32
    return %c0_i32, %c0_i32_0, %c0_i32_1 : i32, i32, i32
  }
  func.func @transform_5(%arg0: i32) -> (i32, i32, i32) {
    %c0_i32 = arith.constant 0 : i32
    %c0_i32_0 = arith.constant 0 : i32
    %c0_i32_1 = arith.constant 0 : i32
    %c0_i32_2 = arith.constant 0 : i32
    return %c0_i32, %c0_i32_0, %c0_i32_1 : i32, i32, i32
  }
  func.func @transform_6(%arg0: i32) -> (i32, i32, i32) {
    %c0_i32 = arith.constant 0 : i32
    %c0_i32_0 = arith.constant 0 : i32
    %c0_i32_1 = arith.constant 0 : i32
    %c0_i32_2 = arith.constant 0 : i32
    return %c0_i32, %c0_i32_0, %c0_i32_1 : i32, i32, i32
  }
  func.func @transform_7(%arg0: i32) -> (i32, i32, i32) {
    %c0_i32 = arith.constant 0 : i32
    %c0_i32_0 = arith.constant 0 : i32
    %c0_i32_1 = arith.constant 0 : i32
    %c0_i32_2 = arith.constant 0 : i32
    return %c0_i32, %c0_i32_0, %c0_i32_1 : i32, i32, i32
  }
  func.func @transform_8(%arg0: i32) -> (i32, i32, i32) {
    %c0_i32 = arith.constant 0 : i32
    %c0_i32_0 = arith.constant 0 : i32
    %c0_i32_1 = arith.constant 0 : i32
    %c0_i32_2 = arith.constant 0 : i32
    return %c0_i32, %c0_i32_0, %c0_i32_1 : i32, i32, i32
  }
  func.func @transform_9(%arg0: i32) -> (i32, i32, i32) {
    %c0_i32 = arith.constant 0 : i32
    %c0_i32_0 = arith.constant 0 : i32
    %c0_i32_1 = arith.constant 0 : i32
    return %arg0, %c0_i32, %c0_i32_0 : i32, i32, i32
  }
}

module attributes {stable_mosaic.version = 11 : i64} {
  func.func @_ffn_block_kernel(%arg0: i32, %arg1: memref<64x128xf32, #tpu.memory_space<vmem>>, %arg2: memref<64x128xbf16, #tpu.memory_space<vmem>>, %arg3: memref<128x128xbf16, #tpu.memory_space<vmem>>, %arg4: memref<1x128xf32, #tpu.memory_space<vmem>>, %arg5: memref<1x128xf32, #tpu.memory_space<vmem>>, %arg6: memref<1x128xf32, #tpu.memory_space<vmem>>, %arg7: memref<128x512xbf16, #tpu.memory_space<vmem>>, %arg8: memref<1x512xf32, #tpu.memory_space<vmem>>, %arg9: memref<512x128xbf16, #tpu.memory_space<vmem>>, %arg10: memref<1x128xf32, #tpu.memory_space<vmem>>, %arg11: memref<64x128xf32, #tpu.memory_space<vmem>>) attributes {dimension_semantics = [#tpu.dimension_semantics<parallel>], iteration_bounds = array<i64: 1>, scalar_prefetch = 0 : i64, scratch_operands = 0 : i64, tpu.core_type = #tpu.core_type<tc>, window_params = [{transform_indices = @transform_0, window_bounds = array<i64: 64, 128>}, {transform_indices = @transform_1, window_bounds = array<i64: 64, 128>}, {pipeline_mode = #tpu.pipeline_mode<synchronous>, transform_indices = @transform_2, window_bounds = array<i64: 128, 128>}, {pipeline_mode = #tpu.pipeline_mode<synchronous>, transform_indices = @transform_3, window_bounds = array<i64: 1, 128>}, {pipeline_mode = #tpu.pipeline_mode<synchronous>, transform_indices = @transform_4, window_bounds = array<i64: 1, 128>}, {pipeline_mode = #tpu.pipeline_mode<synchronous>, transform_indices = @transform_5, window_bounds = array<i64: 1, 128>}, {pipeline_mode = #tpu.pipeline_mode<synchronous>, transform_indices = @transform_6, window_bounds = array<i64: 128, 512>}, {pipeline_mode = #tpu.pipeline_mode<synchronous>, transform_indices = @transform_7, window_bounds = array<i64: 1, 512>}, {pipeline_mode = #tpu.pipeline_mode<synchronous>, transform_indices = @transform_8, window_bounds = array<i64: 512, 128>}, {pipeline_mode = #tpu.pipeline_mode<synchronous>, transform_indices = @transform_9, window_bounds = array<i64: 1, 128>}, {transform_indices = @transform_10, window_bounds = array<i64: 64, 128>}]} {
    %c0 = arith.constant 0 : index
    %c0_0 = arith.constant 0 : index
    %0 = vector.load %arg1[%c0, %c0_0] : memref<64x128xf32, #tpu.memory_space<vmem>>, vector<64x128xf32>
    %c0_1 = arith.constant 0 : index
    %c0_2 = arith.constant 0 : index
    %1 = vector.load %arg2[%c0_1, %c0_2] : memref<64x128xbf16, #tpu.memory_space<vmem>>, vector<64x128xbf16>
    %c0_3 = arith.constant 0 : index
    %c0_4 = arith.constant 0 : index
    %2 = vector.load %arg3[%c0_3, %c0_4] : memref<128x128xbf16, #tpu.memory_space<vmem>>, vector<128x128xbf16>
    %cst = arith.constant dense<0.000000e+00> : vector<64x128xf32>
    %3 = tpu.matmul %1, %2, %cst {dimension_numbers = #tpu.dot_dimension_numbers<[1], [0], [0], [1], [0, 0, 1, 1], [], []>} : vector<64x128xbf16>, vector<128x128xbf16>, vector<64x128xf32> -> vector<64x128xf32>
    %4 = arith.addf %0, %3 : vector<64x128xf32>
    %c0_5 = arith.constant 0 : index
    %c0_6 = arith.constant 0 : index
    %5 = vector.load %arg4[%c0_5, %c0_6] : memref<1x128xf32, #tpu.memory_space<vmem>>, vector<1x128xf32>
    %6 = vector.broadcast %5 : vector<1x128xf32> to vector<64x128xf32>
    %7 = arith.addf %4, %6 : vector<64x128xf32>
    %c0_7 = arith.constant 0 : index
    %c0_8 = arith.constant 0 : index
    %8 = vector.load %arg5[%c0_7, %c0_8] : memref<1x128xf32, #tpu.memory_space<vmem>>, vector<1x128xf32>
    %c0_9 = arith.constant 0 : index
    %c0_10 = arith.constant 0 : index
    %9 = vector.load %arg6[%c0_9, %c0_10] : memref<1x128xf32, #tpu.memory_space<vmem>>, vector<1x128xf32>
    %cst_11 = arith.constant dense<0.000000e+00> : vector<64xf32>
    %10 = vector.multi_reduction <add>, %7, %cst_11 [1] : vector<64x128xf32> to vector<64xf32>
    %11 = vector.shape_cast %10 : vector<64xf32> to vector<64x1xf32>
    %cst_12 = arith.constant 1.280000e+02 : f32
    %12 = vector.broadcast %cst_12 : f32 to vector<64x1xf32>
    %13 = arith.divf %11, %12 : vector<64x1xf32>
    %14 = vector.broadcast %13 : vector<64x1xf32> to vector<64x128xf32>
    %15 = arith.subf %7, %14 : vector<64x128xf32>
    %16 = arith.mulf %15, %15 : vector<64x128xf32>
    %cst_13 = arith.constant dense<0.000000e+00> : vector<64xf32>
    %17 = vector.multi_reduction <add>, %16, %cst_13 [1] : vector<64x128xf32> to vector<64xf32>
    %18 = vector.shape_cast %17 : vector<64xf32> to vector<64x1xf32>
    %cst_14 = arith.constant 1.280000e+02 : f32
    %19 = vector.broadcast %cst_14 : f32 to vector<64x1xf32>
    %20 = arith.divf %18, %19 : vector<64x1xf32>
    %cst_15 = arith.constant 9.99999974E-6 : f32
    %21 = vector.broadcast %cst_15 : f32 to vector<64x1xf32>
    %22 = arith.addf %20, %21 : vector<64x1xf32>
    %23 = math.rsqrt %22 : vector<64x1xf32>
    %24 = vector.broadcast %23 : vector<64x1xf32> to vector<64x128xf32>
    %25 = arith.mulf %15, %24 : vector<64x128xf32>
    %26 = vector.broadcast %8 : vector<1x128xf32> to vector<64x128xf32>
    %27 = arith.mulf %25, %26 : vector<64x128xf32>
    %28 = vector.broadcast %9 : vector<1x128xf32> to vector<64x128xf32>
    %29 = arith.addf %27, %28 : vector<64x128xf32>
    %c0_16 = arith.constant 0 : index
    %c0_17 = arith.constant 0 : index
    %30 = vector.load %arg7[%c0_16, %c0_17] : memref<128x512xbf16, #tpu.memory_space<vmem>>, vector<128x512xbf16>
    %31 = arith.truncf %29 : vector<64x128xf32> to vector<64x128xbf16>
    %cst_18 = arith.constant dense<0.000000e+00> : vector<64x512xf32>
    %32 = tpu.matmul %31, %30, %cst_18 {dimension_numbers = #tpu.dot_dimension_numbers<[1], [0], [0], [1], [0, 0, 1, 1], [], []>} : vector<64x128xbf16>, vector<128x512xbf16>, vector<64x512xf32> -> vector<64x512xf32>
    %c0_19 = arith.constant 0 : index
    %c0_20 = arith.constant 0 : index
    %33 = vector.load %arg8[%c0_19, %c0_20] : memref<1x512xf32, #tpu.memory_space<vmem>>, vector<1x512xf32>
    %34 = vector.broadcast %33 : vector<1x512xf32> to vector<64x512xf32>
    %35 = arith.addf %32, %34 : vector<64x512xf32>
    %cst_21 = arith.constant 5.000000e-01 : f32
    %36 = vector.broadcast %cst_21 : f32 to vector<64x512xf32>
    %37 = arith.mulf %36, %35 : vector<64x512xf32>
    %cst_22 = arith.constant 0.707106769 : f32
    %38 = vector.broadcast %cst_22 : f32 to vector<64x512xf32>
    %39 = arith.mulf %35, %38 : vector<64x512xf32>
    %40 = math.absf %39 : vector<64x512xf32>
    %cst_23 = arith.constant 0.327591091 : f32
    %41 = vector.broadcast %cst_23 : f32 to vector<64x512xf32>
    %42 = arith.mulf %41, %40 : vector<64x512xf32>
    %cst_24 = arith.constant 1.000000e+00 : f32
    %43 = vector.broadcast %cst_24 : f32 to vector<64x512xf32>
    %44 = arith.addf %43, %42 : vector<64x512xf32>
    %cst_25 = arith.constant 1.000000e+00 : f32
    %45 = vector.broadcast %cst_25 : f32 to vector<64x512xf32>
    %46 = arith.divf %45, %44 : vector<64x512xf32>
    %cst_26 = arith.constant 1.06140542 : f32
    %47 = vector.broadcast %cst_26 : f32 to vector<64x512xf32>
    %48 = arith.mulf %47, %46 : vector<64x512xf32>
    %cst_27 = arith.constant -1.45315206 : f32
    %49 = vector.broadcast %cst_27 : f32 to vector<64x512xf32>
    %50 = arith.addf %48, %49 : vector<64x512xf32>
    %51 = arith.mulf %50, %46 : vector<64x512xf32>
    %cst_28 = arith.constant 1.42141378 : f32
    %52 = vector.broadcast %cst_28 : f32 to vector<64x512xf32>
    %53 = arith.addf %51, %52 : vector<64x512xf32>
    %54 = arith.mulf %53, %46 : vector<64x512xf32>
    %cst_29 = arith.constant -0.284496725 : f32
    %55 = vector.broadcast %cst_29 : f32 to vector<64x512xf32>
    %56 = arith.addf %54, %55 : vector<64x512xf32>
    %57 = arith.mulf %56, %46 : vector<64x512xf32>
    %cst_30 = arith.constant 0.254829586 : f32
    %58 = vector.broadcast %cst_30 : f32 to vector<64x512xf32>
    %59 = arith.addf %57, %58 : vector<64x512xf32>
    %60 = arith.mulf %59, %46 : vector<64x512xf32>
    %61 = arith.mulf %40, %40 : vector<64x512xf32>
    %cst_31 = arith.constant 0.000000e+00 : f32
    %62 = vector.broadcast %cst_31 : f32 to vector<64x512xf32>
    %63 = arith.subf %62, %61 : vector<64x512xf32>
    %64 = math.exp %63 : vector<64x512xf32>
    %65 = arith.mulf %60, %64 : vector<64x512xf32>
    %cst_32 = arith.constant 1.000000e+00 : f32
    %66 = vector.broadcast %cst_32 : f32 to vector<64x512xf32>
    %67 = arith.subf %66, %65 : vector<64x512xf32>
    %cst_33 = arith.constant 0.000000e+00 : f32
    %68 = vector.broadcast %cst_33 : f32 to vector<64x512xf32>
    %69 = arith.cmpf oge, %39, %68 : vector<64x512xf32>
    %cst_34 = arith.constant 0.000000e+00 : f32
    %70 = vector.broadcast %cst_34 : f32 to vector<64x512xf32>
    %71 = arith.subf %70, %67 : vector<64x512xf32>
    %72 = arith.select %69, %67, %71 : vector<64x512xi1>, vector<64x512xf32>
    %cst_35 = arith.constant 1.000000e+00 : f32
    %73 = vector.broadcast %cst_35 : f32 to vector<64x512xf32>
    %74 = arith.addf %73, %72 : vector<64x512xf32>
    %75 = arith.mulf %37, %74 : vector<64x512xf32>
    %c0_36 = arith.constant 0 : index
    %c0_37 = arith.constant 0 : index
    %76 = vector.load %arg9[%c0_36, %c0_37] : memref<512x128xbf16, #tpu.memory_space<vmem>>, vector<512x128xbf16>
    %77 = arith.truncf %75 : vector<64x512xf32> to vector<64x512xbf16>
    %cst_38 = arith.constant dense<0.000000e+00> : vector<64x128xf32>
    %78 = tpu.matmul %77, %76, %cst_38 {dimension_numbers = #tpu.dot_dimension_numbers<[1], [0], [0], [1], [0, 0, 1, 1], [], []>} : vector<64x512xbf16>, vector<512x128xbf16>, vector<64x128xf32> -> vector<64x128xf32>
    %79 = arith.addf %7, %78 : vector<64x128xf32>
    %c0_39 = arith.constant 0 : index
    %c0_40 = arith.constant 0 : index
    %80 = vector.load %arg10[%c0_39, %c0_40] : memref<1x128xf32, #tpu.memory_space<vmem>>, vector<1x128xf32>
    %81 = vector.broadcast %80 : vector<1x128xf32> to vector<64x128xf32>
    %82 = arith.addf %79, %81 : vector<64x128xf32>
    %c0_41 = arith.constant 0 : index
    %c0_42 = arith.constant 0 : index
    %83 = vector.load %arg11[%c0_41, %c0_42] : memref<64x128xf32, #tpu.memory_space<vmem>>, vector<64x128xf32>
    tpu.vector_store %arg11[%c0_41, %c0_42], %82 {strides = array<i32>} : memref<64x128xf32, #tpu.memory_space<vmem>>, vector<64x128xf32>,
    return
  }
  func.func @transform_0(%arg0: i32) -> (i32, i32) {
    %c0_i32 = arith.constant 0 : i32
    %c0_i32_0 = arith.constant 0 : i32
    return %arg0, %c0_i32 : i32, i32
  }
  func.func @transform_1(%arg0: i32) -> (i32, i32) {
    %c0_i32 = arith.constant 0 : i32
    %c0_i32_0 = arith.constant 0 : i32
    return %arg0, %c0_i32 : i32, i32
  }
  func.func @transform_2(%arg0: i32) -> (i32, i32) {
    %c0_i32 = arith.constant 0 : i32
    %c0_i32_0 = arith.constant 0 : i32
    %c0_i32_1 = arith.constant 0 : i32
    return %c0_i32, %c0_i32_0 : i32, i32
  }
  func.func @transform_3(%arg0: i32) -> (i32, i32) {
    %c0_i32 = arith.constant 0 : i32
    %c0_i32_0 = arith.constant 0 : i32
    %c0_i32_1 = arith.constant 0 : i32
    return %c0_i32, %c0_i32_0 : i32, i32
  }
  func.func @transform_4(%arg0: i32) -> (i32, i32) {
    %c0_i32 = arith.constant 0 : i32
    %c0_i32_0 = arith.constant 0 : i32
    %c0_i32_1 = arith.constant 0 : i32
    return %c0_i32, %c0_i32_0 : i32, i32
  }
  func.func @transform_5(%arg0: i32) -> (i32, i32) {
    %c0_i32 = arith.constant 0 : i32
    %c0_i32_0 = arith.constant 0 : i32
    %c0_i32_1 = arith.constant 0 : i32
    return %c0_i32, %c0_i32_0 : i32, i32
  }
  func.func @transform_6(%arg0: i32) -> (i32, i32) {
    %c0_i32 = arith.constant 0 : i32
    %c0_i32_0 = arith.constant 0 : i32
    %c0_i32_1 = arith.constant 0 : i32
    return %c0_i32, %c0_i32_0 : i32, i32
  }
  func.func @transform_7(%arg0: i32) -> (i32, i32) {
    %c0_i32 = arith.constant 0 : i32
    %c0_i32_0 = arith.constant 0 : i32
    %c0_i32_1 = arith.constant 0 : i32
    return %c0_i32, %c0_i32_0 : i32, i32
  }
  func.func @transform_8(%arg0: i32) -> (i32, i32) {
    %c0_i32 = arith.constant 0 : i32
    %c0_i32_0 = arith.constant 0 : i32
    %c0_i32_1 = arith.constant 0 : i32
    return %c0_i32, %c0_i32_0 : i32, i32
  }
  func.func @transform_9(%arg0: i32) -> (i32, i32) {
    %c0_i32 = arith.constant 0 : i32
    %c0_i32_0 = arith.constant 0 : i32
    %c0_i32_1 = arith.constant 0 : i32
    return %c0_i32, %c0_i32_0 : i32, i32
  }
  func.func @transform_10(%arg0: i32) -> (i32, i32) {
    %c0_i32 = arith.constant 0 : i32
    %c0_i32_0 = arith.constant 0 : i32
    return %arg0, %c0_i32 : i32, i32
  }
}

module attributes {stable_mosaic.version = 11 : i64} {
  func.func @_ffn_block_kernel(%arg0: i32, %arg1: memref<64x128xf32, #tpu.memory_space<vmem>>, %arg2: memref<64x128xbf16, #tpu.memory_space<vmem>>, %arg3: memref<128x128xbf16, #tpu.memory_space<vmem>>, %arg4: memref<1x128xf32, #tpu.memory_space<vmem>>, %arg5: memref<1x128xf32, #tpu.memory_space<vmem>>, %arg6: memref<1x128xf32, #tpu.memory_space<vmem>>, %arg7: memref<128x512xbf16, #tpu.memory_space<vmem>>, %arg8: memref<1x512xf32, #tpu.memory_space<vmem>>, %arg9: memref<512x128xbf16, #tpu.memory_space<vmem>>, %arg10: memref<1x128xf32, #tpu.memory_space<vmem>>, %arg11: memref<1x128xf32, #tpu.memory_space<vmem>>, %arg12: memref<1x128xf32, #tpu.memory_space<vmem>>, %arg13: memref<64x128xf32, #tpu.memory_space<vmem>>) attributes {dimension_semantics = [#tpu.dimension_semantics<parallel>], iteration_bounds = array<i64: 1>, scalar_prefetch = 0 : i64, scratch_operands = 0 : i64, tpu.core_type = #tpu.core_type<tc>, window_params = [{transform_indices = @transform_0, window_bounds = array<i64: 64, 128>}, {transform_indices = @transform_1, window_bounds = array<i64: 64, 128>}, {pipeline_mode = #tpu.pipeline_mode<synchronous>, transform_indices = @transform_2, window_bounds = array<i64: 128, 128>}, {pipeline_mode = #tpu.pipeline_mode<synchronous>, transform_indices = @transform_3, window_bounds = array<i64: 1, 128>}, {pipeline_mode = #tpu.pipeline_mode<synchronous>, transform_indices = @transform_4, window_bounds = array<i64: 1, 128>}, {pipeline_mode = #tpu.pipeline_mode<synchronous>, transform_indices = @transform_5, window_bounds = array<i64: 1, 128>}, {pipeline_mode = #tpu.pipeline_mode<synchronous>, transform_indices = @transform_6, window_bounds = array<i64: 128, 512>}, {pipeline_mode = #tpu.pipeline_mode<synchronous>, transform_indices = @transform_7, window_bounds = array<i64: 1, 512>}, {pipeline_mode = #tpu.pipeline_mode<synchronous>, transform_indices = @transform_8, window_bounds = array<i64: 512, 128>}, {pipeline_mode = #tpu.pipeline_mode<synchronous>, transform_indices = @transform_9, window_bounds = array<i64: 1, 128>}, {pipeline_mode = #tpu.pipeline_mode<synchronous>, transform_indices = @transform_10, window_bounds = array<i64: 1, 128>}, {pipeline_mode = #tpu.pipeline_mode<synchronous>, transform_indices = @transform_11, window_bounds = array<i64: 1, 128>}, {transform_indices = @transform_12, window_bounds = array<i64: 64, 128>}]} {
    %c0 = arith.constant 0 : index
    %c0_0 = arith.constant 0 : index
    %0 = vector.load %arg1[%c0, %c0_0] : memref<64x128xf32, #tpu.memory_space<vmem>>, vector<64x128xf32>
    %c0_1 = arith.constant 0 : index
    %c0_2 = arith.constant 0 : index
    %1 = vector.load %arg2[%c0_1, %c0_2] : memref<64x128xbf16, #tpu.memory_space<vmem>>, vector<64x128xbf16>
    %c0_3 = arith.constant 0 : index
    %c0_4 = arith.constant 0 : index
    %2 = vector.load %arg3[%c0_3, %c0_4] : memref<128x128xbf16, #tpu.memory_space<vmem>>, vector<128x128xbf16>
    %cst = arith.constant dense<0.000000e+00> : vector<64x128xf32>
    %3 = tpu.matmul %1, %2, %cst {dimension_numbers = #tpu.dot_dimension_numbers<[1], [0], [0], [1], [0, 0, 1, 1], [], []>} : vector<64x128xbf16>, vector<128x128xbf16>, vector<64x128xf32> -> vector<64x128xf32>
    %4 = arith.addf %0, %3 : vector<64x128xf32>
    %c0_5 = arith.constant 0 : index
    %c0_6 = arith.constant 0 : index
    %5 = vector.load %arg4[%c0_5, %c0_6] : memref<1x128xf32, #tpu.memory_space<vmem>>, vector<1x128xf32>
    %6 = vector.broadcast %5 : vector<1x128xf32> to vector<64x128xf32>
    %7 = arith.addf %4, %6 : vector<64x128xf32>
    %c0_7 = arith.constant 0 : index
    %c0_8 = arith.constant 0 : index
    %8 = vector.load %arg5[%c0_7, %c0_8] : memref<1x128xf32, #tpu.memory_space<vmem>>, vector<1x128xf32>
    %c0_9 = arith.constant 0 : index
    %c0_10 = arith.constant 0 : index
    %9 = vector.load %arg6[%c0_9, %c0_10] : memref<1x128xf32, #tpu.memory_space<vmem>>, vector<1x128xf32>
    %cst_11 = arith.constant dense<0.000000e+00> : vector<64xf32>
    %10 = vector.multi_reduction <add>, %7, %cst_11 [1] : vector<64x128xf32> to vector<64xf32>
    %11 = vector.shape_cast %10 : vector<64xf32> to vector<64x1xf32>
    %cst_12 = arith.constant 1.280000e+02 : f32
    %12 = vector.broadcast %cst_12 : f32 to vector<64x1xf32>
    %13 = arith.divf %11, %12 : vector<64x1xf32>
    %14 = vector.broadcast %13 : vector<64x1xf32> to vector<64x128xf32>
    %15 = arith.subf %7, %14 : vector<64x128xf32>
    %16 = arith.mulf %15, %15 : vector<64x128xf32>
    %cst_13 = arith.constant dense<0.000000e+00> : vector<64xf32>
    %17 = vector.multi_reduction <add>, %16, %cst_13 [1] : vector<64x128xf32> to vector<64xf32>
    %18 = vector.shape_cast %17 : vector<64xf32> to vector<64x1xf32>
    %cst_14 = arith.constant 1.280000e+02 : f32
    %19 = vector.broadcast %cst_14 : f32 to vector<64x1xf32>
    %20 = arith.divf %18, %19 : vector<64x1xf32>
    %cst_15 = arith.constant 9.99999974E-6 : f32
    %21 = vector.broadcast %cst_15 : f32 to vector<64x1xf32>
    %22 = arith.addf %20, %21 : vector<64x1xf32>
    %23 = math.rsqrt %22 : vector<64x1xf32>
    %24 = vector.broadcast %23 : vector<64x1xf32> to vector<64x128xf32>
    %25 = arith.mulf %15, %24 : vector<64x128xf32>
    %26 = vector.broadcast %8 : vector<1x128xf32> to vector<64x128xf32>
    %27 = arith.mulf %25, %26 : vector<64x128xf32>
    %28 = vector.broadcast %9 : vector<1x128xf32> to vector<64x128xf32>
    %29 = arith.addf %27, %28 : vector<64x128xf32>
    %c0_16 = arith.constant 0 : index
    %c0_17 = arith.constant 0 : index
    %30 = vector.load %arg7[%c0_16, %c0_17] : memref<128x512xbf16, #tpu.memory_space<vmem>>, vector<128x512xbf16>
    %31 = arith.truncf %29 : vector<64x128xf32> to vector<64x128xbf16>
    %cst_18 = arith.constant dense<0.000000e+00> : vector<64x512xf32>
    %32 = tpu.matmul %31, %30, %cst_18 {dimension_numbers = #tpu.dot_dimension_numbers<[1], [0], [0], [1], [0, 0, 1, 1], [], []>} : vector<64x128xbf16>, vector<128x512xbf16>, vector<64x512xf32> -> vector<64x512xf32>
    %c0_19 = arith.constant 0 : index
    %c0_20 = arith.constant 0 : index
    %33 = vector.load %arg8[%c0_19, %c0_20] : memref<1x512xf32, #tpu.memory_space<vmem>>, vector<1x512xf32>
    %34 = vector.broadcast %33 : vector<1x512xf32> to vector<64x512xf32>
    %35 = arith.addf %32, %34 : vector<64x512xf32>
    %cst_21 = arith.constant 5.000000e-01 : f32
    %36 = vector.broadcast %cst_21 : f32 to vector<64x512xf32>
    %37 = arith.mulf %36, %35 : vector<64x512xf32>
    %cst_22 = arith.constant 0.707106769 : f32
    %38 = vector.broadcast %cst_22 : f32 to vector<64x512xf32>
    %39 = arith.mulf %35, %38 : vector<64x512xf32>
    %40 = math.absf %39 : vector<64x512xf32>
    %cst_23 = arith.constant 0.327591091 : f32
    %41 = vector.broadcast %cst_23 : f32 to vector<64x512xf32>
    %42 = arith.mulf %41, %40 : vector<64x512xf32>
    %cst_24 = arith.constant 1.000000e+00 : f32
    %43 = vector.broadcast %cst_24 : f32 to vector<64x512xf32>
    %44 = arith.addf %43, %42 : vector<64x512xf32>
    %cst_25 = arith.constant 1.000000e+00 : f32
    %45 = vector.broadcast %cst_25 : f32 to vector<64x512xf32>
    %46 = arith.divf %45, %44 : vector<64x512xf32>
    %cst_26 = arith.constant 1.06140542 : f32
    %47 = vector.broadcast %cst_26 : f32 to vector<64x512xf32>
    %48 = arith.mulf %47, %46 : vector<64x512xf32>
    %cst_27 = arith.constant -1.45315206 : f32
    %49 = vector.broadcast %cst_27 : f32 to vector<64x512xf32>
    %50 = arith.addf %48, %49 : vector<64x512xf32>
    %51 = arith.mulf %50, %46 : vector<64x512xf32>
    %cst_28 = arith.constant 1.42141378 : f32
    %52 = vector.broadcast %cst_28 : f32 to vector<64x512xf32>
    %53 = arith.addf %51, %52 : vector<64x512xf32>
    %54 = arith.mulf %53, %46 : vector<64x512xf32>
    %cst_29 = arith.constant -0.284496725 : f32
    %55 = vector.broadcast %cst_29 : f32 to vector<64x512xf32>
    %56 = arith.addf %54, %55 : vector<64x512xf32>
    %57 = arith.mulf %56, %46 : vector<64x512xf32>
    %cst_30 = arith.constant 0.254829586 : f32
    %58 = vector.broadcast %cst_30 : f32 to vector<64x512xf32>
    %59 = arith.addf %57, %58 : vector<64x512xf32>
    %60 = arith.mulf %59, %46 : vector<64x512xf32>
    %61 = arith.mulf %40, %40 : vector<64x512xf32>
    %cst_31 = arith.constant 0.000000e+00 : f32
    %62 = vector.broadcast %cst_31 : f32 to vector<64x512xf32>
    %63 = arith.subf %62, %61 : vector<64x512xf32>
    %64 = math.exp %63 : vector<64x512xf32>
    %65 = arith.mulf %60, %64 : vector<64x512xf32>
    %cst_32 = arith.constant 1.000000e+00 : f32
    %66 = vector.broadcast %cst_32 : f32 to vector<64x512xf32>
    %67 = arith.subf %66, %65 : vector<64x512xf32>
    %cst_33 = arith.constant 0.000000e+00 : f32
    %68 = vector.broadcast %cst_33 : f32 to vector<64x512xf32>
    %69 = arith.cmpf oge, %39, %68 : vector<64x512xf32>
    %cst_34 = arith.constant 0.000000e+00 : f32
    %70 = vector.broadcast %cst_34 : f32 to vector<64x512xf32>
    %71 = arith.subf %70, %67 : vector<64x512xf32>
    %72 = arith.select %69, %67, %71 : vector<64x512xi1>, vector<64x512xf32>
    %cst_35 = arith.constant 1.000000e+00 : f32
    %73 = vector.broadcast %cst_35 : f32 to vector<64x512xf32>
    %74 = arith.addf %73, %72 : vector<64x512xf32>
    %75 = arith.mulf %37, %74 : vector<64x512xf32>
    %c0_36 = arith.constant 0 : index
    %c0_37 = arith.constant 0 : index
    %76 = vector.load %arg9[%c0_36, %c0_37] : memref<512x128xbf16, #tpu.memory_space<vmem>>, vector<512x128xbf16>
    %77 = arith.truncf %75 : vector<64x512xf32> to vector<64x512xbf16>
    %cst_38 = arith.constant dense<0.000000e+00> : vector<64x128xf32>
    %78 = tpu.matmul %77, %76, %cst_38 {dimension_numbers = #tpu.dot_dimension_numbers<[1], [0], [0], [1], [0, 0, 1, 1], [], []>} : vector<64x512xbf16>, vector<512x128xbf16>, vector<64x128xf32> -> vector<64x128xf32>
    %79 = arith.addf %7, %78 : vector<64x128xf32>
    %c0_39 = arith.constant 0 : index
    %c0_40 = arith.constant 0 : index
    %80 = vector.load %arg10[%c0_39, %c0_40] : memref<1x128xf32, #tpu.memory_space<vmem>>, vector<1x128xf32>
    %81 = vector.broadcast %80 : vector<1x128xf32> to vector<64x128xf32>
    %82 = arith.addf %79, %81 : vector<64x128xf32>
    %c0_41 = arith.constant 0 : index
    %c0_42 = arith.constant 0 : index
    %83 = vector.load %arg11[%c0_41, %c0_42] : memref<1x128xf32, #tpu.memory_space<vmem>>, vector<1x128xf32>
    %c0_43 = arith.constant 0 : index
    %c0_44 = arith.constant 0 : index
    %84 = vector.load %arg12[%c0_43, %c0_44] : memref<1x128xf32, #tpu.memory_space<vmem>>, vector<1x128xf32>
    %cst_45 = arith.constant dense<0.000000e+00> : vector<64xf32>
    %85 = vector.multi_reduction <add>, %82, %cst_45 [1] : vector<64x128xf32> to vector<64xf32>
    %86 = vector.shape_cast %85 : vector<64xf32> to vector<64x1xf32>
    %cst_46 = arith.constant 1.280000e+02 : f32
    %87 = vector.broadcast %cst_46 : f32 to vector<64x1xf32>
    %88 = arith.divf %86, %87 : vector<64x1xf32>
    %89 = vector.broadcast %88 : vector<64x1xf32> to vector<64x128xf32>
    %90 = arith.subf %82, %89 : vector<64x128xf32>
    %91 = arith.mulf %90, %90 : vector<64x128xf32>
    %cst_47 = arith.constant dense<0.000000e+00> : vector<64xf32>
    %92 = vector.multi_reduction <add>, %91, %cst_47 [1] : vector<64x128xf32> to vector<64xf32>
    %93 = vector.shape_cast %92 : vector<64xf32> to vector<64x1xf32>
    %cst_48 = arith.constant 1.280000e+02 : f32
    %94 = vector.broadcast %cst_48 : f32 to vector<64x1xf32>
    %95 = arith.divf %93, %94 : vector<64x1xf32>
    %cst_49 = arith.constant 9.99999974E-6 : f32
    %96 = vector.broadcast %cst_49 : f32 to vector<64x1xf32>
    %97 = arith.addf %95, %96 : vector<64x1xf32>
    %98 = math.rsqrt %97 : vector<64x1xf32>
    %99 = vector.broadcast %98 : vector<64x1xf32> to vector<64x128xf32>
    %100 = arith.mulf %90, %99 : vector<64x128xf32>
    %101 = vector.broadcast %83 : vector<1x128xf32> to vector<64x128xf32>
    %102 = arith.mulf %100, %101 : vector<64x128xf32>
    %103 = vector.broadcast %84 : vector<1x128xf32> to vector<64x128xf32>
    %104 = arith.addf %102, %103 : vector<64x128xf32>
    %c0_50 = arith.constant 0 : index
    %c0_51 = arith.constant 0 : index
    %105 = vector.load %arg13[%c0_50, %c0_51] : memref<64x128xf32, #tpu.memory_space<vmem>>, vector<64x128xf32>
    tpu.vector_store %arg13[%c0_50, %c0_51], %104 {strides = array<i32>} : memref<64x128xf32, #tpu.memory_space<vmem>>, vector<64x128xf32>,
    return
  }
  func.func @transform_0(%arg0: i32) -> (i32, i32) {
    %c0_i32 = arith.constant 0 : i32
    %c0_i32_0 = arith.constant 0 : i32
    return %arg0, %c0_i32 : i32, i32
  }
  func.func @transform_1(%arg0: i32) -> (i32, i32) {
    %c0_i32 = arith.constant 0 : i32
    %c0_i32_0 = arith.constant 0 : i32
    return %arg0, %c0_i32 : i32, i32
  }
  func.func @transform_2(%arg0: i32) -> (i32, i32) {
    %c0_i32 = arith.constant 0 : i32
    %c0_i32_0 = arith.constant 0 : i32
    %c0_i32_1 = arith.constant 0 : i32
    return %c0_i32, %c0_i32_0 : i32, i32
  }
  func.func @transform_3(%arg0: i32) -> (i32, i32) {
    %c0_i32 = arith.constant 0 : i32
    %c0_i32_0 = arith.constant 0 : i32
    %c0_i32_1 = arith.constant 0 : i32
    return %c0_i32, %c0_i32_0 : i32, i32
  }
  func.func @transform_4(%arg0: i32) -> (i32, i32) {
    %c0_i32 = arith.constant 0 : i32
    %c0_i32_0 = arith.constant 0 : i32
    %c0_i32_1 = arith.constant 0 : i32
    return %c0_i32, %c0_i32_0 : i32, i32
  }
  func.func @transform_5(%arg0: i32) -> (i32, i32) {
    %c0_i32 = arith.constant 0 : i32
    %c0_i32_0 = arith.constant 0 : i32
    %c0_i32_1 = arith.constant 0 : i32
    return %c0_i32, %c0_i32_0 : i32, i32
  }
  func.func @transform_6(%arg0: i32) -> (i32, i32) {
    %c0_i32 = arith.constant 0 : i32
    %c0_i32_0 = arith.constant 0 : i32
    %c0_i32_1 = arith.constant 0 : i32
    return %c0_i32, %c0_i32_0 : i32, i32
  }
  func.func @transform_7(%arg0: i32) -> (i32, i32) {
    %c0_i32 = arith.constant 0 : i32
    %c0_i32_0 = arith.constant 0 : i32
    %c0_i32_1 = arith.constant 0 : i32
    return %c0_i32, %c0_i32_0 : i32, i32
  }
  func.func @transform_8(%arg0: i32) -> (i32, i32) {
    %c0_i32 = arith.constant 0 : i32
    %c0_i32_0 = arith.constant 0 : i32
    %c0_i32_1 = arith.constant 0 : i32
    return %c0_i32, %c0_i32_0 : i32, i32
  }
  func.func @transform_9(%arg0: i32) -> (i32, i32) {
    %c0_i32 = arith.constant 0 : i32
    %c0_i32_0 = arith.constant 0 : i32
    %c0_i32_1 = arith.constant 0 : i32
    return %c0_i32, %c0_i32_0 : i32, i32
  }
  func.func @transform_10(%arg0: i32) -> (i32, i32) {
    %c0_i32 = arith.constant 0 : i32
    %c0_i32_0 = arith.constant 0 : i32
    %c0_i32_1 = arith.constant 0 : i32
    return %c0_i32, %c0_i32_0 : i32, i32
  }
  func.func @transform_11(%arg0: i32) -> (i32, i32) {
    %c0_i32 = arith.constant 0 : i32
    %c0_i32_0 = arith.constant 0 : i32
    %c0_i32_1 = arith.constant 0 : i32
    return %c0_i32, %c0_i32_0 : i32, i32
  }
  func.func @transform_12(%arg0: i32) -> (i32, i32) {
    %c0_i32 = arith.constant 0 : i32
    %c0_i32_0 = arith.constant 0 : i32
    return %arg0, %c0_i32 : i32, i32
  }
}

</mosaic_0001>

<bundles_post_ra>
// kernel: transformer_encoder3d_forward.4
= control target key start
LH: loop header
LB: loop body
LE: loop exit
PB: predicated region body
PF: predicated region fallthrough
CT: control target
= control target key end

     0   :  { %s1287_s30 = smov 0   ;;  %s1385_s0 = inlined_call_operand.vmem [shape: f32[2,32,128], index: 0, kind: input, shape index: {}]   ;;  %s1386_s1 = inlined_call_operand.vmem [shape: f32[1,128], index: 1, kind: input, shape index: {}]   ;;  %s1387_s2 = inlined_call_operand.vmem [shape: f32[1,128], index: 2, kind: input, shape index: {}]   ;;  %s1388_s3 = inlined_call_operand.vmem [shape: bf16[4,128,32], index: 3, kind: input, shape index: {}]   ;;  %s1389_s4 = inlined_call_operand.vmem [shape: f32[4,1,32], index: 4, kind: input, shape index: {}]   ;;  %s1390_s5 = inlined_call_operand.vmem [shape: bf16[4,32,128], index: 5, kind: input, shape index: {}]   ;;  %s1391_s6 = inlined_call_operand.vmem [shape: f32[4,32,1], index: 6, kind: input, shape index: {}]   ;;  %s1392_s7 = inlined_call_operand.vmem [shape: bf16[4,32,128], index: 7, kind: input, shape index: {}]   ;;  %s1393_s8 = inlined_call_operand.vmem [shape: f32[4,32,1], index: 8, kind: input, shape index: {}]   ;;  %s1394_s9 = inlined_call_operand.vmem [shape: bf16[2,128,32], index: 9, kind: output, shape index: {}]  }
   0x1 LB: > { %s1023_s10 = sadd.s32 4294967295, %s1227_s30   ;;  %p1027_p0 = scmp.ge.s32.totalorder %s1227_s30, 1  ;;  %s1227_s30 = sphi %s1287_s30, %s19_s30  }
   0x2   : > { %p287_p1 = scmp.lt.s32.totalorder %s1227_s30, 3 }
   0x4   : > { %p288_p2 = pnand %p1027_p0, %p287_p1 }
   0x5   : > { %p323_p3 = scmp.lt.s32.totalorder (!%p288_p2), %s1023_s10, 1  ;;  %v1032_v34 = vld [vmem:[%s1386_s1] ss:$0 sm:$0xff] (!%p288_p2)  ;;  %s1313_s23 = smov (!%p288_p2), 0  }
   0x6   : > { %291 = sbr.rel (%p288_p2) target bundleno = 1214 (0x4be), region = 56  ;;  %v1033_v39 = vld [vmem:[%s1387_s2] ss:$0 sm:$0xff] (!%p288_p2) }
   0xd   : > { %s1396_s10 = smov (!%p323_p3, %s1023_s10), 1 }
   0xe   : > { %s1065_s11 = sshll.u32 %s1396_s10, 5  ;;  %s1066_s12 = sshll.u32 %s1396_s10, 6 }
   0xf   : > { %s327_s15 = scalar_lea.vmem %s1385_s0, %s1065_s11  ;;  %s1301_s18 = scalar_lea.vmem %s1394_s9, %s1066_s12 }
  0x10   : > { %v335_v0 = vld [vmem:[%s327_s15] sm:$0xff]  ;;  %v337_v1 = vld [vmem:[%s327_s15 + $0x10] sm:$0xff]  ;;  %v336_v2 = vld [vmem:[%s327_s15 + $0x8] sm:$0xff] }
  0x11   : > { %341 = vadd.xlane.f32.xlu0 %v335_v0  ;;  %345 = vadd.xlane.f32.xlu1 %v337_v1  ;;  %v338_v3 = vld [vmem:[%s327_s15 + $0x18] sm:$0xff] }
  0x15   : > { %343 = vadd.xlane.f32.xlu0 %v336_v2  ;;  %347 = vadd.xlane.f32.xlu1 %v338_v3 }
  0x9e   : > { %v342_v4 = vpop.xlane.xlu0 %341  ;;  %v346_v5 = vpop.xlane.xlu1 %345 }
  0x9f   : > { %v350_v6 = vmul.f32 0.0078125, %v342_v4  ;;  %v352_v7 = vmul.f32 0.0078125, %v346_v5 }
  0xa1   : > { %v354_v8 = vsub.f32 %v335_v0, %v350_v6  ;;  %v356_v9 = vsub.f32 %v337_v1, %v352_v7 }
  0xa2   : > { %v344_v10 = vpop.xlane.xlu0 %343  ;;  %v348_v11 = vpop.xlane.xlu1 %347 }
  0xa3   : > { %v351_v12 = vmul.f32 0.0078125, %v344_v10  ;;  %v358_v13 = vmul.f32 %v354_v8, %v354_v8  ;;  %v353_v14 = vmul.f32 0.0078125, %v348_v11  ;;  %v360_v17 = vmul.f32 %v356_v9, %v356_v9 }
  0xa5   : > { %v355_v15 = vsub.f32 %v336_v2, %v351_v12  ;;  %362 = vadd.xlane.f32.xlu0 %v358_v13  ;;  %v357_v16 = vsub.f32 %v338_v3, %v353_v14 }
  0xa7   : > { %v359_v18 = vmul.f32 %v355_v15, %v355_v15  ;;  %v361_v19 = vmul.f32 %v357_v16, %v357_v16 }
  0xa9   : > { %366 = vadd.xlane.f32.xlu0 %v360_v17  ;;  %364 = vadd.xlane.f32.xlu1 %v359_v18 }
  0xad   : > { %368 = vadd.xlane.f32.xlu1 %v361_v19 }
 0x132   : > { %v363_v20 = vpop.xlane.xlu0 %362 }
 0x133   : > { %v370_v21 = vmul.f32 0.0078125, %v363_v20 }
 0x135   : > { %v374_v22 = vadd.f32 1e-05, %v370_v21 }
 0x136   : > { %v365_v23 = vpop.xlane.xlu1 %364  ;;  %v367_v24 = vpop.xlane.xlu0 %366 }
 0x137   : > { %1185 = vrsqrt.f32 %v374_v22  ;;  %v371_v25 = vmul.f32 0.0078125, %v365_v23  ;;  %v372_v26 = vmul.f32 0.0078125, %v367_v24 }
 0x139   : > { %v375_v27 = vadd.f32 1e-05, %v371_v25  ;;  %v376_v28 = vadd.f32 1e-05, %v372_v26 }
 0x13a   : > { %v369_v29 = vpop.xlane.xlu1 %368 }
 0x13b   : > { %1187 = vrsqrt.f32 %v375_v27  ;;  %v373_v30 = vmul.f32 0.0078125, %v369_v29 }
 0x13c   : > { %1189 = vrsqrt.f32 %v376_v28 }
 0x13d   : > { %v377_v31 = vadd.f32 1e-05, %v373_v30 }
 0x13f   : > { %1191 = vrsqrt.f32 %v377_v31 }
 0x141   : > { %v1186_v32 = vpop.eup %1185 }
 0x142   : > { %v382_v33 = vmul.f32 %v1186_v32, %v354_v8 }
 0x144   : > { %v392_v37 = vmul.f32 %v1032_v34, %v382_v33 }
 0x145   : > { %v1188_v35 = vpop.eup %1187 }
 0x146   : > { %v1190_v36 = vpop.eup %1189  ;;  %v383_v38 = vmul.f32 %v1188_v35, %v355_v15  ;;  %v402_v43 = vadd.f32 %v1033_v39, %v392_v37 }
 0x147   : > { %v384_v40 = vmul.f32 %v1190_v36, %v356_v9 }
 0x148   : > { %v393_v41 = vmul.f32 %v1032_v34, %v383_v38 }
 0x149   : > { %v1192_v42 = vpop.eup %1191  ;;  %v394_v45 = vmul.f32 %v1032_v34, %v384_v40 }
 0x14a   : > { %v403_v44 = vadd.f32 %v1033_v39, %v393_v41  ;;  %v385_v46 = vmul.f32 %v1192_v42, %v357_v16 }
 0x14b   : > { %v404_v49 = vadd.f32 %v1033_v39, %v394_v45 }
 0x14c   : > { %v1309_v47 = vpack.c.bf16 %v403_v44, %v402_v43  ;;  %v395_v48 = vmul.f32 %v1032_v34, %v385_v46 }
 0x14e   : > { %v405_v50 = vadd.f32 %v1033_v39, %v395_v48 }
 0x150   : > { %v1311_v51 = vpack.c.bf16 %v405_v50, %v404_v49 }
 0x151 LB: >> { %1123 = vmatprep.subr.bf16.mxu1 %v1309_v47  ;;  %1119 = vmatprep.mubr.bf16.mxu0 %v1309_v47  ;;  %v1233_v52 = vmov 0   ;;  %s1067_s24 = sshll.u32 %s1231_s23, 6  ;;  %s1068_s25 = sshll.u32 %s1231_s23, 4  ;;  %vm728_vm0 = vcmask 261120   ;;  %v1234_v46 = vmov 0.0   ;;  %vm1235_vm1 = vmmov 0   ;;  %s1231_s23 = sphi %s1313_s23, %s413_s23  }
 0x152   : >> { %1124 = vmatpush3.bf16.xpose.msra.mxu1 %v1309_v47  ;;  %1193 = vset.pattern.permute.xlu0 %v1233_v52  ;;  %s1327_s28 = scalar_lea.vmem %s1388_s3, %s1067_s24  ;;  %s540_s11 = scalar_lea.vmem %s1390_s5, %s1068_s25  ;;  %vm945_vm2 = vcmask 257024  }
 0x153   : >> { %1125 = vmatprep.subr.bf16.mxu1 %v1311_v51  ;;  %1194 = vset.pattern.permute.xlu1 %v1233_v52  ;;  %v1195_v53 = vld [vmem:[%s1327_s28] sm:$0xff]   ;;  %v1196_v54 = vld [vmem:[%s1327_s28 + $0x8] sm:$0xff]   ;;  %v1197_v55 = vld [vmem:[%s1327_s28 + $0x10] sm:$0xff]   ;;  %s1336_s12 = sshll.u32 %s1231_s23, 5  ;;  %s633_s19 = scalar_lea.vmem %s1392_s7, %s1068_s25 }
 0x154   : >> { %1103 = vmatprep.subr.bf16.mxu0 %v1195_v53  ;;  %v1199_v56 = vld [vmem:[%s540_s11] sm:$0xff]   ;;  %v1198_v57 = vld [vmem:[%s1327_s28 + $0x18] sm:$0xff]   ;;  %s546_s15 = scalar_lea.vmem %s1391_s6, %s1336_s12  ;;  %v1201_v58 = vld [vmem:[%s540_s11 + $0x8] sm:$0xff]   ;;  %s433_s22 = scalar_lea.vmem %s1389_s4, %s1231_s23 }
 0x155   : >> { %1104 = vmatpush3.bf16.msra.mxu0 %v1195_v53  ;;  %1127 = vmatprep.mubr.bf16.mxu1 %v1199_v56  ;;  %v547_v59 = vld [vmem:[%s546_s15] sm:$0xff]  ;;  %v549_v60 = vld [vmem:[%s546_s15 + $0x10] sm:$0xff]  ;;  %v548_v62 = vld [vmem:[%s546_s15 + $0x8] sm:$0xff]  ;;  %s638_s26 = scalar_lea.vmem %s1393_s8, %s1336_s12  ;;  %s941_s27 = sshra.s32 %s1336_s12, 3 }
 0x156   : >> { %1105 = vmatprep.subr.bf16.mxu0 %v1196_v54  ;;  %v1200_v61 = vld [vmem:[%s1327_s28 + $0x20] sm:$0xff]   ;;  %553 = vperm.xlu0 %1193, %v547_v59   ;;  %v550_v63 = vld [vmem:[%s546_s15 + $0x18] sm:$0xff]  ;;  %v1202_v0 = vld [vmem:[%s1327_s28 + $0x28] sm:$0xff]   ;;  %s413_s23 = sadd.s32 1, %s1231_s23  }
 0x157   : >> { %563 = vperm.xlu1 %1194, %v549_v60   ;;  %v1203_v1 = vld [vmem:[%s1327_s28 + $0x30] sm:$0xff]   ;;  %v1204_v2 = vld [vmem:[%s1327_s28 + $0x38] sm:$0xff]   ;;  %v1205_v3 = vld [vmem:[%s633_s19] sm:$0xff]   ;;  %s1062_s28 = sshll.u32 %s941_s27, 2  ;;  %p410_p4 = scmp.ge.s32.totalorder %s413_s23, 4  }
 0x158   : >> { %v1206_v4 = vld [vmem:[%s633_s19 + $0x8] sm:$0xff]   ;;  %v1036_v20 = vld [vmem:[%s433_s22] ss:$0 sm:$0xff]  ;;  %v641_v41 = vld [vmem:[%s638_s26 + $0x10] sm:$0xff]  ;;  %s944_s29 = scalar_lea.vmem %s1301_s18, %s1062_s28 }
 0x159   : >> { %1106 = vmatpush3.bf16.msra.mxu0 %v1196_v54  ;;  %v639_v38 = vld [vmem:[%s638_s26] sm:$0xff]  ;;  %v642_v42 = vld [vmem:[%s638_s26 + $0x18] sm:$0xff]  ;;  %v640_v44 = vld [vmem:[%s638_s26 + $0x8] sm:$0xff] }
 0x15a   : >> { %1126 = vmatpush3.bf16.xpose.msra.mxu1 %v1311_v51  ;;  %1107 = vmatprep.subr.bf16.mxu0 %v1197_v55 }
 0x15b   : >> { %1131 = vmatprep.subr.bf16.mxu1 %v1309_v47  ;;  %558 = vperm.xlu0 %1193, %v548_v62  }
 0x15c   : >> { %568 = vperm.xlu1 %1194, %v550_v63  }
 0x15d   : >> { %1108 = vmatpush3.bf16.msra.mxu0 %v1197_v55 }
 0x15e   : >> { %1109 = vmatprep.subr.bf16.mxu0 %v1198_v57 }
 0x161   : >> { %1128 = vmatmul.mubr.bf16.vlgmr.msra.gmra.mrb[0].mxu1 %v1201_v58  ;;  %1110 = vmatpush3.bf16.msra.mxu0 %v1198_v57 }
 0x162   : >> { %1132 = vmatpush3.bf16.xpose.msra.mxu1 %v1309_v47  ;;  %1111 = vmatprep.subr.bf16.mxu0 %v1200_v61 }
 0x163   : >> { %1133 = vmatprep.subr.bf16.mxu1 %v1311_v51  ;;  %1135 = vmatprep.mubr.bf16.mxu1 %v1205_v3 }
 0x165   : >> { %1112 = vmatpush3.bf16.msra.mxu0 %v1200_v61 }
 0x166   : >> { %1113 = vmatprep.subr.bf16.mxu0 %v1202_v0 }
 0x169   : >> { %1114 = vmatpush3.bf16.msra.mxu0 %v1202_v0 }
 0x16a   : >> { %1134 = vmatpush3.bf16.xpose.msra.mxu1 %v1311_v51  ;;  %1115 = vmatprep.subr.bf16.mxu0 %v1203_v1 }
 0x16b   : >> { %1147 = vmatprep.subr.bf16.mxu1 %v1234_v46 }
 0x16d   : >> { %1116 = vmatpush3.bf16.msra.mxu0 %v1203_v1 }
 0x16e   : >> { %1117 = vmatprep.subr.bf16.mxu0 %v1204_v2 }
 0x171   : >> { %1118 = vmatpush3.bf16.msra.mxu0 %v1204_v2  ;;  %1136 = vmatmul.mubr.bf16.vlgmr.msra.gmra.mrb[4].mxu1 %v1206_v4 }
 0x172   : >> { %1151 = vmatprep.mubr.msk.bf16.mxu1 %vm1235_vm1, %v1234_v46 }
 0x174   : >> { %1120 = vmatmul.mubr.bf16.vlgmr.msra.gmra.mrb[0].mxu0 %v1311_v51 }
 0x1d5   : >> { %v554_v6 = vpop.permute.xlu0 %553 }
 0x1d6   : >> { %v564_v5 = vpop.permute.xlu1 %563 }
 0x1da   : >> { %v559_v11 = vpop.permute.xlu0 %558 }
 0x1db   : >> { %v569_v8 = vpop.permute.xlu1 %568 }
 0x234   : >> { %v1129_v7 = vpop.f32.mrb[0].mxu1 }
 0x235   : >> { %v617_v9 = vpop.f32.mrb[1].mxu1  ;;  %v626_v10 = vadd.f32 %v1129_v7, %v564_v5 }
 0x236   : >> { %v618_v12 = vadd.f32 %v617_v9, %v554_v6  ;;  %v1130_v13 = vpop.f32.mrb[2].mxu1 }
 0x237   : >> { %v620_v14 = vpop.f32.mrb[3].mxu1  ;;  %v629_v15 = vadd.f32 %v1130_v13, %v569_v8 }
 0x238   : >> { %v621_v16 = vadd.f32 %v620_v14, %v559_v11 }
 0x239   : >> { %v727_v17 = vpack.c.bf16 %v629_v15, %v626_v10  ;;  %v1236_v15 = vmov 1065369472  }
 0x23a   : >> { %v726_v18 = vpack.c.bf16 %v621_v16, %v618_v12 }
 0x23c   : >> { %1139 = vmatprep.subr.bf16.mxu0 %v726_v18 }
 0x23d   : >> { %1140 = vmatpush3.bf16.msra.mxu0 %v726_v18  ;;  %v917_v18 = vlaneseq }
 0x23e   : >> { %1141 = vmatprep.subr.bf16.mxu0 %v727_v17 }
 0x241   : >> { %1142 = vmatpush3.bf16.msra.mxu0 %v727_v17 }
 0x244   : >> { %v1137_v39 = vpop.f32.mrb[4].mxu1 }
 0x245   : >> { %v709_v40 = vpop.f32.mrb[5].mxu1 }
 0x246   : >> { %v1138_v43 = vpop.f32.mrb[6].mxu1 }
 0x247   : >> { %v1121_v19 = vpop.f32.mrb[0].mxu0  ;;  %v712_v45 = vpop.f32.mrb[7].mxu1 }
 0x248   : >> { %v523_v21 = vpop.f32.mrb[1].mxu0  ;;  %v532_v23 = vadd.f32 %v1121_v19, %v1036_v20 }
 0x249   : >> { %v1122_v22 = vpop.f32.mrb[2].mxu0  ;;  %v524_v26 = vadd.f32 %v1036_v20, %v523_v21 }
 0x24a   : >> { %v535_v24 = vadd.f32 %v1122_v22, %v1036_v20  ;;  %v526_v25 = vpop.f32.mrb[3].mxu0 }
 0x24b   : >> { %v527_v27 = vadd.f32 %v1036_v20, %v526_v25  ;;  %v918_v25 = vshrl.u32 %v917_v18, 7 }
 0x24c   : >> { %v725_v28 = vpack.c.bf16 %v535_v24, %v532_v23 }
 0x24d   : >> { %v724_v29 = vpack.c.bf16 %v527_v27, %v524_v26  ;;  %v919_v26 = vsub.s32 0, %v918_v25 }
 0x24f   : >> { %1143 = vmatprep.mubr.msk.bf16.mxu0 %vm728_vm0, %v724_v29 }
 0x250   : >> { %1144 = vmatmul.mubr.msk.bf16.vlgmr.msra.gmra.mrb[4].mxu0 %vm728_vm0, %v725_v28 }
 0x323   : >> { %v1145_v30 = vpop.f32.mrb[4].mxu0 }
 0x324   : >> { %v769_v31 = vpop.f32.mrb[5].mxu0  ;;  %v790_v36 = vsel %vm728_vm0, %v1145_v30, -inf }
 0x325   : >> { %v1146_v32 = vpop.f32.mrb[6].mxu0  ;;  %v784_v33 = vsel %vm728_vm0, %v769_v31, -inf }
 0x326   : >> { %785 = vmax.xlane.f32.xlu0 %v784_v33  ;;  %v772_v34 = vpop.f32.mrb[7].mxu0  ;;  %v793_v37 = vsel %vm728_vm0, %v1146_v32, -inf }
 0x327   : >> { %v787_v35 = vsel %vm728_vm0, %v772_v34, -inf }
 0x328   : >> { %788 = vmax.xlane.f32.xlu1 %v787_v35 }
 0x32a   : >> { %791 = vmax.xlane.f32.xlu0 %v790_v36 }
 0x32e   : >> { %794 = vmax.xlane.f32.xlu0 %v793_v37 }
 0x339   : >> { %645 = vperm.xlu1 %1194, %v639_v38  }
 0x33d   : >> { %655 = vperm.xlu1 %1194, %v641_v41  }
 0x341   : >> { %660 = vperm.xlu1 %1194, %v642_v42  }
 0x344   : >> { %650 = vperm.xlu0 %1193, %v640_v44  }
 0x3b3   : >> { %v786_v48 = vpop.xlane.xlu0 %785 }
 0x3b4   : >> { %v796_v49 = vsub.f32 %v769_v31, %v786_v48 }
 0x3b5   : >> { %v789_v50 = vpop.xlane.xlu1 %788 }
 0x3b6   : >> { %v800_v52 = vmul.f32 1.442695, %v796_v49  ;;  %v797_v53 = vsub.f32 %v772_v34, %v789_v50 }
 0x3b7   : >> { %v792_v54 = vpop.xlane.xlu0 %791 }
 0x3b8   : >> { %v802_v55 = vmul.f32 1.442695, %v797_v53  ;;  %v798_v56 = vsub.f32 %v1145_v30, %v792_v54  ;;  %1207 = vpow2.f32 %v800_v52 }
 0x3b9   : >> { %v646_v57 = vpop.permute.xlu1 %645 }
 0x3ba   : >> { %1209 = vpow2.f32 %v802_v55  ;;  %v804_v58 = vmul.f32 1.442695, %v798_v56  ;;  %v710_v5 = vadd.f32 %v709_v40, %v646_v57 }
 0x3bb   : >> { %v795_v59 = vpop.xlane.xlu0 %794 }
 0x3bc   : >> { %v799_v60 = vsub.f32 %v1146_v32, %v795_v59  ;;  %1211 = vpow2.f32 %v804_v58 }
 0x3bd   : >> { %v656_v61 = vpop.permute.xlu1 %655 }
 0x3be   : >> { %v806_v62 = vmul.f32 1.442695, %v799_v60  ;;  %v718_v0 = vadd.f32 %v1137_v39, %v656_v61 }
 0x3c0   : >> { %1213 = vpow2.f32 %v806_v62 }
 0x3c1   : >> { %v661_v63 = vpop.permute.xlu1 %660 }
 0x3c2   : >> { %v721_v1 = vadd.f32 %v1138_v43, %v661_v63  ;;  %v1208_v2 = vpop.eup %1207 }
 0x3c3   : >> { %v651_v3 = vpop.permute.xlu0 %650 }
 0x3c4   : >> { %v1210_v4 = vpop.eup %1209  ;;  %v860_v6 = vpack.c.bf16 %v721_v1, %v718_v0  ;;  %v713_v7 = vadd.f32 %v712_v45, %v651_v3 }
 0x3c5   : >> { %v808_v8 = vpack.c.bf16 %v1210_v4, %v1208_v2 }
 0x3c6   : >> { %v859_v9 = vpack.c.bf16 %v713_v7, %v710_v5  ;;  %v1212_v11 = vpop.eup %1211 }
 0x3c7   : >> { %1163 = vmatprep.subr.msk.bf16.mxu0 %vm728_vm0, %v808_v8  ;;  %v814_v10 = vsel %vm728_vm0, %v808_v8, 0 }
 0x3c8   : >> { %1148 = vmatpush3.bf16.xpose.msra.mxu1 %v814_v10  ;;  %1156 = vmatpush3.bf16.xpose.msra.mxu0 %v814_v10 }
 0x3c9   : >> { %1159 = vmatprep.mubr.msk.bf16.mxu0 %vm728_vm0, %v859_v9  ;;  %1149 = vmatprep.subr.bf16.mxu1 %v1234_v46 }
 0x3ca   : >> { %v1214_v12 = vpop.eup %1213 }
 0x3cb   : >> { %v809_v13 = vpack.c.bf16 %v1214_v12, %v1212_v11 }
 0x3cd   : >> { %1164 = vmatprep.subr.msk.bf16.mxu0 %vm728_vm0, %v809_v13  ;;  %v817_v14 = vsel %vm728_vm0, %v809_v13, 0 }
 0x3d0   : >> { %1150 = vmatpush3.bf16.xpose.msra.mxu1 %v817_v14  ;;  %1158 = vmatpush3.bf16.xpose.msra.mxu0 %v817_v14 }
 0x3d7   : >> { %1152 = vmatmul.mubr.msk.bf16.vlgmr.msra.gmra.mrb[8].mxu1 %vm728_vm0, %v1236_v15  ;;  %1160 = vmatmul.mubr.msk.bf16.vlgmr.msra.gmra.mrb[8].mxu0 %vm728_vm0, %v860_v6 }
 0x4aa   : >> { %v853_v16 = vpop.f32.mrb[8].mxu1  ;;  %v1161_v17 = vpop.f32.mrb[8].mxu0 }
 0x4ab   : >> { %1215 = vrcp.f32 %v853_v16  ;;  %v1153_v19 = vpop.f32.mrb[9].mxu1  ;;  %v901_v20 = vpop.f32.mrb[9].mxu0 }
 0x4ac   : >> { %v856_v21 = vpop.f32.mrb[10].mxu1  ;;  %v1162_v22 = vpop.f32.mrb[10].mxu0 }
 0x4ad   : >> { %v1154_v23 = vpop.f32.mrb[11].mxu1  ;;  %v904_v24 = vpop.f32.mrb[11].mxu0 }
 0x4b5   : >> { %v1216_v27 = vpop.eup %1215 }
 0x4b6   : >> { %v920_v28 = vrot.slane %v1216_v27, %v919_v26 }
 0x4b7   : > { %412 = sbr.rel (!%p410_p4) target bundleno = 337 (0x151), region = 100 }
 0x4b8   : >> { %v923_v29 = vmul.f32 %v1161_v17, %v920_v28  ;;  %v921_v30 = vmul.f32 %v920_v28, %v901_v20  ;;  %v924_v31 = vmul.f32 %v1162_v22, %v920_v28  ;;  %v922_v32 = vmul.f32 %v920_v28, %v904_v24 }
 0x4ba   : >> { %v1072_v33 = vpack.c.bf16 %v923_v29, %v923_v29  ;;  %v1070_v34 = vpack.c.bf16 %v921_v30, %v921_v30  ;;  %v1073_v35 = vpack.c.bf16 %v924_v31, %v924_v31  ;;  %v1071_v36 = vpack.c.bf16 %v922_v32, %v922_v32 }
 0x4bc   : >> { %948 = vst.msk [vmem:[%s944_s29 + $0x8] sm:$0xf] %vm945_vm2, %v1072_v33  ;;  %946 = vst.msk [vmem:[%s944_s29] sm:$0xf] %vm945_vm2, %v1070_v34 }
 0x4bd   : >> { %949 = vst.msk [vmem:[%s944_s29 + $0xc] sm:$0xf] %vm945_vm2, %v1073_v35  ;;  %947 = vst.msk [vmem:[%s944_s29 + $0x4] sm:$0xf] %vm945_vm2, %v1071_v36 }
 0x4be PF: > { %s19_s30 = sadd.s32 1, %s1227_s30  }
 0x4bf   : > { %p16_p5 = scmp.ge.s32.totalorder %s19_s30, 4  }
 0x4c1   :  { %18 = sbr.rel (!%p16_p5) target bundleno = 1 (0x1), region = 111 }

// kernel: transformer_encoder3d_forward.5
= control target key start
LH: loop header
LB: loop body
LE: loop exit
PB: predicated region body
PF: predicated region fallthrough
CT: control target
= control target key end

     0   :  { %s3925_s2 = inlined_call_operand.vmem [shape: bf16[128,128], index: 2, kind: input, shape index: {}]   ;;  %s3926_s1 = inlined_call_operand.vmem [shape: bf16[64,128], index: 1, kind: input, shape index: {}]   ;;  %s3927_s0 = inlined_call_operand.vmem [shape: f32[64,128], index: 0, kind: input, shape index: {}]   ;;  %s3928_s3 = inlined_call_operand.vmem [shape: f32[1,128], index: 3, kind: input, shape index: {}]   ;;  %s3929_s6 = inlined_call_operand.vmem [shape: bf16[128,512], index: 6, kind: input, shape index: {}]   ;;  %s3930_s4 = inlined_call_operand.vmem [shape: f32[1,128], index: 4, kind: input, shape index: {}]   ;;  %s3931_s5 = inlined_call_operand.vmem [shape: f32[1,128], index: 5, kind: input, shape index: {}]   ;;  %s3932_s7 = inlined_call_operand.vmem [shape: f32[1,512], index: 7, kind: input, shape index: {}]   ;;  %s3933_s8 = inlined_call_operand.vmem [shape: bf16[512,128], index: 8, kind: input, shape index: {}]   ;;  %s3934_s9 = inlined_call_operand.vmem [shape: f32[1,128], index: 9, kind: input, shape index: {}]   ;;  %s3935_s10 = inlined_call_operand.vmem [shape: f32[64,128], index: 10, kind: output, shape index: {}]  }
   0x1   :  { %v2225_v0 = vld [vmem:[%s3925_s2] sm:$0xff]   ;;  %v2226_v1 = vld [vmem:[%s3925_s2 + $0x8] sm:$0xff]   ;;  %v2227_v2 = vld [vmem:[%s3925_s2 + $0x10] sm:$0xff]  }
   0x2   :  { %2184 = vmatprep.subr.bf16.mxu0 %v2225_v0  ;;  %v2228_v3 = vld [vmem:[%s3925_s2 + $0x18] sm:$0xff]   ;;  %v2233_v4 = vld [vmem:[%s3926_s1] sm:$0xff]   ;;  %v2230_v6 = vld [vmem:[%s3925_s2 + $0x28] sm:$0xff]  }
   0x3   :  { %2185 = vmatpush3.bf16.msra.mxu0 %v2225_v0  ;;  %2200 = vmatprep.mubr.bf16.mxu0 %v2233_v4  ;;  %v2229_v5 = vld [vmem:[%s3925_s2 + $0x20] sm:$0xff]   ;;  %v2231_v7 = vld [vmem:[%s3925_s2 + $0x30] sm:$0xff]   ;;  %v2232_v8 = vld [vmem:[%s3925_s2 + $0x38] sm:$0xff]  }
   0x4   :  { %2186 = vmatprep.subr.bf16.mxu0 %v2226_v1  ;;  %v2234_v9 = vld [vmem:[%s3926_s1 + $0x8] sm:$0xff]   ;;  %v2235_v10 = vld [vmem:[%s3926_s1 + $0x10] sm:$0xff]   ;;  %v2236_v11 = vld [vmem:[%s3926_s1 + $0x18] sm:$0xff]  }
   0x5   :  { %v38_v12 = vld [vmem:[%s3927_s0 + $0x10] sm:$0xff]  ;;  %v36_v13 = vld [vmem:[%s3927_s0] sm:$0xff]  ;;  %v39_v16 = vld [vmem:[%s3927_s0 + $0x18] sm:$0xff] }
   0x6   :  { %v2024_v15 = vld [vmem:[%s3928_s3] ss:$0 sm:$0xff]  ;;  %v37_v19 = vld [vmem:[%s3927_s0 + $0x8] sm:$0xff]  ;;  %v42_v28 = vld [vmem:[%s3927_s0 + $0x30] sm:$0xff] }
   0x7   :  { %2187 = vmatpush3.bf16.msra.mxu0 %v2226_v1  ;;  %v40_v29 = vld [vmem:[%s3927_s0 + $0x20] sm:$0xff]  ;;  %v43_v33 = vld [vmem:[%s3927_s0 + $0x38] sm:$0xff]  ;;  %v41_v34 = vld [vmem:[%s3927_s0 + $0x28] sm:$0xff] }
   0x8   :  { %2188 = vmatprep.subr.bf16.mxu0 %v2227_v2  ;;  %v2237_v45 = vld [vmem:[%s3929_s6 + $0x4] ss:$16 sps:$4 sm:$0xff]   ;;  %v2239_v46 = vld [vmem:[%s3929_s6 + $0x8] ss:$16 sps:$4 sm:$0xff]   ;;  %v2241_v47 = vld [vmem:[%s3929_s6 + $0xc] ss:$16 sps:$4 sm:$0xff]  }
   0x9   :  { %565 = vmatprep.subr.bf16.mxu1 %v2237_v45  ;;  %v2242_v48 = vld [vmem:[%s3929_s6] ss:$16 sps:$4 sm:$0xff]   ;;  %v2243_v49 = vld [vmem:[%s3929_s6 + $0x24] ss:$16 sps:$4 sm:$0xff]   ;;  %v2245_v50 = vld [vmem:[%s3929_s6 + $0x28] ss:$16 sps:$4 sm:$0xff]  }
   0xa   :  { %566 = vmatpush1.bf16.msra.mxu1 %v2242_v48  ;;  %v2247_v51 = vld [vmem:[%s3929_s6 + $0x2c] ss:$16 sps:$4 sm:$0xff]   ;;  %v2273_v45 = vld [vmem:[%s3929_s6 + $0xc4] ss:$16 sps:$4 sm:$0xff]   ;;  %v2278_v48 = vld [vmem:[%s3929_s6 + $0xc0] ss:$16 sps:$4 sm:$0xff]  }
   0xb   :  { %2189 = vmatpush3.bf16.msra.mxu0 %v2227_v2  ;;  %567 = vmatprep.subr.bf16.mxu1 %v2243_v49  ;;  %v2279_v49 = vld [vmem:[%s3929_s6 + $0xe4] ss:$16 sps:$4 sm:$0xff]  }
   0xc   :  { %2190 = vmatprep.subr.bf16.mxu0 %v2228_v3 }
   0xf   :  { %2191 = vmatpush3.bf16.msra.mxu0 %v2228_v3 }
  0x10   :  { %2192 = vmatprep.subr.bf16.mxu0 %v2229_v5 }
  0x13   :  { %2193 = vmatpush3.bf16.msra.mxu0 %v2229_v5 }
  0x14   :  { %2194 = vmatprep.subr.bf16.mxu0 %v2230_v6 }
  0x17   :  { %2195 = vmatpush3.bf16.msra.mxu0 %v2230_v6 }
  0x18   :  { %2196 = vmatprep.subr.bf16.mxu0 %v2231_v7 }
  0x1b   :  { %2197 = vmatpush3.bf16.msra.mxu0 %v2231_v7 }
  0x1c   :  { %2198 = vmatprep.subr.bf16.mxu0 %v2232_v8 }
  0x1f   :  { %2199 = vmatpush3.bf16.msra.mxu0 %v2232_v8 }
  0x20   :  { %638 = vmatprep.subr.bf16.mxu0 %v2241_v47  ;;  %v2275_v47 = vld [vmem:[%s3929_s6 + $0xc8] ss:$16 sps:$4 sm:$0xff]  }
  0x22   :  { %2201 = vmatmul.mubr.bf16.vlgmr.msra.gmra.mrb[0].mxu0 %v2234_v9 }
  0x23   :  { %2204 = vmatprep.mubr.bf16.mxu0 %v2235_v10  ;;  %639 = vmatpush1.bf16.msra.mxu0 %v2239_v46  ;;  %v2277_v46 = vld [vmem:[%s3929_s6 + $0xcc] ss:$16 sps:$4 sm:$0xff]  }
  0x24   :  { %640 = vmatprep.subr.bf16.mxu0 %v2247_v51  ;;  %v2281_v51 = vld [vmem:[%s3929_s6 + $0xe8] ss:$16 sps:$4 sm:$0xff]  }
  0x27   :  { %641 = vmatpush1.bf16.msra.mxu0 %v2245_v50  ;;  %v2283_v50 = vld [vmem:[%s3929_s6 + $0xec] ss:$16 sps:$4 sm:$0xff]  }
  0x2a   :  { %2205 = vmatmul.mubr.bf16.gmra.mrb[4].mxu0 %v2236_v11 }
  0xf5   :  { %v2202_v14 = vpop.f32.mrb[0].mxu0 }
  0xf6   :  { %v207_v17 = vadd.f32 %v2202_v14, %v38_v12  ;;  %v174_v18 = vpop.f32.mrb[1].mxu0 }
  0xf7   :  { %v205_v20 = vadd.f32 %v174_v18, %v36_v13  ;;  %v2203_v21 = vpop.f32.mrb[2].mxu0 }
  0xf8   :  { %v2583_v22 = vadd.f32 %v2024_v15, %v207_v17  ;;  %v208_v23 = vadd.f32 %v2203_v21, %v39_v16  ;;  %v177_v24 = vpop.f32.mrb[3].mxu0  ;;  %v2249_v21 = vld [vmem:[%s3929_s6 + $0x44] ss:$16 sps:$4 sm:$0xff]  }
  0xf9   :  { %v2585_v25 = vadd.f32 %v2024_v15, %v205_v20  ;;  %v206_v26 = vadd.f32 %v177_v24, %v37_v19  ;;  %v2248_v19 = vld [vmem:[%s3929_s6 + $0x20] ss:$16 sps:$4 sm:$0xff]   ;;  %v2251_v24 = vld [vmem:[%s3929_s6 + $0x48] ss:$16 sps:$4 sm:$0xff]  }
  0xfa   :  { %3962 = vst [vmem:[#allocation2_spill] sm:$0xff] %v2583_v22  ;;  %234 = vadd.xlane.f32.xlu1 %v2583_v22  ;;  %v2589_v27 = vadd.f32 %v2024_v15, %v208_v23  ;;  %568 = vmatpush1.bf16.msra.mxu1 %v2248_v19  ;;  %v2253_v23 = vld [vmem:[%s3929_s6 + $0x4c] ss:$16 sps:$4 sm:$0xff]  }
  0xfb   :  { %3963 = vst [vmem:[#allocation3_spill] sm:$0xff] %v2585_v25  ;;  %230 = vadd.xlane.f32.xlu0 %v2585_v25  ;;  %v2597_v30 = vadd.f32 %v2024_v15, %v206_v26  ;;  %569 = vmatprep.subr.bf16.mxu1 %v2249_v21  ;;  %v2254_v26 = vld [vmem:[%s3929_s6 + $0x40] ss:$16 sps:$4 sm:$0xff]  }
  0xfc   :  { %3964 = vst [vmem:[#allocation4_spill] sm:$0xff] %v2589_v27  ;;  %642 = vmatprep.subr.bf16.mxu0 %v2253_v23  ;;  %v2025_v21 = vld [vmem:[%s3930_s4] ss:$0 sm:$0xff] }
  0xfd   :  { %3965 = vst [vmem:[#allocation5_spill] sm:$0xff] %v2597_v30  ;;  %v2206_v31 = vpop.f32.mrb[4].mxu0  ;;  %643 = vmatpush1.bf16.msra.mxu0 %v2251_v24 }
  0xfe   :  { %v190_v32 = vpop.f32.mrb[5].mxu0  ;;  %236 = vadd.xlane.f32.xlu1 %v2589_v27  ;;  %v211_v35 = vadd.f32 %v2206_v31, %v42_v28  ;;  %570 = vmatpush1.bf16.msra.mxu1 %v2254_v26  ;;  %v2255_v28 = vld [vmem:[%s3929_s6 + $0x64] ss:$16 sps:$4 sm:$0xff]   ;;  %v2257_v31 = vld [vmem:[%s3929_s6 + $0x68] ss:$16 sps:$4 sm:$0xff]  }
  0xff   :  { %v209_v36 = vadd.f32 %v190_v32, %v40_v29  ;;  %v2207_v37 = vpop.f32.mrb[6].mxu0  ;;  %232 = vadd.xlane.f32.xlu0 %v2597_v30  ;;  %v2259_v29 = vld [vmem:[%s3929_s6 + $0x6c] ss:$16 sps:$4 sm:$0xff]   ;;  %v2260_v32 = vld [vmem:[%s3929_s6 + $0x60] ss:$16 sps:$4 sm:$0xff]   ;;  %571 = vmatprep.subr.bf16.mxu1 %v2255_v28 }
 0x100   :  { %v193_v38 = vpop.f32.mrb[7].mxu0  ;;  %v212_v40 = vadd.f32 %v2207_v37, %v43_v33  ;;  %v2609_v42 = vadd.f32 %v2024_v15, %v211_v35  ;;  %644 = vmatprep.subr.bf16.mxu0 %v2259_v29  ;;  %v2261_v33 = vld [vmem:[%s3929_s6 + $0x84] ss:$16 sps:$4 sm:$0xff]   ;;  %v2263_v35 = vld [vmem:[%s3929_s6 + $0x88] ss:$16 sps:$4 sm:$0xff]  }
 0x101   :  { %v2607_v39 = vadd.f32 %v2024_v15, %v209_v36  ;;  %v210_v41 = vadd.f32 %v193_v38, %v41_v34  ;;  %645 = vmatpush1.bf16.msra.mxu0 %v2257_v31  ;;  %v2265_v34 = vld [vmem:[%s3929_s6 + $0x8c] ss:$16 sps:$4 sm:$0xff]   ;;  %v2266_v36 = vld [vmem:[%s3929_s6 + $0x80] ss:$16 sps:$4 sm:$0xff]   ;;  %v2267_v37 = vld [vmem:[%s3929_s6 + $0xa4] ss:$16 sps:$4 sm:$0xff]  }
 0x102   :  { %3967 = vst [vmem:[#allocation7_spill] sm:$0xff] %v2609_v42  ;;  %v2614_v44 = vadd.f32 %v2024_v15, %v212_v40  ;;  %572 = vmatpush1.bf16.msra.mxu1 %v2260_v32  ;;  %646 = vmatprep.subr.bf16.mxu0 %v2265_v34  ;;  %v2271_v38 = vld [vmem:[%s3929_s6 + $0xac] ss:$16 sps:$4 sm:$0xff]   ;;  %v2269_v40 = vld [vmem:[%s3929_s6 + $0xa8] ss:$16 sps:$4 sm:$0xff]  }
 0x103   :  { %3966 = vst [vmem:[#allocation6_spill] sm:$0xff] %v2607_v39  ;;  %v2611_v43 = vadd.f32 %v2024_v15, %v210_v41  ;;  %238 = vadd.xlane.f32.xlu0 %v2607_v39  ;;  %573 = vmatprep.subr.bf16.mxu1 %v2261_v33  ;;  %v2272_v41 = vld [vmem:[%s3929_s6 + $0xa0] ss:$16 sps:$4 sm:$0xff]  }
 0x104   :  { %3969 = vst [vmem:[#allocation9_spill] sm:$0xff] %v2614_v44  ;;  %v2026_v32 = vld [vmem:[%s3931_s5] ss:$0 sm:$0xff] }
 0x105   :  { %3968 = vst [vmem:[#allocation8_spill] sm:$0xff] %v2611_v43  ;;  %240 = vadd.xlane.f32.xlu1 %v2611_v43  ;;  %647 = vmatpush1.bf16.msra.mxu0 %v2263_v35 }
 0x106   :  { %574 = vmatpush1.bf16.msra.mxu1 %v2266_v36  ;;  %648 = vmatprep.subr.bf16.mxu0 %v2271_v38 }
 0x107   :  { %242 = vadd.xlane.f32.xlu0 %v2609_v42  ;;  %575 = vmatprep.subr.bf16.mxu1 %v2267_v37 }
 0x109   :  { %244 = vadd.xlane.f32.xlu1 %v2614_v44  ;;  %649 = vmatpush1.bf16.msra.mxu0 %v2269_v40 }
 0x10a   :  { %576 = vmatpush1.bf16.msra.mxu1 %v2272_v41  ;;  %650 = vmatprep.subr.bf16.mxu0 %v2277_v46 }
 0x10b   :  { %577 = vmatprep.subr.bf16.mxu1 %v2273_v45 }
 0x10d   :  { %651 = vmatpush1.bf16.msra.mxu0 %v2275_v47 }
 0x10e   :  { %578 = vmatpush1.bf16.msra.mxu1 %v2278_v48  ;;  %652 = vmatprep.subr.bf16.mxu0 %v2283_v50 }
 0x10f   :  { %579 = vmatprep.subr.bf16.mxu1 %v2279_v49 }
 0x111   :  { %653 = vmatpush1.bf16.msra.mxu0 %v2281_v51 }
 0x187   :  { %v235_v52 = vpop.xlane.xlu1 %234 }
 0x188   :  { %v231_v53 = vpop.xlane.xlu0 %230  ;;  %v249_v54 = vmul.f32 0.0078125, %v235_v52  ;;  %v2284_v52 = vld [vmem:[%s3929_s6 + $0xe0] ss:$16 sps:$4 sm:$0xff]  }
 0x189   :  { %v247_v55 = vmul.f32 0.0078125, %v231_v53  ;;  %v2476_v53 = vmov 0   ;;  %580 = vmatpush1.bf16.msra.mxu1 %v2284_v52 }
 0x18a   :  { %v2644_v59 = vsub.f32 %v2583_v22, %v249_v54  ;;  %597 = vmatprep.mubr.bf16.mxu1 %v2476_v53  ;;  %670 = vmatprep.mubr.bf16.mxu0 %v2476_v53 }
 0x18b   :  { %v2641_v56 = vsub.f32 %v2585_v25, %v247_v55  ;;  %v237_v57 = vpop.xlane.xlu1 %236 }
 0x18c   :  { %v233_v58 = vpop.xlane.xlu0 %232  ;;  %v250_v60 = vmul.f32 0.0078125, %v237_v57  ;;  %v265_v3 = vmul.f32 %v2644_v59, %v2644_v59 }
 0x18d   :  { %v248_v61 = vmul.f32 0.0078125, %v233_v58  ;;  %v263_v62 = vmul.f32 %v2641_v56, %v2641_v56 }
 0x18e   :  { %v2652_v1 = vsub.f32 %v2589_v27, %v250_v60 }
 0x18f   :  { %v2649_v63 = vsub.f32 %v2597_v30, %v248_v61  ;;  %271 = vadd.xlane.f32.xlu0 %v263_v62 }
 0x190   :  { %v239_v0 = vpop.xlane.xlu0 %238  ;;  %v266_v11 = vmul.f32 %v2652_v1, %v2652_v1 }
 0x191   :  { %v251_v2 = vmul.f32 0.0078125, %v239_v0  ;;  %v264_v4 = vmul.f32 %v2649_v63, %v2649_v63 }
 0x192   :  { %v241_v5 = vpop.xlane.xlu1 %240 }
 0x193   :  { %v2659_v6 = vsub.f32 %v2607_v39, %v251_v2  ;;  %v252_v7 = vmul.f32 0.0078125, %v241_v5  ;;  %275 = vadd.xlane.f32.xlu0 %v265_v3  ;;  %273 = vadd.xlane.f32.xlu1 %v264_v4 }
 0x194   :  { %v243_v8 = vpop.xlane.xlu0 %242 }
 0x195   :  { %v2662_v9 = vsub.f32 %v2611_v43, %v252_v7  ;;  %v253_v10 = vmul.f32 0.0078125, %v243_v8  ;;  %v267_v12 = vmul.f32 %v2659_v6, %v2659_v6 }
 0x196   :  { %v245_v13 = vpop.xlane.xlu1 %244 }
 0x197   :  { %v2669_v14 = vsub.f32 %v2609_v42, %v253_v10  ;;  %v254_v15 = vmul.f32 0.0078125, %v245_v13  ;;  %277 = vadd.xlane.f32.xlu1 %v266_v11  ;;  %279 = vadd.xlane.f32.xlu0 %v267_v12  ;;  %v268_v17 = vmul.f32 %v2662_v9, %v2662_v9 }
 0x199   :  { %v2672_v16 = vsub.f32 %v2614_v44, %v254_v15  ;;  %v269_v18 = vmul.f32 %v2669_v14, %v2669_v14 }
 0x19b   :  { %281 = vadd.xlane.f32.xlu1 %v268_v17  ;;  %283 = vadd.xlane.f32.xlu0 %v269_v18  ;;  %v270_v20 = vmul.f32 %v2672_v16, %v2672_v16 }
 0x19f   :  { %285 = vadd.xlane.f32.xlu1 %v270_v20 }
 0x21c   :  { %v272_v54 = vpop.xlane.xlu0 %271 }
 0x21d   :  { %v287_v55 = vmul.f32 0.0078125, %v272_v54 }
 0x21f   :  { %v295_v57 = vadd.f32 1e-05, %v287_v55 }
 0x220   :  { %v274_v58 = vpop.xlane.xlu1 %273  ;;  %v276_v60 = vpop.xlane.xlu0 %275 }
 0x221   :  { %2317 = vrsqrt.f32 %v295_v57  ;;  %v288_v61 = vmul.f32 0.0078125, %v274_v58  ;;  %v289_v62 = vmul.f32 0.0078125, %v276_v60 }
 0x223   :  { %v296_v0 = vadd.f32 1e-05, %v288_v61  ;;  %v297_v2 = vadd.f32 1e-05, %v289_v62 }
 0x224   :  { %v278_v3 = vpop.xlane.xlu1 %277  ;;  %v280_v4 = vpop.xlane.xlu0 %279 }
 0x225   :  { %2319 = vrsqrt.f32 %v296_v0  ;;  %v290_v5 = vmul.f32 0.0078125, %v278_v3  ;;  %v291_v8 = vmul.f32 0.0078125, %v280_v4  ;;  %v385_v3 = vlaneseq }
 0x226   :  { %2321 = vrsqrt.f32 %v297_v2 }
 0x227   :  { %v298_v7 = vadd.f32 1e-05, %v290_v5  ;;  %v299_v13 = vadd.f32 1e-05, %v291_v8  ;;  %v386_v4 = vshrl.u32 %v385_v3, 7 }
 0x228   :  { %v282_v10 = vpop.xlane.xlu1 %281  ;;  %v284_v17 = vpop.xlane.xlu0 %283 }
 0x229   :  { %2323 = vrsqrt.f32 %v298_v7  ;;  %v292_v11 = vmul.f32 0.0078125, %v282_v10  ;;  %v293_v24 = vmul.f32 0.0078125, %v284_v17  ;;  %v395_v5 = vsub.s32 2, %v386_v4 }
 0x22a   :  { %v391_v7 = vsub.s32 1, %v386_v4  ;;  %v399_v8 = vsub.s32 3, %v386_v4 }
 0x22b   :  { %v2318_v12 = vpop.eup %2317  ;;  %v300_v15 = vadd.f32 1e-05, %v292_v11  ;;  %v301_v34 = vadd.f32 1e-05, %v293_v24 }
 0x22c   :  { %v286_v18 = vpop.xlane.xlu1 %285  ;;  %v311_v19 = vmul.f32 %v2318_v12, %v2641_v56 }
 0x22d   :  { %2325 = vrsqrt.f32 %v300_v15  ;;  %v294_v20 = vmul.f32 0.0078125, %v286_v18 }
 0x22e   :  { %2327 = vrsqrt.f32 %v299_v13  ;;  %v325_v28 = vmul.f32 %v2025_v21, %v311_v19 }
 0x22f   :  { %v2320_v23 = vpop.eup %2319  ;;  %v302_v31 = vadd.f32 1e-05, %v294_v20 }
 0x230   :  { %v312_v26 = vmul.f32 %v2320_v23, %v2649_v63  ;;  %v2322_v29 = vpop.eup %2321  ;;  %v339_v35 = vadd.f32 %v2026_v32, %v325_v28 }
 0x231   :  { %v313_v37 = vmul.f32 %v2322_v29, %v2644_v59  ;;  %2329 = vrsqrt.f32 %v302_v31 }
 0x232   :  { %v326_v33 = vmul.f32 %v2025_v21, %v312_v26  ;;  %2331 = vrsqrt.f32 %v301_v34 }
 0x233   :  { %v2324_v56 = vpop.eup %2323  ;;  %v327_v45 = vmul.f32 %v2025_v21, %v313_v37 }
 0x234   :  { %v340_v36 = vadd.f32 %v2026_v32, %v326_v33  ;;  %v314_v38 = vmul.f32 %v2324_v56, %v2652_v1 }
 0x235   :  { %v341_v49 = vadd.f32 %v2026_v32, %v327_v45 }
 0x236   :  { %v379_v40 = vpack.c.bf16 %v340_v36, %v339_v35  ;;  %v328_v41 = vmul.f32 %v2025_v21, %v314_v38 }
 0x237   :  { %v2326_v63 = vpop.eup %2325 }
 0x238   :  { %598 = vmatmul.mubr.bf16.vlgmr.msra.gmra.mrb[0].mxu1 %v379_v40  ;;  %671 = vmatmul.mubr.bf16.vlgmr.msra.gmra.mrb[8].mxu0 %v379_v40  ;;  %v2328_v46 = vpop.eup %2327  ;;  %v342_v47 = vadd.f32 %v2026_v32, %v328_v41  ;;  %v316_v48 = vmul.f32 %v2326_v63, %v2662_v9 }
 0x239   :  { %607 = vmatprep.mubr.bf16.mxu1 %v2476_v53  ;;  %680 = vmatprep.mubr.bf16.mxu0 %v2476_v53  ;;  %v315_v59 = vmul.f32 %v2328_v46, %v2659_v6 }
 0x23a   :  { %v380_v1 = vpack.c.bf16 %v342_v47, %v341_v49  ;;  %v330_v50 = vmul.f32 %v2025_v21, %v316_v48 }
 0x23b   :  { %v2330_v51 = vpop.eup %2329  ;;  %v329_v52 = vmul.f32 %v2025_v21, %v315_v59 }
 0x23c   :  { %v2332_v54 = vpop.eup %2331  ;;  %v344_v55 = vadd.f32 %v2026_v32, %v330_v50  ;;  %v318_v57 = vmul.f32 %v2330_v51, %v2672_v16  ;;  %v387_v16 = vsub.s32 0, %v386_v4 }
 0x23d   :  { %v343_v58 = vadd.f32 %v2026_v32, %v329_v52  ;;  %v317_v9 = vmul.f32 %v2332_v54, %v2669_v14  ;;  %v383_v14 = vld [vmem:[%s3932_s7] sm:$0xf] }
 0x23e   :  { %v332_v61 = vmul.f32 %v2025_v21, %v318_v57  ;;  %v2780_v10 = vrot.slane %v383_v14, %v387_v16  ;;  %v2782_v11 = vrot.slane %v383_v14, %v395_v5  ;;  %v2786_v12 = vrot.slane %v383_v14, %v399_v8 }
 0x23f   :  { %v381_v60 = vpack.c.bf16 %v344_v55, %v343_v58  ;;  %v331_v6 = vmul.f32 %v2025_v21, %v317_v9 }
 0x240   :  { %608 = vmatmul.mubr.bf16.gmra.mrb[4].mxu1 %v380_v1  ;;  %681 = vmatmul.mubr.bf16.gmra.mrb[12].mxu0 %v380_v1  ;;  %v346_v62 = vadd.f32 %v2026_v32, %v332_v61 }
 0x241   :  { %617 = vmatprep.mubr.bf16.mxu1 %v2476_v53  ;;  %690 = vmatprep.mubr.bf16.mxu0 %v2476_v53  ;;  %v345_v0 = vadd.f32 %v2026_v32, %v331_v6 }
 0x243   :  { %v382_v2 = vpack.c.bf16 %v346_v62, %v345_v0 }
 0x248   :  { %618 = vmatmul.mubr.bf16.gmra.mrb[8].mxu1 %v381_v60  ;;  %691 = vmatmul.mubr.bf16.gmra.mrb[16].mxu0 %v381_v60 }
 0x249   :  { %627 = vmatprep.mubr.bf16.mxu1 %v2476_v53  ;;  %700 = vmatprep.mubr.bf16.mxu0 %v2476_v53  ;;  %v2784_v53 = vrot.slane %v383_v14, %v391_v7 }
 0x250   :  { %628 = vmatmul.mubr.bf16.gmra.mrb[12].mxu1 %v382_v2  ;;  %701 = vmatmul.mubr.bf16.gmra.mrb[20].mxu0 %v382_v2 }
 0x30b   :  { %v599_v13 = vpop.f32.mrb[0].mxu1  ;;  %v672_v15 = vpop.f32.mrb[8].mxu0 }
 0x30c   :  { %v2789_v17 = vadd.f32 %v599_v13, %v2780_v10  ;;  %v2792_v18 = vadd.f32 %v672_v15, %v2782_v11  ;;  %v601_v19 = vpop.f32.mrb[1].mxu1  ;;  %v674_v20 = vpop.f32.mrb[9].mxu0  ;;  %v2285_v13 = vld [vmem:[%s3933_s8 + $0x40] sm:$0xff]  }
 0x30d   :  { %v2795_v21 = vadd.f32 %v601_v19, %v2784_v53  ;;  %v2798_v23 = vadd.f32 %v674_v20, %v2786_v12  ;;  %v603_v24 = vpop.f32.mrb[2].mxu1  ;;  %v676_v26 = vpop.f32.mrb[10].mxu0  ;;  %2104 = vmatprep.subr.bf16.mxu1 %v2285_v13 }
 0x30e   :  { %v2801_v28 = vmul.f32 0.70710677, %v2789_v17  ;;  %v2804_v29 = vmul.f32 0.70710677, %v2792_v18  ;;  %v605_v38 = vpop.f32.mrb[3].mxu1  ;;  %v678_v40 = vpop.f32.mrb[11].mxu0  ;;  %v2835_v52 = vadd.f32 %v603_v24, %v2780_v10  ;;  %v2842_v57 = vadd.f32 %v676_v26, %v2782_v11 }
 0x30f   :  { %v2807_v31 = vmul.f32 0.70710677, %v2795_v21  ;;  %v2810_v32 = vmul.f32 0.70710677, %v2798_v23  ;;  %v2848_v61 = vadd.f32 %v605_v38, %v2784_v53  ;;  %v2855_v2 = vadd.f32 %v678_v40, %v2786_v12 }
 0x310   :  { %v775_v33 = vand.u32 2147483647, %v2801_v28  ;;  %v777_v56 = vand.u32 2147483647, %v2804_v29  ;;  %v2845_v60 = vmul.f32 0.70710677, %v2835_v52 }
 0x311   :  { %v2815_v34 = vand.u32 2147483647, %v2807_v31  ;;  %v2818_v35 = vand.u32 2147483647, %v2810_v32  ;;  %v2851_v6 = vmul.f32 0.70710677, %v2842_v57 }
 0x312   :  { %v807_v36 = vmul.f32 0.3275911, %v775_v33  ;;  %v809_v37 = vmul.f32 0.3275911, %v777_v56  ;;  %v1223_v58 = vmul.f32 %v775_v33, %v775_v33  ;;  %v1225_v62 = vmul.f32 %v777_v56, %v777_v56 }
 0x313   :  { %v808_v41 = vmul.f32 0.3275911, %v2815_v34  ;;  %v2821_v63 = vpop.f32.mrb[4].mxu1  ;;  %v2823_v45 = vpop.f32.mrb[12].mxu0  ;;  %v810_v48 = vmul.f32 0.3275911, %v2818_v35 }
 0x314   :  { %v839_v46 = vadd.f32 1.0, %v807_v36  ;;  %v841_v47 = vadd.f32 1.0, %v809_v37  ;;  %v2826_v49 = vpop.f32.mrb[5].mxu1  ;;  %v2828_v59 = vpop.f32.mrb[13].mxu0  ;;  %v779_v0 = vand.u32 2147483647, %v2845_v60 }
 0x315   :  { %v2830_v1 = vpop.f32.mrb[6].mxu1  ;;  %v2832_v50 = vpop.f32.mrb[14].mxu0  ;;  %v840_v51 = vadd.f32 1.0, %v808_v41  ;;  %v842_v9 = vadd.f32 1.0, %v810_v48  ;;  %v781_v3 = vand.u32 2147483647, %v2851_v6 }
 0x316   :  { %2333 = vrcp.f32 %v839_v46  ;;  %v2837_v54 = vpop.f32.mrb[7].mxu1  ;;  %v2839_v55 = vpop.f32.mrb[15].mxu0  ;;  %v2859_v4 = vmul.f32 0.70710677, %v2848_v61  ;;  %v1255_v5 = vsub.f32 0.0, %v1223_v58  ;;  %v1257_v26 = vsub.f32 0.0, %v1225_v62 }
 0x317   :  { %2335 = vrcp.f32 %v841_v47  ;;  %v811_v14 = vmul.f32 0.3275911, %v779_v0  ;;  %v813_v15 = vmul.f32 0.3275911, %v781_v3  ;;  %v2878_v56 = vmul.f32 0.70710677, %v2855_v2 }
 0x318   :  { %2337 = vrcp.f32 %v840_v51  ;;  %v2871_v19 = vand.u32 2147483647, %v2859_v4  ;;  %v2883_v37 = vmul.f32 0.5, %v2789_v17  ;;  %v1287_v48 = vmul.f32 1.442695, %v1255_v5 }
 0x319   :  { %2339 = vrcp.f32 %v842_v9  ;;  %v843_v33 = vadd.f32 1.0, %v811_v14  ;;  %v845_v38 = vadd.f32 1.0, %v813_v15  ;;  %v2893_v51 = vmul.f32 0.5, %v2792_v18 }
 0x31a   :  { %v812_v40 = vmul.f32 0.3275911, %v2871_v19  ;;  %v2896_v58 = vand.u32 2147483647, %v2878_v56  ;;  %v1227_v62 = vmul.f32 %v779_v0, %v779_v0  ;;  %v1291_v15 = vmul.f32 1.442695, %v1257_v26 }
 0x31b   :  { %v2861_v16 = vpop.f32.mrb[8].mxu1  ;;  %v2863_v7 = vpop.f32.mrb[16].mxu0  ;;  %2341 = vrcp.f32 %v843_v33  ;;  %v2905_v18 = vadd.f32 %v2821_v63, %v2780_v10  ;;  %v1229_v0 = vmul.f32 %v781_v3, %v781_v3  ;;  %vm1415_vm0 = vcmp.ge.f32.partialorder %v2801_v28, 0.0 }
 0x31c   :  { %3970 = vst [vmem:[#allocation10_spill] sm:$0xff] %v2863_v7  ;;  %v2865_v8 = vpop.f32.mrb[9].mxu1  ;;  %v2873_v20 = vpop.f32.mrb[17].mxu0  ;;  %2343 = vrcp.f32 %v845_v38  ;;  %v844_v14 = vadd.f32 1.0, %v812_v40  ;;  %v814_v44 = vmul.f32 0.3275911, %v2896_v58 }
 0x31d   :  { %3971 = vst [vmem:[#allocation11_spill] sm:$0xff] %v2865_v8  ;;  %3972 = vst [vmem:[#allocation12_spill] sm:$0xff] %v2873_v20  ;;  %v2875_v24 = vpop.f32.mrb[10].mxu1  ;;  %v2880_v36 = vpop.f32.mrb[18].mxu0  ;;  %v1259_v27 = vsub.f32 0.0, %v1227_v62  ;;  %vm1417_vm1 = vcmp.ge.f32.partialorder %v2804_v29, 0.0  ;;  %v3019_v29 = vadd.f32 %v2826_v49, %v2784_v53 }
 0x31e   :  { %3973 = vst [vmem:[#allocation13_spill] sm:$0xff] %v2875_v24  ;;  %3974 = vst [vmem:[#allocation14_spill] sm:$0xff] %v2880_v36  ;;  %v2886_v41 = vpop.f32.mrb[11].mxu1  ;;  %v2888_v46 = vpop.f32.mrb[19].mxu0  ;;  %2345 = vrcp.f32 %v844_v14  ;;  %v846_v38 = vadd.f32 1.0, %v814_v44  ;;  %vm1419_vm2 = vcmp.ge.f32.partialorder %v2845_v60, 0.0 }
 0x31f   :  { %3975 = vst [vmem:[#allocation15_spill] sm:$0xff] %v2886_v41  ;;  %3976 = vst [vmem:[#allocation16_spill] sm:$0xff] %v2888_v46  ;;  %2347 = vpow2.f32 %v1287_v48  ;;  %vm1421_vm3 = vcmp.ge.f32.partialorder %v2851_v6, 0.0  ;;  %vm1416_vm4 = vcmp.ge.f32.partialorder %v2807_v31, 0.0  ;;  %vm1418_vm5 = vcmp.ge.f32.partialorder %v2810_v32, 0.0 }
 0x320   :  { %v2890_v47 = vpop.eup %2333  ;;  %2349 = vrcp.f32 %v846_v38  ;;  %v3135_v31 = vmul.f32 0.5, %v2905_v18  ;;  %vm1420_vm6 = vcmp.ge.f32.partialorder %v2859_v4, 0.0  ;;  %vm1422_vm7 = vcmp.ge.f32.partialorder %v2878_v56, 0.0  ;;  %v2311_v56 = vld [vmem:[%s3933_s8 + $0xf0] sm:$0xff]  }
 0x321   :  { %v2898_v9 = vpop.eup %2335  ;;  %v935_v17 = vmul.f32 1.0614054, %v2890_v47  ;;  %2351 = vpow2.f32 %v1291_v15 }
 0x322   :  { %v937_v13 = vmul.f32 1.0614054, %v2898_v9  ;;  %v2911_v43 = vpop.eup %2337 }
 0x323   :  { %v967_v5 = vadd.f32 -1.4531521, %v935_v17  ;;  %v2907_v33 = vpop.f32.mrb[12].mxu1  ;;  %v2909_v42 = vpop.f32.mrb[20].mxu0  ;;  %v2917_v17 = vmul.f32 0.5, %v2795_v21  ;;  %v1261_v21 = vsub.f32 0.0, %v1229_v0 }
 0x324   :  { %3977 = vst [vmem:[#allocation17_spill] sm:$0xff] %v2907_v33  ;;  %3978 = vst [vmem:[#allocation18_spill] sm:$0xff] %v2909_v42  ;;  %v969_v39 = vadd.f32 -1.4531521, %v937_v13  ;;  %v2913_v40 = vpop.f32.mrb[13].mxu1  ;;  %v2920_v22 = vpop.eup %2339 }
 0x325   :  { %3979 = vst [vmem:[#allocation19_spill] sm:$0xff] %v2913_v40  ;;  %v999_v26 = vmul.f32 %v2890_v47, %v967_v5  ;;  %3980 = vst [vmem:[#allocation20_spill] sm:$0xff] %v2917_v17  ;;  %v936_v63 = vmul.f32 1.0614054, %v2911_v43  ;;  %v2924_v13 = vmul.f32 0.70710677, %v2905_v18  ;;  %v2932_v42 = vpop.eup %2341 }
 0x326   :  { %v1001_v30 = vmul.f32 %v2898_v9, %v969_v39  ;;  %v938_v14 = vmul.f32 1.0614054, %v2920_v22  ;;  %v1295_v39 = vmul.f32 1.442695, %v1259_v27  ;;  %v2940_v0 = vpop.eup %2343  ;;  %v939_v27 = vmul.f32 1.0614054, %v2932_v42 }
 0x327   :  { %3981 = vst [vmem:[#allocation21_spill] sm:$0xff] %v2924_v13  ;;  %v1031_v3 = vadd.f32 1.4214138, %v999_v26  ;;  %v968_v44 = vadd.f32 -1.4531521, %v936_v63  ;;  %v1224_v63 = vmul.f32 %v2815_v34, %v2815_v34  ;;  %v2947_v36 = vpop.f32.mrb[21].mxu0 }
 0x328   :  { %v1033_v5 = vadd.f32 1.4214138, %v1001_v30  ;;  %v2928_v25 = vand.u32 2147483647, %v2924_v13  ;;  %v970_v40 = vadd.f32 -1.4531521, %v938_v14  ;;  %v1226_v30 = vmul.f32 %v2818_v35, %v2818_v35  ;;  %v2949_v24 = vpop.eup %2345 }
 0x329   :  { %v1063_v62 = vmul.f32 %v2890_v47, %v1031_v3  ;;  %v1000_v48 = vmul.f32 %v2911_v43, %v968_v44  ;;  %v941_v33 = vmul.f32 1.0614054, %v2940_v0  ;;  %v971_v35 = vadd.f32 -1.4531521, %v939_v27  ;;  %3982 = vst [vmem:[#allocation22_spill] sm:$0xff] %v2947_v36  ;;  %v2348_v17 = vpop.eup %2347 }
 0x32a   :  { %v1065_v26 = vmul.f32 %v2898_v9, %v1033_v5  ;;  %v815_v15 = vmul.f32 0.3275911, %v2928_v25  ;;  %v1002_v44 = vmul.f32 %v2920_v22, %v970_v40  ;;  %v1299_v5 = vmul.f32 1.442695, %v1261_v21  ;;  %v2955_v27 = vpop.eup %2349 }
 0x32b   :  { %v1095_v38 = vadd.f32 -0.28449672, %v1063_v62  ;;  %v1032_v3 = vadd.f32 1.4214138, %v1000_v48  ;;  %v1256_v48 = vsub.f32 0.0, %v1224_v63  ;;  %v1258_v40 = vsub.f32 0.0, %v1226_v30 }
 0x32c   :  { %v1097_v14 = vadd.f32 -0.28449672, %v1065_v26  ;;  %v1034_v41 = vadd.f32 1.4214138, %v1002_v44  ;;  %v973_v20 = vadd.f32 -1.4531521, %v941_v33  ;;  %v1003_v26 = vmul.f32 %v2932_v42, %v971_v35 }
 0x32d   :  { %v1127_v46 = vmul.f32 %v2890_v47, %v1095_v38  ;;  %v1064_v34 = vmul.f32 %v2911_v43, %v1032_v3  ;;  %2353 = vpow2.f32 %v1295_v39  ;;  %v847_v21 = vadd.f32 1.0, %v815_v15 }
 0x32e   :  { %v1129_v62 = vmul.f32 %v2898_v9, %v1097_v14  ;;  %v1005_v3 = vmul.f32 %v2940_v0, %v973_v20  ;;  %2355 = vpow2.f32 %v1299_v5  ;;  %v940_v44 = vmul.f32 1.0614054, %v2949_v24 }
 0x32f   :  { %v1159_v8 = vadd.f32 0.2548296, %v1127_v46  ;;  %v1096_v14 = vadd.f32 -0.28449672, %v1064_v34  ;;  %v1066_v63 = vmul.f32 %v2920_v22, %v1034_v41  ;;  %v1035_v33 = vadd.f32 1.4214138, %v1003_v26  ;;  %v2352_v46 = vpop.eup %2351 }
 0x330   :  { %v1161_v38 = vadd.f32 0.2548296, %v1129_v62  ;;  %v1037_v39 = vadd.f32 1.4214138, %v1005_v3  ;;  %v972_v15 = vadd.f32 -1.4531521, %v940_v44  ;;  %2357 = vrcp.f32 %v847_v21 }
 0x331   :  { %v1191_v36 = vmul.f32 %v2890_v47, %v1159_v8  ;;  %v942_v35 = vmul.f32 1.0614054, %v2955_v27  ;;  %v1289_v20 = vmul.f32 1.442695, %v1256_v48  ;;  %v1067_v5 = vmul.f32 %v2932_v42, %v1035_v33  ;;  %v2967_v41 = vld [vmem:[%s3933_s8 + $0xc0] sm:$0xff]   ;;  %v2982_v44 = vpop.f32.mrb[14].mxu1 }
 0x332   :  { %v1193_v30 = vmul.f32 %v2898_v9, %v1161_v38  ;;  %v1069_v7 = vmul.f32 %v2940_v0, %v1037_v39  ;;  %v1004_v8 = vmul.f32 %v2949_v24, %v972_v15  ;;  %v2970_v9 = vmul.f32 0.5, %v2798_v23  ;;  %2144 = vmatprep.subr.bf16.mxu0 %v2967_v41  ;;  %3983 = vst [vmem:[#allocation23_spill] sm:$0xff] %v2982_v44 }
 0x333   :  { %v1351_v62 = vmul.f32 %v2348_v17, %v1191_v36  ;;  %v974_v47 = vadd.f32 -1.4531521, %v942_v35  ;;  %v1293_v34 = vmul.f32 1.442695, %v1258_v40  ;;  %v1099_v36 = vadd.f32 -0.28449672, %v1067_v5 }
 0x334   :  { %v1353_v13 = vmul.f32 %v2352_v46, %v1193_v30  ;;  %v2286_v17 = vld [vmem:[%s3933_s8] sm:$0xff]   ;;  %v1128_v48 = vmul.f32 %v2911_v43, %v1096_v14  ;;  %v1098_v26 = vadd.f32 -0.28449672, %v1066_v63  ;;  %v1101_v21 = vadd.f32 -0.28449672, %v1069_v7 }
 0x335   :  { %v1228_v38 = vmul.f32 %v2871_v19, %v2871_v19  ;;  %v1383_v3 = vsub.f32 1.0, %v1351_v62  ;;  %v1131_v23 = vmul.f32 %v2932_v42, %v1099_v36  ;;  %v1006_v40 = vmul.f32 %v2955_v27, %v974_v47  ;;  %2105 = vmatpush3.bf16.msra.mxu1 %v2286_v17 }
 0x336   :  { %v1385_v33 = vsub.f32 1.0, %v1353_v13  ;;  %2359 = vpow2.f32 %v1289_v20  ;;  %v1133_v46 = vmul.f32 %v2940_v0, %v1101_v21  ;;  %v1036_v14 = vadd.f32 1.4214138, %v1004_v8  ;;  %v2992_v21 = vpop.f32.mrb[22].mxu0 }
 0x337   :  { %v2354_v63 = vpop.eup %2353  ;;  %v715_v7 = vmul.f32 0.5, %v2835_v52  ;;  %v1163_v19 = vadd.f32 0.2548296, %v1131_v23  ;;  %v1160_v39 = vadd.f32 0.2548296, %v1128_v48  ;;  %v717_v15 = vmul.f32 0.5, %v2842_v57 }
 0x338   :  { %v2356_v30 = vpop.eup %2355  ;;  %v1165_v35 = vadd.f32 0.2548296, %v1133_v46  ;;  %v1260_v62 = vsub.f32 0.0, %v1228_v38  ;;  %v1447_v5 = vsub.f32 0.0, %v1383_v3  ;;  %v1130_v47 = vmul.f32 %v2920_v22, %v1098_v26  ;;  %3984 = vst [vmem:[#allocation24_spill] sm:$0xff] %v2992_v21 }
 0x339   :  { %v1195_v13 = vmul.f32 %v2932_v42, %v1163_v19  ;;  %v1038_v20 = vadd.f32 1.4214138, %v1006_v40  ;;  %v1449_v36 = vsub.f32 0.0, %v1385_v33  ;;  %v1068_v17 = vmul.f32 %v2949_v24, %v1036_v14 }
 0x33a   :  { %v1197_v8 = vmul.f32 %v2940_v0, %v1165_v35  ;;  %v2994_v52 = vpop.eup %2357  ;;  %2361 = vpow2.f32 %v1293_v34  ;;  %v1230_v57 = vmul.f32 %v2896_v58, %v2896_v58  ;;  %v3000_v26 = vadd.f32 %v2823_v45, %v2782_v11 }
 0x33b   :  { %v1355_v48 = vmul.f32 %v2354_v63, %v1195_v13  ;;  %v1297_v0 = vmul.f32 1.442695, %v1260_v62  ;;  %v1479_v38 = vsel %vm1415_vm0, %v1383_v3, %v1447_v5  ;;  %v1192_v23 = vmul.f32 %v2911_v43, %v1160_v39  ;;  %v2288_v63 = vld [vmem:[%s3933_s8 + $0x80] sm:$0xff]   ;;  %v3028_v13 = vpop.f32.mrb[15].mxu1 }
 0x33c   :  { %v1357_v42 = vmul.f32 %v2356_v30, %v1197_v8  ;;  %v1162_v34 = vadd.f32 0.2548296, %v1130_v47  ;;  %v1481_v58 = vsel %vm1417_vm1, %v1385_v33, %v1449_v36  ;;  %v1100_v14 = vadd.f32 -0.28449672, %v1068_v17  ;;  %2145 = vmatpush3.bf16.msra.mxu0 %v2288_v63  ;;  %3985 = vst [vmem:[#allocation25_spill] sm:$0xff] %v3028_v13 }
 0x33d   :  { %v1387_v40 = vsub.f32 1.0, %v1355_v48  ;;  %v1070_v45 = vmul.f32 %v2955_v27, %v1038_v20  ;;  %v1262_v30 = vsub.f32 0.0, %v1230_v57  ;;  %v943_v28 = vmul.f32 1.0614054, %v2994_v52 }
 0x33e   :  { %v1389_v46 = vsub.f32 1.0, %v1357_v42  ;;  %v3015_v3 = vmul.f32 0.70710677, %v3000_v26  ;;  %v1511_v39 = vadd.f32 1.0, %v1479_v38  ;;  %v1513_v33 = vadd.f32 1.0, %v1481_v58 }
 0x33f   :  { %v1451_v19 = vsub.f32 0.0, %v1387_v40  ;;  %v1194_v20 = vmul.f32 %v2920_v22, %v1162_v34  ;;  %v1102_v49 = vadd.f32 -0.28449672, %v1070_v45  ;;  %v1132_v48 = vmul.f32 %v2949_v24, %v1100_v14  ;;  %v3043_v22 = vpop.f32.mrb[23].mxu0 }
 0x340   :  { %v2360_v43 = vpop.eup %2359  ;;  %v1453_v35 = vsub.f32 0.0, %v1389_v46  ;;  %v3026_v47 = vand.u32 2147483647, %v3015_v3  ;;  %v975_v57 = vadd.f32 -1.4531521, %v943_v28  ;;  %v3036_v60 = vmul.f32 %v1511_v39, %v2883_v37  ;;  %3988 = vst [vmem:[#allocation28_spill] sm:$0xff] %v3043_v22 }
 0x341   :  { %v3021_v62 = vmul.f32 %v2360_v43, %v1192_v23  ;;  %v1483_v5 = vsel %vm1419_vm2, %v1387_v40, %v1451_v19  ;;  %2363 = vpow2.f32 %v1297_v0  ;;  %v3041_v23 = vmul.f32 0.70710677, %v3019_v29  ;;  %v2289_v43 = vld [vmem:[%s3933_s8 + $0x48] sm:$0xff]  }
 0x342   :  { %v1515_v36 = vadd.f32 1.0, %v1483_v5  ;;  %v1485_v8 = vsel %vm1421_vm3, %v1389_v46, %v1453_v35  ;;  %v817_v42 = vmul.f32 0.3275911, %v3026_v47  ;;  %3986 = vst [vmem:[#allocation26_spill] sm:$0xff] %v3036_v60  ;;  %v3046_v34 = vmul.f32 %v1513_v33, %v2893_v51  ;;  %v2291_v39 = vld [vmem:[%s3933_s8 + $0xc8] sm:$0xff]   ;;  %2106 = vmatprep.subr.bf16.mxu1 %v2289_v43 }
 0x343   :  { %v1517_v17 = vadd.f32 1.0, %v1485_v8  ;;  %v1231_v58 = vmul.f32 %v2928_v25, %v2928_v25  ;;  %v1301_v0 = vmul.f32 1.442695, %v1262_v30  ;;  %v3057_v14 = vand.u32 2147483647, %v3041_v23  ;;  %v2292_v5 = vld [vmem:[%s3933_s8 + $0x88] sm:$0xff]   ;;  %2146 = vmatprep.subr.bf16.mxu0 %v2291_v39 }
 0x344   :  { %v3038_v38 = vmul.f32 %v1515_v36, %v715_v7  ;;  %v2362_v6 = vpop.eup %2361  ;;  %3989 = vst [vmem:[#allocation29_spill] sm:$0xff] %v3046_v34  ;;  %v849_v46 = vadd.f32 1.0, %v817_v42  ;;  %v1384_v45 = vsub.f32 1.0, %v3021_v62  ;;  %v1134_v25 = vmul.f32 %v2955_v27, %v1102_v49  ;;  %2147 = vmatpush3.bf16.msra.mxu0 %v2292_v5 }
 0x345   :  { %v3048_v40 = vmul.f32 %v1517_v17, %v717_v15  ;;  %v3052_v37 = vmul.f32 %v2362_v6, %v1194_v20  ;;  %v1164_v15 = vadd.f32 0.2548296, %v1132_v48  ;;  %v1007_v63 = vmul.f32 %v2994_v52, %v975_v57 }
 0x346   :  { %3987 = vst [vmem:[#allocation27_spill] sm:$0xff] %v3038_v38  ;;  %2365 = vrcp.f32 %v849_v46  ;;  %v816_v19 = vmul.f32 0.3275911, %v3057_v14  ;;  %v3068_v30 = vmul.f32 0.5, %v2848_v61  ;;  %v1263_v28 = vsub.f32 0.0, %v1231_v58  ;;  %v2290_v61 = vld [vmem:[%s3933_s8 + $0x8] sm:$0xff]  }
 0x347   :  { %3990 = vst [vmem:[#allocation30_spill] sm:$0xff] %v3048_v40  ;;  %v1386_v35 = vsub.f32 1.0, %v3052_v37  ;;  %2367 = vpow2.f32 %v1301_v0  ;;  %v3079_v62 = vadd.f32 %v2828_v59, %v2786_v12  ;;  %v1448_v20 = vsub.f32 0.0, %v1384_v45  ;;  %2107 = vmatpush3.bf16.msra.mxu1 %v2290_v61  ;;  %v2295_v58 = vld [vmem:[%s3933_s8 + $0xd0] sm:$0xff]   ;;  %v2308_v38 = vld [vmem:[%s3933_s8 + $0xa8] sm:$0xff]  }
 0x348   :  { %v848_v33 = vadd.f32 1.0, %v816_v19  ;;  %v1196_v36 = vmul.f32 %v2949_v24, %v1164_v15  ;;  %v3090_v8 = vadd.f32 %v2830_v1, %v2780_v10  ;;  %v3094_v49 = vadd.f32 %v2832_v50, %v2782_v11  ;;  %v2293_v50 = vld [vmem:[%s3933_s8 + $0x50] sm:$0xff]   ;;  %2148 = vmatprep.subr.bf16.mxu0 %v2295_v58 }
 0x349   :  { %v1166_v59 = vadd.f32 0.2548296, %v1134_v25  ;;  %v1039_v17 = vadd.f32 1.4214138, %v1007_v63  ;;  %v3097_v48 = vmul.f32 0.5, %v2855_v2  ;;  %v1450_v42 = vsub.f32 0.0, %v1386_v35  ;;  %2108 = vmatprep.subr.bf16.mxu1 %v2293_v50 }
 0x34a   :  { %2369 = vrcp.f32 %v848_v33  ;;  %v3100_v24 = vmul.f32 0.70710677, %v3079_v62  ;;  %v3103_v1 = vmul.f32 0.70710677, %v3090_v8  ;;  %v3109_v6 = vmul.f32 0.70710677, %v3094_v49 }
 0x34b   :  { %v2364_v57 = vpop.eup %2363  ;;  %v2294_v2 = vld [vmem:[%s3933_s8 + $0x10] sm:$0xff]   ;;  %v1480_v37 = vsel %vm1416_vm4, %v1384_v45, %v1448_v20  ;;  %v1071_v63 = vmul.f32 %v2994_v52, %v1039_v17  ;;  %v1303_v19 = vmul.f32 1.442695, %v1263_v28  ;;  %v2297_v33 = vld [vmem:[%s3933_s8 + $0x58] sm:$0xff]   ;;  %v1482_v5 = vsel %vm1418_vm5, %v1386_v35, %v1450_v42 }
 0x34c   :  { %v2296_v46 = vld [vmem:[%s3933_s8 + $0x90] sm:$0xff]   ;;  %v3122_v0 = vmul.f32 %v2364_v57, %v1196_v36  ;;  %v3125_v15 = vand.u32 2147483647, %v3100_v24  ;;  %v3128_v25 = vand.u32 2147483647, %v3103_v1  ;;  %2109 = vmatpush3.bf16.msra.mxu1 %v2294_v2  ;;  %v3144_v28 = vadd.f32 1.0, %v1480_v37 }
 0x34d   :  { %v3132_v43 = vand.u32 2147483647, %v3109_v6  ;;  %2149 = vmatpush3.bf16.msra.mxu0 %v2296_v46  ;;  %v1198_v18 = vmul.f32 %v2955_v27, %v1166_v59  ;;  %v2298_v36 = vld [vmem:[%s3933_s8 + $0x18] sm:$0xff]   ;;  %v3164_v27 = vadd.f32 %v2837_v54, %v2784_v53  ;;  %2110 = vmatprep.subr.bf16.mxu1 %v2297_v33  ;;  %v1103_v42 = vadd.f32 -0.28449672, %v1071_v63  ;;  %v2301_v54 = vld [vmem:[%s3933_s8 + $0x60] sm:$0xff]  }
 0x34e   :  { %v818_v45 = vmul.f32 0.3275911, %v3125_v15  ;;  %v819_v39 = vmul.f32 0.3275911, %v3128_v25  ;;  %v2299_v17 = vld [vmem:[%s3933_s8 + $0xd8] sm:$0xff]   ;;  %v1388_v32 = vsub.f32 1.0, %v3122_v0  ;;  %v1232_v4 = vmul.f32 %v3057_v14, %v3057_v14 }
 0x34f   :  { %v821_v20 = vmul.f32 0.3275911, %v3132_v43  ;;  %v2300_v50 = vld [vmem:[%s3933_s8 + $0x98] sm:$0xff]   ;;  %v3167_v2 = vmul.f32 0.5, %v3000_v26  ;;  %2150 = vmatprep.subr.bf16.mxu0 %v2299_v17  ;;  %v3169_v46 = vadd.f32 1.0, %v1482_v5  ;;  %v2303_v63 = vld [vmem:[%s3933_s8 + $0xe0] sm:$0xff]  }
 0x350   :  { %v3142_v61 = vpop.eup %2365  ;;  %v850_v57 = vadd.f32 1.0, %v818_v45  ;;  %v851_v58 = vadd.f32 1.0, %v819_v39  ;;  %2111 = vmatpush3.bf16.msra.mxu1 %v2298_v36  ;;  %v1233_v39 = vmul.f32 %v3026_v47, %v3026_v47  ;;  %v3184_v33 = vmul.f32 0.5, %v3019_v29  ;;  %v2302_v5 = vld [vmem:[%s3933_s8 + $0x20] sm:$0xff]  }
 0x351   :  { %v945_v35 = vmul.f32 1.0614054, %v3142_v61  ;;  %v2368_v59 = vpop.eup %2367  ;;  %v853_v0 = vadd.f32 1.0, %v821_v20  ;;  %2151 = vmatpush3.bf16.msra.mxu0 %v2300_v50  ;;  %v1452_v20 = vsub.f32 0.0, %v1388_v32  ;;  %v3191_v17 = vmul.f32 0.70710677, %v3164_v27  ;;  %2112 = vmatprep.subr.bf16.mxu1 %v2301_v54 }
 0x352   :  { %2371 = vrcp.f32 %v850_v57  ;;  %v3179_v26 = vmul.f32 %v2368_v59, %v1198_v18  ;;  %2152 = vmatprep.subr.bf16.mxu0 %v2303_v63  ;;  %v2304_v47 = vld [vmem:[%s3933_s8 + $0xa0] sm:$0xff]   ;;  %v1135_v29 = vmul.f32 %v2994_v52, %v1103_v42  ;;  %v3199_v18 = vadd.f32 %v2839_v55, %v2786_v12 }
 0x353   :  { %v977_v37 = vadd.f32 -1.4531521, %v945_v35  ;;  %2373 = vrcp.f32 %v851_v58  ;;  %v3203_v50 = vadd.f32 %v2861_v16, %v2780_v10  ;;  %v3207_v59 = vand.u32 2147483647, %v3191_v17  ;;  %v2305_v16 = vld [vmem:[%s3933_s8 + $0x68] sm:$0xff]  }
 0x354   :  { %v3177_v45 = vpop.eup %2369  ;;  %2113 = vmatpush3.bf16.msra.mxu1 %v2302_v5  ;;  %2375 = vrcp.f32 %v853_v0  ;;  %v1390_v58 = vsub.f32 1.0, %v3179_v26  ;;  %v1265_v42 = vsub.f32 0.0, %v1233_v39  ;;  %v3211_v55 = vmul.f32 0.70710677, %v3199_v18 }
 0x355   :  { %v944_v36 = vmul.f32 1.0614054, %v3177_v45  ;;  %v1009_v35 = vmul.f32 %v3142_v61, %v977_v37  ;;  %2153 = vmatpush3.bf16.msra.mxu0 %v2304_v47  ;;  %2377 = vpow2.f32 %v1303_v19  ;;  %v2306_v37 = vld [vmem:[%s3933_s8 + $0x28] sm:$0xff]   ;;  %v1484_v0 = vsel %vm1420_vm6, %v1388_v32, %v1452_v20  ;;  %2114 = vmatprep.subr.bf16.mxu1 %v2305_v16 }
 0x356   :  { %3991 = vst [vmem:[#allocation31_spill] sm:$0xff] %v3211_v55  ;;  %v820_v63 = vmul.f32 0.3275911, %v3207_v59  ;;  %v1167_v19 = vadd.f32 0.2548296, %v1135_v29  ;;  %v3232_v20 = vadd.f32 1.0, %v1484_v0 }
 0x357   :  { %v976_v57 = vadd.f32 -1.4531521, %v944_v36  ;;  %v3225_v26 = vand.u32 2147483647, %v3211_v55  ;;  %v3228_v39 = vmul.f32 0.70710677, %v3203_v50 }
 0x358   :  { %v1041_v5 = vadd.f32 1.4214138, %v1009_v35  ;;  %v852_v32 = vadd.f32 1.0, %v820_v63  ;;  %2115 = vmatpush3.bf16.msra.mxu1 %v2306_v37  ;;  %v1307_v35 = vmul.f32 1.442695, %v1265_v42  ;;  %v1454_v14 = vsub.f32 0.0, %v1390_v58 }
 0x359   :  { %v1008_v54 = vmul.f32 %v3177_v45, %v976_v57  ;;  %3992 = vst [vmem:[#allocation32_spill] sm:$0xff] %v3228_v39  ;;  %v822_v47 = vmul.f32 0.3275911, %v3225_v26  ;;  %v3236_v29 = vand.u32 2147483647, %v3228_v39  ;;  %v2307_v57 = vld [vmem:[%s3933_s8 + $0xe8] sm:$0xff]   ;;  %v1199_v63 = vmul.f32 %v2994_v52, %v1167_v19 }
 0x35a   :  { %2379 = vrcp.f32 %v852_v32  ;;  %2154 = vmatprep.subr.bf16.mxu0 %v2307_v57  ;;  %v1073_v7 = vmul.f32 %v3142_v61, %v1041_v5  ;;  %v1264_v34 = vsub.f32 0.0, %v1232_v4  ;;  %v1234_v57 = vmul.f32 %v3125_v15, %v3125_v15 }
 0x35b   :  { %v1040_v36 = vadd.f32 1.4214138, %v1008_v54  ;;  %v854_v0 = vadd.f32 1.0, %v822_v47  ;;  %v823_v54 = vmul.f32 0.3275911, %v3236_v29  ;;  %2155 = vmatpush3.bf16.msra.mxu0 %v2308_v38  ;;  %v1235_v38 = vmul.f32 %v3128_v25, %v3128_v25 }
 0x35c   :  { %v3241_v51 = vpop.eup %2371  ;;  %v1105_v13 = vadd.f32 -0.28449672, %v1073_v7  ;;  %v1266_v39 = vsub.f32 0.0, %v1234_v57  ;;  %v3995_v7 = vld [vmem:[#allocation21_spill] sm:$0xff]  ;;  %2156 = vmatprep.subr.bf16.mxu0 %v2311_v56  ;;  %vm1425_vm9 = vcmp.ge.f32.partialorder %v3015_v3, 0.0  ;;  %vm1424_vm10 = vcmp.ge.f32.partialorder %v3041_v23, 0.0 }
 0x35d   :  { %v3243_v16 = vpop.eup %2373  ;;  %v946_v37 = vmul.f32 1.0614054, %v3241_v51  ;;  %v1072_v60 = vmul.f32 %v3177_v45, %v1040_v36  ;;  %2381 = vrcp.f32 %v854_v0  ;;  %v855_v32 = vadd.f32 1.0, %v823_v54  ;;  %v3993_v36 = vld [vmem:[#allocation10_spill] sm:$0xff]  ;;  %v2309_v0 = vld [vmem:[%s3933_s8 + $0x70] sm:$0xff]  }
 0x35e   :  { %v947_v40 = vmul.f32 1.0614054, %v3243_v16  ;;  %v3254_v47 = vpop.eup %2375  ;;  %v2310_v54 = vld [vmem:[%s3933_s8 + $0x30] sm:$0xff]   ;;  %2116 = vmatprep.subr.bf16.mxu1 %v2309_v0  ;;  %vm1423_vm8 = vcmp.ge.f32.partialorder %v3995_v7, 0.0  ;;  %vm1426_vm11 = vcmp.ge.f32.partialorder %v3100_v24, 0.0  ;;  %vm1427_vm12 = vcmp.ge.f32.partialorder %v3103_v1, 0.0 }
 0x35f   :  { %v978_v42 = vadd.f32 -1.4531521, %v946_v37  ;;  %v2378_v19 = vpop.eup %2377  ;;  %v949_v4 = vmul.f32 1.0614054, %v3254_v47  ;;  %v3262_v37 = vadd.f32 %v3993_v36, %v2782_v11  ;;  %v1104_v36 = vadd.f32 -0.28449672, %v1072_v60  ;;  %2117 = vmatpush3.bf16.msra.mxu1 %v2310_v54 }
 0x360   :  { %v979_v52 = vadd.f32 -1.4531521, %v947_v40  ;;  %v1486_v40 = vsel %vm1422_vm7, %v1390_v58, %v1454_v14  ;;  %v3272_v15 = vmul.f32 %v2378_v19, %v1199_v63  ;;  %2383 = vrcp.f32 %v855_v32  ;;  %v2312_v63 = vld [vmem:[%s3933_s8 + $0xb0] sm:$0xff]   ;;  %v4004_v24 = vld [vmem:[#allocation15_spill] sm:$0xff] }
 0x361   :  { %v1010_v5 = vmul.f32 %v3241_v51, %v978_v42  ;;  %v1305_v42 = vmul.f32 1.442695, %v1264_v34  ;;  %v981_v21 = vadd.f32 -1.4531521, %v949_v4  ;;  %v3278_v55 = vmul.f32 0.70710677, %v3262_v37  ;;  %2157 = vmatpush3.bf16.msra.mxu0 %v2312_v63 }
 0x362   :  { %v1011_v22 = vmul.f32 %v3243_v16, %v979_v52  ;;  %v1391_v60 = vsub.f32 1.0, %v3272_v15  ;;  %v3294_v32 = vadd.f32 1.0, %v1486_v40  ;;  %2385 = vpow2.f32 %v1307_v35  ;;  %v2313_v4 = vld [vmem:[%s3933_s8 + $0x78] sm:$0xff]  }
 0x363   :  { %v1042_v44 = vadd.f32 1.4214138, %v1010_v5  ;;  %3994 = vst [vmem:[#allocation10_spill] sm:$0xff] %v3278_v55  ;;  %v1013_v25 = vmul.f32 %v3254_v47, %v981_v21  ;;  %v3289_v14 = vand.u32 2147483647, %v3278_v55  ;;  %v1137_v52 = vmul.f32 %v3142_v61, %v1105_v13  ;;  %v2314_v13 = vld [vmem:[%s3933_s8 + $0x38] sm:$0xff]   ;;  %2118 = vmatprep.subr.bf16.mxu1 %v2313_v4 }
 0x364   :  { %v1043_v34 = vadd.f32 1.4214138, %v1011_v22  ;;  %v3283_v58 = vpop.eup %2379  ;;  %v1267_v22 = vsub.f32 0.0, %v1235_v38  ;;  %v1136_v19 = vmul.f32 %v3177_v45, %v1104_v36  ;;  %v1309_v5 = vmul.f32 1.442695, %v1266_v39  ;;  %2119 = vmatpush3.bf16.msra.mxu1 %v2314_v13  ;;  %v3997_v55 = vld [vmem:[#allocation20_spill] sm:$0xff] }
 0x365   :  { %v948_v57 = vmul.f32 1.0614054, %v3283_v58  ;;  %v825_v21 = vmul.f32 0.3275911, %v3289_v14  ;;  %2387 = vpow2.f32 %v1305_v42  ;;  %v3306_v35 = vmul.f32 0.5, %v3079_v62  ;;  %2208 = vmatprep.subr.bf16.mxu1 %v2967_v41  ;;  %v2316_v4 = vld [vmem:[%s3933_s8 + $0xb8] sm:$0xff]  }
 0x366   :  { %v1074_v54 = vmul.f32 %v3241_v51, %v1042_v44  ;;  %v1455_v39 = vsub.f32 0.0, %v1391_v60  ;;  %v1075_v15 = vmul.f32 %v3243_v16, %v1043_v34  ;;  %v1045_v36 = vadd.f32 1.4214138, %v1013_v25  ;;  %v3998_v13 = vld [vmem:[#allocation11_spill] sm:$0xff] }
 0x367   :  { %v3303_v0 = vpop.eup %2381  ;;  %3996 = vst [vmem:[#allocation21_spill] sm:$0xff] %v3306_v35  ;;  %v980_v40 = vadd.f32 -1.4531521, %v948_v57  ;;  %v857_v38 = vadd.f32 1.0, %v825_v21  ;;  %v1311_v56 = vmul.f32 1.442695, %v1267_v22  ;;  %v1237_v42 = vmul.f32 %v3132_v43, %v3132_v43 }
 0x368   :  { %v950_v62 = vmul.f32 1.0614054, %v3303_v0  ;;  %v1169_v63 = vadd.f32 0.2548296, %v1137_v52  ;;  %v1168_v44 = vadd.f32 0.2548296, %v1136_v19  ;;  %v3320_v35 = vmul.f32 %v3144_v28, %v3997_v55 }
 0x369   :  { %v1012_v57 = vmul.f32 %v3283_v58, %v980_v40  ;;  %v1106_v34 = vadd.f32 -0.28449672, %v1074_v54  ;;  %v3323_v25 = vmul.f32 0.5, %v3090_v8  ;;  %v2315_v43 = vld [vmem:[%s3933_s8 + $0xf8] sm:$0xff]   ;;  %v3332_v52 = vmul.f32 %v3169_v46, %v2970_v9 }
 0x36a   :  { %v3328_v22 = vpop.eup %2383  ;;  %v1107_v19 = vadd.f32 -0.28449672, %v1075_v15  ;;  %v1077_v41 = vmul.f32 %v3254_v47, %v1045_v36  ;;  %2389 = vrcp.f32 %v857_v38  ;;  %v3337_v28 = vmul.f32 %v3232_v20, %v3068_v30  ;;  %2158 = vmatprep.subr.bf16.mxu0 %v2315_v43 }
 0x36b   :  { %v1487_v8 = vsel %vm1423_vm8, %v1391_v60, %v1455_v39  ;;  %v1269_v55 = vsub.f32 0.0, %v1237_v42  ;;  %v982_v21 = vadd.f32 -1.4531521, %v950_v62  ;;  %v1201_v9 = vmul.f32 %v3142_v61, %v1169_v63  ;;  %2159 = vmatpush3.bf16.msra.mxu0 %v2316_v4 }
 0x36c   :  { %v1200_v46 = vmul.f32 %v3177_v45, %v1168_v44  ;;  %v1044_v54 = vadd.f32 1.4214138, %v1012_v57  ;;  %v1236_v40 = vmul.f32 %v3207_v59, %v3207_v59  ;;  %v2386_v30 = vpop.eup %2385  ;;  %v1138_v20 = vmul.f32 %v3241_v51, %v1106_v34 }
 0x36d   :  { %v3350_v60 = vmul.f32 0.5, %v3094_v49  ;;  %v951_v7 = vmul.f32 1.0614054, %v3328_v22  ;;  %v3355_v39 = vadd.f32 %v3998_v13, %v2784_v53  ;;  %v1519_v61 = vadd.f32 1.0, %v1487_v8 }
 0x36e   :  { %2391 = vpow2.f32 %v1309_v5  ;;  %v1139_v45 = vmul.f32 %v3243_v16, %v1107_v19  ;;  %v1109_v15 = vadd.f32 -0.28449672, %v1077_v41  ;;  %v1315_v59 = vmul.f32 1.442695, %v1269_v55 }
 0x36f   :  { %v2388_v36 = vpop.eup %2387  ;;  %2393 = vpow2.f32 %v1311_v56  ;;  %v1014_v38 = vmul.f32 %v3303_v0, %v982_v21  ;;  %v1238_v49 = vmul.f32 %v3225_v26, %v3225_v26  ;;  %v1361_v42 = vmul.f32 %v2386_v30, %v1201_v9 }
 0x370   :  { %v1360_v62 = vmul.f32 %v2388_v36, %v1200_v46  ;;  %v1076_v63 = vmul.f32 %v3283_v58, %v1044_v54  ;;  %v1268_v44 = vsub.f32 0.0, %v1236_v40  ;;  %v3364_v57 = vmul.f32 %v3294_v32, %v3097_v48 }
 0x371   :  { %v1170_v5 = vadd.f32 0.2548296, %v1138_v20  ;;  %v983_v34 = vadd.f32 -1.4531521, %v951_v7  ;;  %v3367_v43 = vmul.f32 0.70710677, %v3355_v39  ;;  %v3370_v56 = vmul.f32 %v1519_v61, %v3135_v31 }
 0x372   :  { %v1171_v19 = vadd.f32 0.2548296, %v1139_v45  ;;  %v1141_v26 = vmul.f32 %v3254_v47, %v1109_v15  ;;  %v3374_v41 = vmul.f32 0.5, %v3164_v27  ;;  %2395 = vpow2.f32 %v1315_v59 }
 0x373   :  { %3999 = vst [vmem:[#allocation20_spill] sm:$0xff] %v3370_v56  ;;  %v1046_v48 = vadd.f32 1.4214138, %v1014_v38  ;;  %v1270_v32 = vsub.f32 0.0, %v1238_v49  ;;  %v1239_v8 = vmul.f32 %v3236_v29, %v3236_v29  ;;  %v1393_v31 = vsub.f32 1.0, %v1361_v42 }
 0x374   :  { %v3380_v55 = vpop.eup %2389  ;;  %v1392_v21 = vsub.f32 1.0, %v1360_v62  ;;  %v1108_v4 = vadd.f32 -0.28449672, %v1076_v63  ;;  %v3383_v9 = vand.u32 2147483647, %v3367_v43  ;;  %v1202_v27 = vmul.f32 %v3241_v51, %v1170_v5  ;;  %v4001_v5 = vld [vmem:[#allocation13_spill] sm:$0xff] }
 0x375   :  { %v1313_v46 = vmul.f32 1.442695, %v1268_v44  ;;  %v3387_v54 = vmul.f32 0.5, %v3199_v18  ;;  %v1015_v40 = vmul.f32 %v3328_v22, %v983_v34  ;;  %v1203_v30 = vmul.f32 %v3243_v16, %v1171_v19 }
 0x376   :  { %v1173_v20 = vadd.f32 0.2548296, %v1141_v26  ;;  %v3392_v29 = vmul.f32 0.5, %v3203_v50  ;;  %v824_v7 = vmul.f32 0.3275911, %v3383_v9  ;;  %v1078_v13 = vmul.f32 %v3303_v0, %v1046_v48  ;;  %v4000_v50 = vld [vmem:[#allocation12_spill] sm:$0xff] }
 0x377   :  { %v1317_v61 = vmul.f32 1.442695, %v1270_v32  ;;  %v1271_v45 = vsub.f32 0.0, %v1239_v8  ;;  %v953_v51 = vmul.f32 1.0614054, %v3380_v55  ;;  %v1457_v36 = vsub.f32 0.0, %v1393_v31 }
 0x378   :  { %v2392_v15 = vpop.eup %2391  ;;  %v1456_v18 = vsub.f32 0.0, %v1392_v21  ;;  %v1140_v59 = vmul.f32 %v3283_v58, %v1108_v4  ;;  %v856_v38 = vadd.f32 1.0, %v824_v7  ;;  %2397 = vpow2.f32 %v1313_v46 }
 0x379   :  { %v2394_v49 = vpop.eup %2393  ;;  %v1362_v16 = vmul.f32 %v2392_v15, %v1202_v27  ;;  %v1047_v42 = vadd.f32 1.4214138, %v1015_v40  ;;  %v3400_v62 = vadd.f32 %v4000_v50, %v2786_v12  ;;  %v1205_v44 = vmul.f32 %v3254_v47, %v1173_v20 }
 0x37a   :  { %v1363_v63 = vmul.f32 %v2394_v49, %v1203_v30  ;;  %2399 = vrcp.f32 %v856_v38  ;;  %v3405_v34 = vadd.f32 %v4001_v5, %v2780_v10  ;;  %v1110_v19 = vadd.f32 -0.28449672, %v1078_v13 }
 0x37b   :  { %2401 = vpow2.f32 %v1317_v61  ;;  %v1319_v26 = vmul.f32 1.442695, %v1271_v45  ;;  %v985_v48 = vadd.f32 -1.4531521, %v953_v51  ;;  %v1489_v32 = vsel %vm1425_vm9, %v1393_v31, %v1457_v36 }
 0x37c   :  { %v1488_v8 = vsel %vm1424_vm10, %v1392_v21, %v1456_v18  ;;  %v1172_v4 = vadd.f32 0.2548296, %v1140_v59  ;;  %v3413_v47 = vmul.f32 0.70710677, %v3400_v62  ;;  %v2396_v27 = vpop.eup %2395  ;;  %v1394_v46 = vsub.f32 1.0, %v1362_v16 }
 0x37d   :  { %v1079_v40 = vmul.f32 %v3328_v22, %v1047_v42  ;;  %v1241_v30 = vmul.f32 %v3289_v14, %v3289_v14  ;;  %v3420_v3 = vmul.f32 0.70710677, %v3405_v34  ;;  %v1395_v23 = vsub.f32 1.0, %v1363_v63  ;;  %v4002_v42 = vld [vmem:[#allocation14_spill] sm:$0xff] }
 0x37e   :  { %v1365_v31 = vmul.f32 %v2396_v27, %v1205_v44  ;;  %v3423_v21 = vmul.f32 0.5, %v3262_v37  ;;  %v3426_v20 = vand.u32 2147483647, %v3413_v47  ;;  %v1521_v7 = vadd.f32 1.0, %v1489_v32 }
 0x37f   :  { %v1142_v13 = vmul.f32 %v3303_v0, %v1110_v19  ;;  %v1017_v61 = vmul.f32 %v3380_v55, %v985_v48  ;;  %v3431_v45 = vand.u32 2147483647, %v3420_v3  ;;  %v1520_v14 = vadd.f32 1.0, %v1488_v8 }
 0x380   :  { %v1204_v51 = vmul.f32 %v3283_v58, %v1172_v4  ;;  %2403 = vpow2.f32 %v1319_v26  ;;  %v826_v15 = vmul.f32 0.3275911, %v3426_v20  ;;  %v1458_v36 = vsub.f32 0.0, %v1394_v46 }
 0x381   :  { %v1111_v37 = vadd.f32 -0.28449672, %v1079_v40  ;;  %v1273_v18 = vsub.f32 0.0, %v1241_v30  ;;  %v827_v59 = vmul.f32 0.3275911, %v3431_v45  ;;  %v1459_v38 = vsub.f32 0.0, %v1395_v23 }
 0x382   :  { %v1397_v49 = vsub.f32 1.0, %v1365_v31  ;;  %vm1429_vm13 = vcmp.ge.f32.partialorder %v3109_v6, 0.0  ;;  %v858_v16 = vadd.f32 1.0, %v826_v15  ;;  %v3439_v50 = vadd.f32 %v4002_v42, %v2782_v11  ;;  %v2398_v63 = vpop.eup %2397 }
 0x383   :  { %v3442_v58 = vmul.f32 %v1521_v7, %v3167_v2  ;;  %v1174_v44 = vadd.f32 0.2548296, %v1142_v13  ;;  %v1049_v5 = vadd.f32 1.4214138, %v1017_v61  ;;  %v859_v19 = vadd.f32 1.0, %v827_v59 }
 0x384   :  { %v3444_v26 = vpop.eup %2399  ;;  %v3447_v48 = vmul.f32 %v1520_v14, %v3184_v33  ;;  %v1364_v32 = vmul.f32 %v2398_v63, %v1204_v51  ;;  %2405 = vrcp.f32 %v858_v16  ;;  %v3450_v8 = vmul.f32 0.70710677, %v3439_v50  ;;  %v4005_v14 = vld [vmem:[#allocation16_spill] sm:$0xff] }
 0x385   :  { %4003 = vst [vmem:[#allocation11_spill] sm:$0xff] %v3442_v58  ;;  %v2402_v4 = vpop.eup %2401  ;;  %v1490_v27 = vsel %vm1426_vm11, %v1394_v46, %v1458_v36  ;;  %v1143_v2 = vmul.f32 %v3328_v22, %v1111_v37  ;;  %v1323_v40 = vmul.f32 1.442695, %v1273_v18  ;;  %2407 = vrcp.f32 %v859_v19 }
 0x386   :  { %v1491_v30 = vsel %vm1427_vm12, %v1395_v23, %v1459_v38  ;;  %v1461_v31 = vsub.f32 0.0, %v1397_v49  ;;  %v952_v33 = vmul.f32 1.0614054, %v3444_v26  ;;  %v797_v7 = vand.u32 2147483647, %v3450_v8 }
 0x387   :  { %vm1428_vm14 = vcmp.ge.f32.partialorder %v3191_v17, 0.0  ;;  %v1206_v13 = vmul.f32 %v3303_v0, %v1174_v44  ;;  %v1081_v61 = vmul.f32 %v3380_v55, %v1049_v5  ;;  %v3464_v46 = vadd.f32 %v4004_v24, %v2784_v53 }
 0x388   :  { %v3468_v51 = vadd.f32 %v4005_v14, %v2786_v12  ;;  %v1396_v1 = vsub.f32 1.0, %v1364_v32  ;;  %v3471_v23 = vmul.f32 0.5, %v3355_v39  ;;  %v1240_v15 = vmul.f32 %v3383_v9, %v3383_v9 }
 0x389   :  { %v829_v36 = vmul.f32 0.3275911, %v797_v7  ;;  %v1522_v37 = vadd.f32 1.0, %v1490_v27  ;;  %v1523_v0 = vadd.f32 1.0, %v1491_v30  ;;  %v1175_v18 = vadd.f32 0.2548296, %v1143_v2 }
 0x38a   :  { %v3476_v59 = vmul.f32 0.70710677, %v3464_v46  ;;  %v2404_v38 = vpop.eup %2403  ;;  %2409 = vpow2.f32 %v1323_v40  ;;  %v984_v16 = vadd.f32 -1.4531521, %v952_v33  ;;  %v3479_v63 = vmul.f32 0.70710677, %v3468_v51 }
 0x38b   :  { %v861_v42 = vadd.f32 1.0, %v829_v36  ;;  %v1493_v39 = vsel %vm1429_vm13, %v1397_v49, %v1461_v31  ;;  %v3483_v44 = vmul.f32 %v2402_v4, %v1206_v13  ;;  %v1113_v9 = vadd.f32 -0.28449672, %v1081_v61  ;;  %v4006_v2 = vld [vmem:[#allocation21_spill] sm:$0xff] }
 0x38c   :  { %v3486_v5 = vand.u32 2147483647, %v3476_v59  ;;  %v1460_v19 = vsub.f32 0.0, %v1396_v1  ;;  %v1272_v32 = vsub.f32 0.0, %v1240_v15  ;;  %v3489_v27 = vand.u32 2147483647, %v3479_v63 }
 0x38d   :  { %2411 = vrcp.f32 %v861_v42  ;;  %v3492_v40 = vmul.f32 %v1522_v37, %v4006_v2  ;;  %v3495_v30 = vmul.f32 %v1523_v0, %v3323_v25  ;;  %v1207_v6 = vmul.f32 %v3328_v22, %v1175_v18  ;;  %v4009_v61 = vld [vmem:[#allocation17_spill] sm:$0xff]  ;;  %v4011_v42 = vld [vmem:[#allocation31_spill] sm:$0xff] }
 0x38e   :  { %v828_v49 = vmul.f32 0.3275911, %v3486_v5  ;;  %v3499_v4 = vpop.eup %2405  ;;  %v1525_v31 = vadd.f32 1.0, %v1493_v39  ;;  %v1016_v33 = vmul.f32 %v3444_v26, %v984_v16  ;;  %v830_v13 = vmul.f32 0.3275911, %v3489_v27 }
 0x38f   :  { %4007 = vst [vmem:[#allocation12_spill] sm:$0xff] %v3492_v40  ;;  %4008 = vst [vmem:[#allocation13_spill] sm:$0xff] %v3495_v30  ;;  %v3505_v24 = vadd.f32 %v4009_v61, %v2780_v10  ;;  %v3507_v14 = vpop.eup %2407  ;;  %v1398_v25 = vsub.f32 1.0, %v3483_v44  ;;  %v1145_v15 = vmul.f32 %v3380_v55, %v1113_v9  ;;  %v954_v22 = vmul.f32 1.0614054, %v3499_v4 }
 0x390   :  { %v860_v36 = vadd.f32 1.0, %v828_v49  ;;  %v1492_v37 = vsel %vm1428_vm14, %v1396_v1, %v1460_v19  ;;  %v1321_v0 = vmul.f32 1.442695, %v1272_v32  ;;  %v955_v18 = vmul.f32 1.0614054, %v3507_v14  ;;  %v4014_v32 = vld [vmem:[#allocation18_spill] sm:$0xff] }
 0x391   :  { %4010 = vst [vmem:[#allocation14_spill] sm:$0xff] %v3505_v24  ;;  %v862_v16 = vadd.f32 1.0, %v830_v13  ;;  %vm1430_vm15 = vcmp.ge.f32.partialorder %v4011_v42, 0.0  ;;  %v3516_v39 = vmul.f32 %v2404_v38, %v1207_v6  ;;  %v986_v2 = vadd.f32 -1.4531521, %v954_v22 }
 0x392   :  { %v1245_v61 = vmul.f32 %v797_v7, %v797_v7  ;;  %2413 = vrcp.f32 %v860_v36  ;;  %v1048_v44 = vadd.f32 1.4214138, %v1016_v33  ;;  %v987_v58 = vadd.f32 -1.4531521, %v955_v18 }
 0x393   :  { %2415 = vrcp.f32 %v862_v16  ;;  %v3519_v9 = vmul.f32 0.70710677, %v3505_v24  ;;  %v3522_v17 = vmul.f32 %v1525_v31, %v3350_v60  ;;  %v1177_v1 = vadd.f32 0.2548296, %v1145_v15 }
 0x394   :  { %v3525_v19 = vmul.f32 0.5, %v3400_v62  ;;  %v3529_v38 = vadd.f32 %v4014_v32, %v2782_v11  ;;  %v2410_v6 = vpop.eup %2409  ;;  %v1524_v7 = vadd.f32 1.0, %v1492_v37  ;;  %v1018_v49 = vmul.f32 %v3499_v4, %v986_v2 }
 0x395   :  { %4012 = vst [vmem:[#allocation15_spill] sm:$0xff] %v3519_v9  ;;  %4013 = vst [vmem:[#allocation16_spill] sm:$0xff] %v3522_v17  ;;  %v1242_v33 = vmul.f32 %v3426_v20, %v3426_v20  ;;  %v3535_v13 = vand.u32 2147483647, %v3519_v9  ;;  %v1462_v60 = vsub.f32 0.0, %v1398_v25  ;;  %v1019_v31 = vmul.f32 %v3507_v14, %v987_v58 }
 0x396   :  { %4015 = vst [vmem:[#allocation21_spill] sm:$0xff] %v3529_v38  ;;  %v1277_v15 = vsub.f32 0.0, %v1245_v61  ;;  %v3539_v62 = vmul.f32 0.70710677, %v3529_v38  ;;  %v1080_v37 = vmul.f32 %v3444_v26, %v1048_v44  ;;  %2417 = vpow2.f32 %v1321_v0 }
 0x397   :  { %v3541_v22 = vpop.eup %2411  ;;  %v831_v18 = vmul.f32 0.3275911, %v3535_v13  ;;  %v1209_v20 = vmul.f32 %v3380_v55, %v1177_v1  ;;  %v1243_v16 = vmul.f32 %v3431_v45, %v3431_v45  ;;  %v1050_v61 = vadd.f32 1.4214138, %v1018_v49 }
 0x398   :  { %4016 = vst [vmem:[#allocation17_spill] sm:$0xff] %v3539_v62  ;;  %v957_v58 = vmul.f32 1.0614054, %v3541_v22  ;;  %v3551_v2 = vand.u32 2147483647, %v3539_v62  ;;  %v1274_v32 = vsub.f32 0.0, %v1242_v33  ;;  %v3557_v0 = vmul.f32 %v1524_v7, %v3374_v41 }
 0x399   :  { %v3554_v38 = vmul.f32 0.5, %v3405_v34  ;;  %v863_v36 = vadd.f32 1.0, %v831_v18  ;;  %v1051_v44 = vadd.f32 1.4214138, %v1019_v31  ;;  %v1331_v55 = vmul.f32 1.442695, %v1277_v15 }
 0x39a   :  { %4017 = vst [vmem:[#allocation31_spill] sm:$0xff] %v3557_v0  ;;  %v989_v24 = vadd.f32 -1.4531521, %v957_v58  ;;  %v3561_v45 = vsel %vm1430_vm15, %v1398_v25, %v1462_v60  ;;  %v1112_v1 = vadd.f32 -0.28449672, %v1080_v37  ;;  %v4018_v34 = vsub.f32 1.0, %v3516_v39 }
 0x39b   :  { %2419 = vrcp.f32 %v863_v36  ;;  %v833_v62 = vmul.f32 0.3275911, %v3551_v2  ;;  %v1369_v18 = vmul.f32 %v2410_v6, %v1209_v20  ;;  %v1275_v9 = vsub.f32 0.0, %v1243_v16  ;;  %v4019_v6 = vld [vmem:[#allocation32_spill] sm:$0xff]  ;;  %v4020_v58 = vld [vmem:[#allocation19_spill] sm:$0xff] }
 0x39c   :  { %v3564_v49 = vpop.eup %2413  ;;  %v1463_v33 = vsub.f32 0.0, %v4018_v34  ;;  %v1021_v41 = vmul.f32 %v3541_v22, %v989_v24  ;;  %v1082_v31 = vmul.f32 %v3499_v4, %v1050_v61  ;;  %v1325_v42 = vmul.f32 1.442695, %v1274_v32  ;;  %v4022_v34 = vld [vmem:[#allocation10_spill] sm:$0xff] }
 0x39d   :  { %v3569_v7 = vpop.eup %2415  ;;  %v956_v25 = vmul.f32 1.0614054, %v3564_v49  ;;  %v1244_v60 = vmul.f32 %v3486_v5, %v3486_v5  ;;  %v1083_v15 = vmul.f32 %v3507_v14, %v1051_v44  ;;  %2421 = vpow2.f32 %v1331_v55 }
 0x39e   :  { %v1053_v36 = vadd.f32 1.4214138, %v1021_v41  ;;  %v958_v37 = vmul.f32 1.0614054, %v3569_v7  ;;  %vm1431_vm0 = vcmp.ge.f32.partialorder %v4019_v6, 0.0  ;;  %v1144_v24 = vmul.f32 %v3444_v26, %v1112_v1 }
 0x39f   :  { %v988_v20 = vadd.f32 -1.4531521, %v956_v25  ;;  %v865_v16 = vadd.f32 1.0, %v833_v62  ;;  %v3581_v61 = vadd.f32 %v4020_v58, %v2784_v53  ;;  %v1401_v32 = vsub.f32 1.0, %v1369_v18 }
 0x3a0   :  { %vm1433_vm1 = vcmp.ge.f32.partialorder %v4022_v34, 0.0  ;;  %v1085_v5 = vmul.f32 %v3541_v22, %v1053_v36  ;;  %v990_v44 = vadd.f32 -1.4531521, %v958_v37  ;;  %v1246_v55 = vmul.f32 %v3489_v27, %v3489_v27  ;;  %v2418_v41 = vpop.eup %2417 }
 0x3a1   :  { %4021 = vst [vmem:[#allocation18_spill] sm:$0xff] %v3581_v61  ;;  %v1114_v17 = vadd.f32 -0.28449672, %v1082_v31  ;;  %2423 = vpow2.f32 %v1325_v42  ;;  %v1020_v1 = vmul.f32 %v3564_v49, %v988_v20  ;;  %v1276_v25 = vsub.f32 0.0, %v1244_v60 }
 0x3a2   :  { %v1115_v62 = vadd.f32 -0.28449672, %v1083_v15  ;;  %v1327_v30 = vmul.f32 1.442695, %v1275_v9  ;;  %v1117_v56 = vadd.f32 -0.28449672, %v1085_v5  ;;  %v1022_v58 = vmul.f32 %v3569_v7, %v990_v44 }
 0x3a3   :  { %v1176_v18 = vadd.f32 0.2548296, %v1144_v24  ;;  %v1052_v40 = vadd.f32 1.4214138, %v1020_v1  ;;  %2425 = vrcp.f32 %v865_v16  ;;  %v3590_v36 = vmul.f32 0.70710677, %v3581_v61 }
 0x3a4   :  { %v1465_v37 = vsub.f32 0.0, %v1401_v32  ;;  %v1149_v27 = vmul.f32 %v3541_v22, %v1117_v56  ;;  %v1054_v0 = vadd.f32 1.4214138, %v1022_v58  ;;  %v1278_v31 = vsub.f32 0.0, %v1246_v55 }
 0x3a5   :  { %4023 = vst [vmem:[#allocation32_spill] sm:$0xff] %v3590_v36  ;;  %v3593_v42 = vpop.eup %2419  ;;  %v1146_v60 = vmul.f32 %v3499_v4, %v1114_v17  ;;  %v1084_v9 = vmul.f32 %v3564_v49, %v1052_v40  ;;  %v1329_v15 = vmul.f32 1.442695, %v1276_v25  ;;  %v3598_v20 = vand.u32 2147483647, %v3590_v36  ;;  %v4025_v36 = vld [vmem:[#allocation22_spill] sm:$0xff] }
 0x3a6   :  { %v1147_v24 = vmul.f32 %v3507_v14, %v1115_v62  ;;  %2427 = vpow2.f32 %v1327_v30  ;;  %v1181_v16 = vadd.f32 0.2548296, %v1149_v27  ;;  %v1086_v5 = vmul.f32 %v3569_v7, %v1054_v0 }
 0x3a7   :  { %v1208_v56 = vmul.f32 %v3444_v26, %v1176_v18  ;;  %v1116_v44 = vadd.f32 -0.28449672, %v1084_v9  ;;  %v959_v55 = vmul.f32 1.0614054, %v3593_v42  ;;  %v832_v1 = vmul.f32 0.3275911, %v3598_v20  ;;  %v2422_v17 = vpop.eup %2421 }
 0x3a8   :  { %v4024_v40 = vsub.f32 1.0, %v3516_v39  ;;  %v1213_v58 = vmul.f32 %v3541_v22, %v1181_v16  ;;  %v1118_v62 = vadd.f32 -0.28449672, %v1086_v5  ;;  %v1333_v30 = vmul.f32 1.442695, %v1278_v31 }
 0x3a9   :  { %v1497_v0 = vsel %vm1433_vm1, %v1401_v32, %v1465_v37  ;;  %v1178_v27 = vadd.f32 0.2548296, %v1146_v60  ;;  %2429 = vpow2.f32 %v1329_v15  ;;  %v864_v26 = vadd.f32 1.0, %v832_v1 }
 0x3aa   :  { %v1495_v25 = vsel %vm1431_vm0, %v4024_v40, %v1463_v33  ;;  %v1179_v18 = vadd.f32 0.2548296, %v1147_v24  ;;  %v1373_v9 = vmul.f32 %v2422_v17, %v1213_v58  ;;  %v1148_v61 = vmul.f32 %v3564_v49, %v1116_v44 }
 0x3ab   :  { %v3615_v39 = vadd.f32 %v4025_v36, %v2786_v12  ;;  %v2424_v6 = vpop.eup %2423  ;;  %v1368_v33 = vmul.f32 %v2418_v41, %v1208_v56  ;;  %v1150_v22 = vmul.f32 %v3569_v7, %v1118_v62  ;;  %v991_v16 = vadd.f32 -1.4531521, %v959_v55 }
 0x3ac   :  { %2431 = vrcp.f32 %v864_v26  ;;  %v1526_v34 = vadd.f32 1.0, %v3561_v45  ;;  %v1529_v32 = vadd.f32 1.0, %v1497_v0  ;;  %v1405_v37 = vsub.f32 1.0, %v1373_v9 }
 0x3ad   :  { %2433 = vpow2.f32 %v1333_v30  ;;  %v3619_v31 = vpop.eup %2425  ;;  %v1527_v60 = vadd.f32 1.0, %v1495_v25  ;;  %v1210_v15 = vmul.f32 %v3499_v4, %v1178_v27  ;;  %v733_v24 = vmul.f32 0.5, %v3439_v50 }
 0x3ae   :  { %v1247_v36 = vmul.f32 %v3535_v13, %v3535_v13  ;;  %vm1432_vm2 = vcmp.ge.f32.partialorder %v3367_v43, 0.0  ;;  %v1211_v41 = vmul.f32 %v3507_v14, %v1179_v18  ;;  %v1469_v5 = vsub.f32 0.0, %v1405_v37 }
 0x3af   :  { %v1180_v56 = vadd.f32 0.2548296, %v1148_v61  ;;  %v3628_v45 = vmul.f32 0.70710677, %v3615_v39  ;;  %v1400_v44 = vsub.f32 1.0, %v1368_v33  ;;  %vm1437_vm3 = vcmp.ge.f32.partialorder %v3450_v8, 0.0 }
 0x3b0   :  { %v1182_v55 = vadd.f32 0.2548296, %v1150_v22  ;;  %v1023_v4 = vmul.f32 %v3593_v42, %v991_v16  ;;  %v2428_v1 = vpop.eup %2427  ;;  %v3633_v50 = vmul.f32 %v1529_v32, %v3423_v21  ;;  %v1501_v13 = vsel %vm1437_vm3, %v1405_v37, %v1469_v5  ;;  %v4026_v8 = vld [vmem:[#allocation23_spill] sm:$0xff] }
 0x3b1   :  { %v961_v17 = vmul.f32 1.0614054, %v3619_v31  ;;  %v3637_v14 = vand.u32 2147483647, %v3628_v45  ;;  %v1370_v61 = vmul.f32 %v2424_v6, %v1210_v15  ;;  %v1533_v40 = vadd.f32 1.0, %v1501_v13 }
 0x3b2   :  { %v1249_v25 = vmul.f32 %v3551_v2, %v3551_v2  ;;  %v3643_v58 = vadd.f32 %v4026_v8, %v2780_v10  ;;  %v1371_v62 = vmul.f32 %v2428_v1, %v1211_v41  ;;  %v1212_v30 = vmul.f32 %v3564_v49, %v1180_v56 }
 0x3b3   :  { %v1279_v21 = vsub.f32 0.0, %v1247_v36  ;;  %v834_v0 = vmul.f32 0.3275911, %v3637_v14  ;;  %v2430_v27 = vpop.eup %2429  ;;  %v1464_v26 = vsub.f32 0.0, %v1400_v44  ;;  %v3647_v18 = vmul.f32 %v1533_v40, %v733_v24 }
 0x3b4   :  { %v1214_v9 = vmul.f32 %v3569_v7, %v1182_v55  ;;  %v1055_v6 = vadd.f32 1.4214138, %v1023_v4  ;;  %v3651_v33 = vmul.f32 %v1526_v34, %v3387_v54  ;;  %vm1434_vm4 = vcmp.ge.f32.partialorder %v3413_v47, 0.0 }
 0x3b5   :  { %v993_v10 = vadd.f32 -1.4531521, %v961_v17  ;;  %v866_v2 = vadd.f32 1.0, %v834_v0  ;;  %v1402_v49 = vsub.f32 1.0, %v1370_v61  ;;  %vm1435_vm5 = vcmp.ge.f32.partialorder %v3420_v3, 0.0 }
 0x3b6   :  { %v3654_v22 = vpop.eup %2431  ;;  %v1649_v16 = vpack.c.bf16 %v3647_v18, %v3633_v50  ;;  %v1281_v32 = vsub.f32 0.0, %v1249_v25  ;;  %v3660_v37 = vmul.f32 0.70710677, %v3643_v58  ;;  %v3663_v54 = vmul.f32 %v1527_v60, %v3392_v29  ;;  %v4027_v25 = vld [vmem:[#allocation24_spill] sm:$0xff]  ;;  %v3883_v50 = vld [vmem:[%s3934_s9] ss:$0 sm:$0xff] }
 0x3b7   :  { %v2434_v7 = vpop.eup %2433  ;;  %v1403_v34 = vsub.f32 1.0, %v1371_v62  ;;  %v1372_v15 = vmul.f32 %v2430_v27, %v1212_v30  ;;  %v1335_v24 = vmul.f32 1.442695, %v1279_v21  ;;  %v1496_v36 = vsel %vm1432_vm2, %v1400_v44, %v1464_v26  ;;  %v4048_v18 = vld [vmem:[#allocation3_spill] sm:$0xff] }
 0x3b8   :  { %v1374_v41 = vmul.f32 %v2434_v7, %v1214_v9  ;;  %v1087_v5 = vmul.f32 %v3593_v42, %v1055_v6  ;;  %2435 = vrcp.f32 %v866_v2  ;;  %v3669_v56 = vmul.f32 0.5, %v3464_v46 }
 0x3b9   :  { %v1025_v55 = vmul.f32 %v3619_v31, %v993_v10  ;;  %v960_v4 = vmul.f32 1.0614054, %v3654_v22  ;;  %v803_v29 = vand.u32 2147483647, %v3660_v37  ;;  %v1466_v60 = vsub.f32 0.0, %v1402_v49 }
 0x3ba   :  { %vm1436_vm6 = vcmp.ge.f32.partialorder %v3476_v59, 0.0  ;;  %v3676_v1 = vmul.f32 0.5, %v3468_v51  ;;  %v1339_v43 = vmul.f32 1.442695, %v1281_v32  ;;  %v1528_v44 = vadd.f32 1.0, %v1496_v36  ;;  %v4028_v51 = vld [vmem:[#allocation25_spill] sm:$0xff] }
 0x3bb   :  { %v1467_v13 = vsub.f32 0.0, %v1403_v34  ;;  %v1404_v17 = vsub.f32 1.0, %v1372_v15  ;;  %vm1438_vm7 = vcmp.ge.f32.partialorder %v3479_v63, 0.0  ;;  %v835_v46 = vmul.f32 0.3275911, %v803_v29 }
 0x3bc   :  { %v1406_v61 = vsub.f32 1.0, %v1374_v41  ;;  %v1119_v40 = vadd.f32 -0.28449672, %v1087_v5  ;;  %2437 = vpow2.f32 %v1335_v24  ;;  %v3681_v8 = vadd.f32 %v4027_v25, %v2782_v11 }
 0x3bd   :  { %v1057_v62 = vadd.f32 1.4214138, %v1025_v55  ;;  %v992_v30 = vadd.f32 -1.4531521, %v960_v4  ;;  %v867_v21 = vadd.f32 1.0, %v835_v46  ;;  %v3685_v0 = vadd.f32 %v4028_v51, %v2784_v53 }
 0x3be   :  { %v1498_v27 = vsel %vm1434_vm4, %v1402_v49, %v1466_v60  ;;  %2439 = vpow2.f32 %v1339_v43  ;;  %v1248_v26 = vmul.f32 %v3598_v20, %v3598_v20  ;;  %v3692_v9 = vmul.f32 0.70710677, %v3681_v8  ;;  %v4029_v49 = vld [vmem:[#allocation28_spill] sm:$0xff] }
 0x3bf   :  { %v3695_v11 = vmul.f32 %v1528_v44, %v3471_v23  ;;  %v1499_v6 = vsel %vm1435_vm5, %v1403_v34, %v1467_v13  ;;  %v1468_v10 = vsub.f32 0.0, %v1404_v17  ;;  %2441 = vrcp.f32 %v867_v21 }
 0x3c0   :  { %v1470_v53 = vsub.f32 0.0, %v1406_v61  ;;  %v1151_v2 = vmul.f32 %v3593_v42, %v1119_v40  ;;  %v805_v47 = vand.u32 2147483647, %v3692_v9  ;;  %v3703_v32 = vadd.f32 %v4029_v49, %v2786_v12 }
 0x3c1   :  { %v1530_v20 = vadd.f32 1.0, %v1498_v27  ;;  %v1089_v7 = vmul.f32 %v3619_v31, %v1057_v62  ;;  %v1024_v23 = vmul.f32 %v3654_v22, %v992_v30  ;;  %v3708_v15 = vmul.f32 0.70710677, %v3685_v0 }
 0x3c2   :  { %v3710_v3 = vpop.eup %2435  ;;  %v1531_v34 = vadd.f32 1.0, %v1499_v6  ;;  %v1280_v24 = vsub.f32 0.0, %v1248_v26  ;;  %v3714_v36 = vmul.f32 %v3637_v14, %v3637_v14  ;;  %v837_v41 = vmul.f32 0.3275911, %v805_v47 }
 0x3c3   :  { %v1500_v12 = vsel %vm1436_vm6, %v1404_v17, %v1468_v10  ;;  %v962_v5 = vmul.f32 1.0614054, %v3710_v3  ;;  %v1251_v55 = vmul.f32 %v803_v29, %v803_v29  ;;  %v804_v4 = vand.u32 2147483647, %v3708_v15 }
 0x3c4   :  { %v1502_v60 = vsel %vm1438_vm7, %v1406_v61, %v1470_v53  ;;  %v1183_v43 = vadd.f32 0.2548296, %v1151_v2  ;;  %v869_v44 = vadd.f32 1.0, %v837_v41  ;;  %v3723_v13 = vmul.f32 0.70710677, %v3703_v32 }
 0x3c5   :  { %v3726_v14 = vmul.f32 %v1530_v20, %v3525_v19  ;;  %v1121_v46 = vadd.f32 -0.28449672, %v1089_v7  ;;  %v1056_v40 = vadd.f32 1.4214138, %v1024_v23  ;;  %v994_v59 = vadd.f32 -1.4531521, %v962_v5 }
 0x3c6   :  { %v2438_v17 = vpop.eup %2437  ;;  %v1532_v25 = vadd.f32 1.0, %v1500_v12  ;;  %2443 = vrcp.f32 %v869_v44  ;;  %v836_v29 = vmul.f32 0.3275911, %v804_v4  ;;  %v806_v62 = vand.u32 2147483647, %v3723_v13 }
 0x3c7   :  { %v3730_v63 = vmul.f32 %v1531_v34, %v3554_v38  ;;  %v1534_v61 = vadd.f32 1.0, %v1502_v60  ;;  %v1026_v30 = vmul.f32 %v3710_v3, %v994_v59  ;;  %v1283_v21 = vsub.f32 0.0, %v1251_v55  ;;  %v4030_v60 = vld [vmem:[#allocation31_spill] sm:$0xff]  ;;  %v4035_v59 = vld [vmem:[#allocation20_spill] sm:$0xff] }
 0x3c8   :  { %v3733_v51 = vpop.eup %2439  ;;  %v1337_v19 = vmul.f32 1.442695, %v1280_v24  ;;  %v1282_v27 = vsub.f32 0.0, %v3714_v36  ;;  %v868_v26 = vadd.f32 1.0, %v836_v29  ;;  %v838_v6 = vmul.f32 0.3275911, %v806_v62 }
 0x3c9   :  { %v3736_v10 = vpop.eup %2441  ;;  %v1215_v53 = vmul.f32 %v3593_v42, %v1183_v43  ;;  %v1153_v2 = vmul.f32 %v3619_v31, %v1121_v46  ;;  %v1088_v38 = vmul.f32 %v3654_v22, %v1056_v40  ;;  %v1058_v49 = vadd.f32 1.4214138, %v1026_v30  ;;  %v4039_v30 = vld [vmem:[#allocation30_spill] sm:$0xff] }
 0x3ca   :  { %v3742_v20 = vmul.f32 %v1532_v25, %v3669_v56  ;;  %v963_v7 = vmul.f32 1.0614054, %v3736_v10  ;;  %2445 = vrcp.f32 %v868_v26  ;;  %v870_v23 = vadd.f32 1.0, %v838_v6  ;;  %v4036_v25 = vld [vmem:[#allocation13_spill] sm:$0xff] }
 0x3cb   :  { %v3746_v34 = vmul.f32 %v1534_v61, %v3676_v1  ;;  %v1343_v24 = vmul.f32 1.442695, %v1283_v21  ;;  %v1253_v36 = vmul.f32 %v805_v47, %v805_v47  ;;  %v1640_v42 = vpack.c.bf16 %v3337_v28, %v3320_v35  ;;  %v4031_v1 = vld [vmem:[#allocation12_spill] sm:$0xff]  ;;  %v4032_v35 = vld [vmem:[#allocation27_spill] sm:$0xff]  ;;  %v4033_v28 = vld [vmem:[#allocation26_spill] sm:$0xff] }
 0x3cc   :  { %v1090_v41 = vmul.f32 %v3710_v3, %v1058_v49  ;;  %v995_v12 = vadd.f32 -1.4531521, %v963_v7  ;;  %2447 = vrcp.f32 %v870_v23  ;;  %v1642_v56 = vpack.c.bf16 %v3364_v57, %v3332_v52  ;;  %v4037_v57 = vld [vmem:[#allocation11_spill] sm:$0xff]  ;;  %v4040_v21 = vld [vmem:[#allocation29_spill] sm:$0xff] }
 0x3cd   :  { %v1120_v5 = vadd.f32 -0.28449672, %v1088_v38  ;;  %v1252_v55 = vmul.f32 %v804_v4, %v804_v4  ;;  %1879 = vmatprep.mubr.bf16.mxu1 %v1640_v42  ;;  %v1644_v43 = vpack.c.bf16 %v4030_v60, %v3447_v48  ;;  %v1646_v44 = vpack.c.bf16 %v3651_v33, %v4031_v1  ;;  %v4038_v4 = vld [vmem:[#allocation16_spill] sm:$0xff]  ;;  %v2461_v33 = vld [vmem:[%s3933_s8 + $0x80] sm:$0xff]  }
 0x3ce   :  { %v1185_v47 = vadd.f32 0.2548296, %v1153_v2  ;;  %v1027_v46 = vmul.f32 %v3736_v10, %v995_v12  ;;  %1944 = vmatprep.mubr.bf16.mxu0 %v1642_v56  ;;  %v4034_v40 = vpack.c.bf16 %v4032_v35, %v4033_v28  ;;  %v1643_v52 = vpack.c.bf16 %v4036_v25, %v4035_v59 }
 0x3cf   :  { %v1645_v29 = vpack.c.bf16 %v4038_v4, %v4037_v57  ;;  %v3765_v61 = vmul.f32 %v2438_v17, %v1215_v53  ;;  %v1285_v48 = vsub.f32 0.0, %v1253_v36  ;;  %v4041_v26 = vpack.c.bf16 %v4039_v30, %v4040_v21  ;;  %v2462_v17 = vld [vmem:[%s3933_s8 + $0xc8] sm:$0xff]   ;;  %v2465_v57 = vld [vmem:[%s3933_s8 + $0x90] sm:$0xff]  }
 0x3d0   :  { %1880 = vmatmul.mubr.bf16.vlgmr.msra.gmra.mrb[16].mxu1 %v4034_v40  ;;  %v1648_v6 = vpack.c.bf16 %v3742_v20, %v3695_v11  ;;  %v3775_v2 = vpop.eup %2443  ;;  %v1122_v38 = vadd.f32 -0.28449672, %v1090_v41  ;;  %v1059_v49 = vadd.f32 1.4214138, %v1027_v46  ;;  %v1647_v53 = vpack.c.bf16 %v3730_v63, %v3663_v54  ;;  %v4042_v21 = vld [vmem:[#allocation15_spill] sm:$0xff] }
 0x3d1   :  { %2216 = vmatpush3.bf16.msra.mxu1 %v2461_v33  ;;  %1945 = vmatmul.mubr.bf16.vlgmr.msra.gmra.mrb[24].mxu0 %v4041_v26  ;;  %v1650_v7 = vpack.c.bf16 %v3746_v34, %v3726_v14  ;;  %v1152_v23 = vmul.f32 %v3654_v22, %v1120_v5  ;;  %v1341_v36 = vmul.f32 1.442695, %v1282_v27  ;;  %2449 = vpow2.f32 %v1343_v24  ;;  %v2470_v54 = vld [vmem:[%s3933_s8 + $0xe8] sm:$0xff]  }
 0x3d2   :  { %2209 = vmatprep.subr.bf16.mxu1 %v2462_v17  ;;  %1887 = vmatprep.mubr.bf16.mxu1 %v1644_v43  ;;  %v965_v11 = vmul.f32 1.0614054, %v3775_v2  ;;  %v1217_v20 = vmul.f32 %v3619_v31, %v1185_v47  ;;  %2451 = vpow2.f32 %v1337_v19  ;;  %v1091_v42 = vmul.f32 %v3736_v10, %v1059_v49  ;;  %v2463_v43 = vld [vmem:[%s3933_s8 + $0x88] sm:$0xff]   ;;  %v2464_v31 = vld [vmem:[%s3933_s8 + $0xd0] sm:$0xff]  }
 0x3d3   :  { %1952 = vmatprep.mubr.bf16.mxu0 %v1646_v44  ;;  %v1284_v41 = vsub.f32 0.0, %v1252_v55  ;;  %v1407_v12 = vsub.f32 1.0, %v3765_v61  ;;  %v1254_v60 = vmul.f32 %v806_v62, %v806_v62  ;;  %v1154_v24 = vmul.f32 %v3710_v3, %v1122_v38 }
 0x3d4   :  { %v997_v56 = vadd.f32 -1.4531521, %v965_v11  ;;  %v3792_v27 = vpop.eup %2445  ;;  %v1123_v5 = vadd.f32 -0.28449672, %v1091_v42  ;;  %v1347_v1 = vmul.f32 1.442695, %v1285_v48  ;;  %2453 = vpow2.f32 %v1341_v36 }
 0x3d5   :  { %2217 = vmatpush3.bf16.msra.mxu1 %v2463_v43  ;;  %v1184_v19 = vadd.f32 0.2548296, %v1152_v23  ;;  %v964_v55 = vmul.f32 1.0614054, %v3792_v27  ;;  %v3803_v47 = vmul.f32 %v3733_v51, %v1217_v20  ;;  %v1345_v35 = vmul.f32 1.442695, %v1284_v41 }
 0x3d6   :  { %2210 = vmatprep.subr.bf16.mxu1 %v2464_v31  ;;  %v1029_v62 = vmul.f32 %v3775_v2, %v997_v56  ;;  %v3800_v44 = vpop.eup %2447  ;;  %v1155_v46 = vmul.f32 %v3736_v10, %v1123_v5  ;;  %v1471_v28 = vsub.f32 0.0, %v1407_v12  ;;  %v1286_v25 = vsub.f32 0.0, %v1254_v60  ;;  %v2466_v48 = vld [vmem:[%s3933_s8 + $0xd8] sm:$0xff]  }
 0x3d7   :  { %v996_v59 = vadd.f32 -1.4531521, %v964_v55  ;;  %v1186_v4 = vadd.f32 0.2548296, %v1154_v24  ;;  %2455 = vpow2.f32 %v1347_v1  ;;  %v966_v51 = vmul.f32 1.0614054, %v3800_v44 }
 0x3d8   :  { %1888 = vmatmul.mubr.bf16.gmra.mrb[20].mxu1 %v1643_v52  ;;  %v1061_v40 = vadd.f32 1.4214138, %v1029_v62  ;;  %v1187_v61 = vadd.f32 0.2548296, %v1155_v46  ;;  %v1216_v52 = vmul.f32 %v3654_v22, %v1184_v19  ;;  %vm1439_vm8 = vcmp.ge.f32.partialorder %v4042_v21, 0.0  ;;  %v2467_v22 = vld [vmem:[%s3933_s8 + $0x98] sm:$0xff]  }
 0x3d9   :  { %2218 = vmatpush3.bf16.msra.mxu1 %v2465_v57  ;;  %1953 = vmatmul.mubr.bf16.gmra.mrb[28].mxu0 %v1645_v29  ;;  %v1028_v30 = vmul.f32 %v3792_v27, %v996_v59  ;;  %v1409_v29 = vsub.f32 1.0, %v3803_v47  ;;  %v998_v38 = vadd.f32 -1.4531521, %v966_v51  ;;  %v1503_v17 = vsel %vm1439_vm8, %v1407_v12, %v1471_v28  ;;  %v2469_v19 = vld [vmem:[%s3933_s8 + $0xa0] sm:$0xff]  }
 0x3da   :  { %2211 = vmatprep.subr.bf16.mxu1 %v2466_v48  ;;  %1895 = vmatprep.mubr.bf16.mxu1 %v1648_v6  ;;  %v1093_v33 = vmul.f32 %v3775_v2, %v1061_v40  ;;  %v1219_v26 = vmul.f32 %v3736_v10, %v1187_v61  ;;  %v1349_v11 = vmul.f32 1.442695, %v1286_v25  ;;  %v1218_v20 = vmul.f32 %v3710_v3, %v1186_v4  ;;  %v2468_v10 = vld [vmem:[%s3933_s8 + $0xe0] sm:$0xff]   ;;  %v4044_v25 = vld [vmem:[#allocation17_spill] sm:$0xff] }
 0x3db   :  { %v2450_v49 = vpop.eup %2449  ;;  %v1060_v36 = vadd.f32 1.4214138, %v1028_v30  ;;  %2457 = vpow2.f32 %v1345_v35  ;;  %v1030_v41 = vmul.f32 %v3800_v44, %v998_v38  ;;  %v1535_v5 = vadd.f32 1.0, %v1503_v17  ;;  %v4043_v40 = vld [vmem:[#allocation14_spill] sm:$0xff] }
 0x3dc   :  { %v1125_v23 = vadd.f32 -0.28449672, %v1093_v33  ;;  %v2452_v6 = vpop.eup %2451  ;;  %v1379_v42 = vmul.f32 %v2450_v49, %v1219_v26  ;;  %2459 = vpow2.f32 %v1349_v11  ;;  %v1473_v62 = vsub.f32 0.0, %v1409_v29  ;;  %v2472_v26 = vld [vmem:[%s3933_s8 + $0xf0] sm:$0xff]  }
 0x3dd   :  { %2219 = vmatpush3.bf16.msra.mxu1 %v2467_v22  ;;  %v1376_v12 = vmul.f32 %v2452_v6, %v1216_v52  ;;  %v1092_v60 = vmul.f32 %v3792_v27, %v1060_v36  ;;  %v1062_v24 = vadd.f32 1.4214138, %v1030_v41  ;;  %vm1443_vm9 = vcmp.ge.f32.partialorder %v3660_v37, 0.0  ;;  %v2471_v37 = vld [vmem:[%s3933_s8 + $0xa8] sm:$0xff]  }
 0x3de   :  { %2212 = vmatprep.subr.bf16.mxu1 %v2468_v10  ;;  %v1157_v56 = vmul.f32 %v3775_v2, %v1125_v23  ;;  %v1411_v43 = vsub.f32 1.0, %v1379_v42  ;;  %v2454_v3 = vpop.eup %2453  ;;  %v735_v59 = vmul.f32 0.5, %v4043_v40  ;;  %vm1441_vm10 = vcmp.ge.f32.partialorder %v4044_v25, 0.0  ;;  %v4045_v42 = vld [vmem:[#allocation32_spill] sm:$0xff] }
 0x3df   :  { %v1124_v31 = vadd.f32 -0.28449672, %v1092_v60  ;;  %v1378_v55 = vmul.f32 %v2454_v3, %v1218_v20  ;;  %v1094_v46 = vmul.f32 %v3800_v44, %v1062_v24  ;;  %v1408_v63 = vsub.f32 1.0, %v1376_v12 }
 0x3e0   :  { %1896 = vmatmul.mubr.bf16.gmra.mrb[24].mxu1 %v1647_v53  ;;  %v1189_v1 = vadd.f32 0.2548296, %v1157_v56  ;;  %v1475_v47 = vsub.f32 0.0, %v1411_v43  ;;  %v739_v61 = vmul.f32 0.5, %v3643_v58  ;;  %v1505_v33 = vsel %vm1441_vm10, %v1409_v29, %v1473_v62  ;;  %v2473_v29 = vld [vmem:[%s3933_s8 + $0xb0] sm:$0xff]   ;;  %v4046_v56 = vld [vmem:[#allocation21_spill] sm:$0xff] }
 0x3e1   :  { %2220 = vmatpush3.bf16.msra.mxu1 %v2469_v19  ;;  %v1156_v35 = vmul.f32 %v3792_v27, %v1124_v31  ;;  %v2456_v28 = vpop.eup %2455  ;;  %v1126_v4 = vadd.f32 -0.28449672, %v1094_v46  ;;  %v1410_v30 = vsub.f32 1.0, %v1378_v55  ;;  %v1472_v38 = vsub.f32 0.0, %v1408_v63 }
 0x3e2   :  { %2213 = vmatprep.subr.bf16.mxu1 %v2470_v54  ;;  %v1221_v53 = vmul.f32 %v3775_v2, %v1189_v1  ;;  %v1507_v57 = vsel %vm1443_vm9, %v1411_v43, %v1475_v47  ;;  %v1567_v2 = vmul.f32 %v1535_v5, %v735_v59  ;;  %v1537_v11 = vadd.f32 1.0, %v1505_v33  ;;  %v4047_v54 = vld [vmem:[#allocation18_spill] sm:$0xff] }
 0x3e3   :  { %v1539_v51 = vadd.f32 1.0, %v1507_v57  ;;  %v1188_v52 = vadd.f32 0.2548296, %v1156_v35  ;;  %v1158_v21 = vmul.f32 %v3800_v44, %v1126_v4  ;;  %vm1440_vm11 = vcmp.ge.f32.partialorder %v4045_v42, 0.0 }
 0x3e4   :  { %v1381_v48 = vmul.f32 %v2456_v28, %v1221_v53  ;;  %v1474_v41 = vsub.f32 0.0, %v1410_v30  ;;  %vm1445_vm12 = vcmp.ge.f32.partialorder %v3692_v9, 0.0  ;;  %v737_v60 = vmul.f32 0.5, %v4046_v56 }
 0x3e5   :  { %2221 = vmatpush3.bf16.msra.mxu1 %v2471_v37  ;;  %v1571_v58 = vmul.f32 %v1539_v51, %v739_v61  ;;  %v1220_v17 = vmul.f32 %v3792_v27, %v1188_v52  ;;  %v2458_v23 = vpop.eup %2457  ;;  %v1190_v36 = vadd.f32 0.2548296, %v1158_v21  ;;  %v2474_v27 = vld [vmem:[%s3933_s8 + $0xf8] sm:$0xff]   ;;  %v1504_v43 = vsel %vm1440_vm11, %v1408_v63, %v1472_v38 }
 0x3e6   :  { %2214 = vmatprep.subr.bf16.mxu1 %v2472_v26  ;;  %v1413_v49 = vsub.f32 1.0, %v1381_v48  ;;  %v2460_v12 = vpop.eup %2459  ;;  %v741_v5 = vmul.f32 0.5, %v3681_v8  ;;  %v1569_v19 = vmul.f32 %v1537_v11, %v737_v60  ;;  %vm1442_vm13 = vcmp.ge.f32.partialorder %v3628_v45, 0.0 }
 0x3e7   :  { %v1380_v6 = vmul.f32 %v2458_v23, %v1220_v17  ;;  %v1651_v20 = vpack.c.bf16 %v1571_v58, %v1567_v2  ;;  %v1222_v10 = vmul.f32 %v3800_v44, %v1190_v36  ;;  %vm1444_vm14 = vcmp.ge.f32.partialorder %v3708_v15, 0.0  ;;  %v2475_v44 = vld [vmem:[%s3933_s8 + $0xb8] sm:$0xff]  }
 0x3e8   :  { %v1477_v22 = vsub.f32 0.0, %v1413_v49  ;;  %v1536_v62 = vadd.f32 1.0, %v1504_v43  ;;  %v1506_v55 = vsel %vm1442_vm13, %v1410_v30, %v1474_v41  ;;  %v736_v63 = vmul.f32 0.5, %v4047_v54  ;;  %v4049_v23 = vld [vmem:[#allocation5_spill] sm:$0xff] }
 0x3e9   :  { %2222 = vmatpush3.bf16.msra.mxu1 %v2473_v29  ;;  %v1412_v3 = vsub.f32 1.0, %v1380_v6  ;;  %v1382_v31 = vmul.f32 %v2460_v12, %v1222_v10  ;;  %v740_v53 = vmul.f32 0.5, %v3685_v0  ;;  %v1538_v40 = vadd.f32 1.0, %v1506_v55 }
 0x3ea   :  { %2215 = vmatprep.subr.bf16.mxu1 %v2474_v27  ;;  %v1509_v24 = vsel %vm1445_vm12, %v1413_v49, %v1477_v22  ;;  %vm1446_vm15 = vcmp.ge.f32.partialorder %v3723_v13, 0.0  ;;  %v1568_v15 = vmul.f32 %v1536_v62, %v736_v63  ;;  %v738_v57 = vmul.f32 0.5, %v3615_v39 }
 0x3eb   :  { %v1541_v1 = vadd.f32 1.0, %v1509_v24  ;;  %v1476_v9 = vsub.f32 0.0, %v1412_v3  ;;  %v1414_v46 = vsub.f32 1.0, %v1382_v31  ;;  %v742_v4 = vmul.f32 0.5, %v3703_v32  ;;  %v4050_v24 = vld [vmem:[#allocation2_spill] sm:$0xff] }
 0x3ec   :  { %v1570_v48 = vmul.f32 %v1538_v40, %v738_v57 }
 0x3ed   :  { %2223 = vmatpush3.bf16.msra.mxu1 %v2475_v44  ;;  %v1573_v47 = vmul.f32 %v1541_v1, %v741_v5  ;;  %v1508_v8 = vsel %vm1444_vm14, %v1412_v3, %v1476_v9  ;;  %v1478_v28 = vsub.f32 0.0, %v1414_v46 }
 0x3ee   :  { %v1540_v35 = vadd.f32 1.0, %v1508_v8 }
 0x3ef   :  { %v1653_v45 = vpack.c.bf16 %v1573_v47, %v1569_v19  ;;  %v1510_v25 = vsel %vm1446_vm15, %v1414_v46, %v1478_v28  ;;  %v4051_v19 = vld [vmem:[#allocation4_spill] sm:$0xff] }
 0x3f0   :  { %v1572_v59 = vmul.f32 %v1540_v35, %v740_v53  ;;  %v1542_v61 = vadd.f32 1.0, %v1510_v25 }
 0x3f2   :  { %v1652_v51 = vpack.c.bf16 %v1572_v59, %v1568_v15  ;;  %v1574_v52 = vmul.f32 %v1542_v61, %v742_v4 }
 0x3f4   :  { %1903 = vmatprep.mubr.bf16.mxu1 %v1652_v51  ;;  %v1654_v0 = vpack.c.bf16 %v1574_v52, %v1570_v48  ;;  %v4052_v51 = vld [vmem:[#allocation6_spill] sm:$0xff] }
 0x3f5   :  { %1904 = vmatmul.mubr.bf16.gmra.mrb[28].mxu1 %v1651_v20 }
 0x3f6   :  { %1960 = vmatprep.mubr.bf16.mxu1 %v1650_v7 }
 0x3fd   :  { %1961 = vmatmul.mubr.bf16.vlgmr.msra.gmra.mrb[32].mxu1 %v1649_v16 }
 0x3fe   :  { %1968 = vmatprep.mubr.bf16.mxu1 %v1654_v0 }
 0x405   :  { %1969 = vmatmul.mubr.bf16.gmra.mrb[36].mxu1 %v1653_v45 }
 0x4a3   :  { %v2120_v39 = vpop.f32.mrb[16].mxu1 }
 0x4a4   :  { %v2160_v13 = vpop.f32.mrb[24].mxu0  ;;  %v2121_v32 = vpop.f32.mrb[17].mxu1 }
 0x4a5   :  { %v2122_v37 = vadd.f32 %v2121_v32, %v2120_v39  ;;  %v2161_v2 = vpop.f32.mrb[25].mxu0  ;;  %v2123_v33 = vpop.f32.mrb[18].mxu1  ;;  %v4053_v39 = vld [vmem:[#allocation8_spill] sm:$0xff] }
 0x4a6   :  { %v2162_v30 = vadd.f32 %v2161_v2, %v2160_v13  ;;  %v2163_v21 = vpop.f32.mrb[26].mxu0  ;;  %v2124_v26 = vpop.f32.mrb[19].mxu1 }
 0x4a7   :  { %v2125_v38 = vadd.f32 %v2124_v26, %v2123_v33  ;;  %v2164_v58 = vpop.f32.mrb[27].mxu0 }
 0x4a8   :  { %v1947_v49 = vadd.f32 %v2162_v30, %v2122_v37  ;;  %v2165_v14 = vadd.f32 %v2164_v58, %v2163_v21  ;;  %v4054_v58 = vld [vmem:[#allocation7_spill] sm:$0xff] }
 0x4aa   :  { %v1977_v16 = vadd.f32 %v1947_v49, %v4048_v18  ;;  %v1950_v34 = vadd.f32 %v2165_v14, %v2125_v38 }
 0x4ab   :  { %v2126_v7 = vpop.f32.mrb[20].mxu1 }
 0x4ac   :  { %v1992_v17 = vadd.f32 %v3883_v50, %v1977_v16  ;;  %v1978_v36 = vadd.f32 %v1950_v34, %v4049_v23  ;;  %v2166_v11 = vpop.f32.mrb[28].mxu0  ;;  %v2127_v22 = vpop.f32.mrb[21].mxu1  ;;  %v4055_v16 = vld [vmem:[#allocation9_spill] sm:$0xff] }
 0x4ad   :  { %v2128_v6 = vadd.f32 %v2127_v22, %v2126_v7  ;;  %v2167_v20 = vpop.f32.mrb[29].mxu0  ;;  %v2129_v29 = vpop.f32.mrb[22].mxu1 }
 0x4ae   :  { %2000 = vst [vmem:[%s3935_s10] sm:$0xff] %v1992_v17  ;;  %v1993_v42 = vadd.f32 %v3883_v50, %v1978_v36  ;;  %v2168_v41 = vadd.f32 %v2167_v20, %v2166_v11  ;;  %v2169_v10 = vpop.f32.mrb[30].mxu0  ;;  %v2130_v27 = vpop.f32.mrb[23].mxu1 }
 0x4af   :  { %v2131_v12 = vadd.f32 %v2130_v27, %v2129_v29  ;;  %v2170_v56 = vpop.f32.mrb[31].mxu0 }
 0x4b0   :  { %2001 = vst [vmem:[%s3935_s10 + $0x8] sm:$0xff] %v1993_v42  ;;  %v1955_v60 = vadd.f32 %v2168_v41, %v2128_v6  ;;  %v2171_v43 = vadd.f32 %v2170_v56, %v2169_v10 }
 0x4b2   :  { %v1979_v3 = vadd.f32 %v1955_v60, %v4050_v24  ;;  %v1958_v5 = vadd.f32 %v2171_v43, %v2131_v12 }
 0x4b3   :  { %v2132_v1 = vpop.f32.mrb[24].mxu1 }
 0x4b4   :  { %v1994_v31 = vadd.f32 %v3883_v50, %v1979_v3  ;;  %v1980_v9 = vadd.f32 %v1958_v5, %v4051_v19  ;;  %v2133_v44 = vpop.f32.mrb[25].mxu1 }
 0x4b5   :  { %v2134_v62 = vadd.f32 %v2133_v44, %v2132_v1  ;;  %v2135_v55 = vpop.f32.mrb[26].mxu1 }
 0x4b6   :  { %2002 = vst [vmem:[%s3935_s10 + $0x10] sm:$0xff] %v1994_v31  ;;  %v1995_v47 = vadd.f32 %v3883_v50, %v1980_v9  ;;  %v2136_v46 = vpop.f32.mrb[27].mxu1 }
 0x4b7   :  { %v2137_v54 = vadd.f32 %v2136_v46, %v2135_v55 }
 0x4b8   :  { %2003 = vst [vmem:[%s3935_s10 + $0x18] sm:$0xff] %v1995_v47 }
 0x4c8   :  { %v2138_v63 = vpop.f32.mrb[28].mxu1 }
 0x4c9   :  { %v2139_v8 = vpop.f32.mrb[29].mxu1 }
 0x4ca   :  { %v2140_v53 = vadd.f32 %v2139_v8, %v2138_v63  ;;  %v2141_v35 = vpop.f32.mrb[30].mxu1 }
 0x4cb   :  { %v2142_v28 = vpop.f32.mrb[31].mxu1 }
 0x4cc   :  { %v2143_v45 = vadd.f32 %v2142_v28, %v2141_v35 }
 0x4d0   :  { %v2172_v40 = vpop.f32.mrb[32].mxu1 }
 0x4d1   :  { %v2173_v15 = vpop.f32.mrb[33].mxu1 }
 0x4d2   :  { %v2174_v59 = vadd.f32 %v2173_v15, %v2172_v40  ;;  %v2175_v25 = vpop.f32.mrb[34].mxu1 }
 0x4d3   :  { %v2176_v57 = vpop.f32.mrb[35].mxu1 }
 0x4d4   :  { %v1963_v4 = vadd.f32 %v2174_v59, %v2134_v62  ;;  %v2177_v61 = vadd.f32 %v2176_v57, %v2175_v25 }
 0x4d6   :  { %v1981_v48 = vadd.f32 %v1963_v4, %v4052_v51  ;;  %v1966_v52 = vadd.f32 %v2177_v61, %v2137_v54 }
 0x4d8   :  { %v1996_v0 = vadd.f32 %v3883_v50, %v1981_v48  ;;  %v1982_v13 = vadd.f32 %v1966_v52, %v4053_v39  ;;  %v2178_v32 = vpop.f32.mrb[36].mxu1 }
 0x4d9   :  { %v2179_v37 = vpop.f32.mrb[37].mxu1 }
 0x4da   :  { %2004 = vst [vmem:[%s3935_s10 + $0x20] sm:$0xff] %v1996_v0  ;;  %v1997_v2 = vadd.f32 %v3883_v50, %v1982_v13  ;;  %v2180_v33 = vadd.f32 %v2179_v37, %v2178_v32  ;;  %v2181_v30 = vpop.f32.mrb[38].mxu1 }
 0x4db   :  { %v2182_v21 = vpop.f32.mrb[39].mxu1 }
 0x4dc   :  { %2005 = vst [vmem:[%s3935_s10 + $0x28] sm:$0xff] %v1997_v2  ;;  %v1971_v26 = vadd.f32 %v2180_v33, %v2140_v53  ;;  %v2183_v38 = vadd.f32 %v2182_v21, %v2181_v30 }
 0x4de   :  { %v1983_v49 = vadd.f32 %v1971_v26, %v4054_v58  ;;  %v1974_v14 = vadd.f32 %v2183_v38, %v2143_v45 }
 0x4e0   :  { %v1998_v18 = vadd.f32 %v3883_v50, %v1983_v49  ;;  %v1984_v34 = vadd.f32 %v1974_v14, %v4055_v16 }
 0x4e2   :  { %2006 = vst [vmem:[%s3935_s10 + $0x30] sm:$0xff] %v1998_v18  ;;  %v1999_v7 = vadd.f32 %v3883_v50, %v1984_v34 }
 0x4e4   :  { %2007 = vst [vmem:[%s3935_s10 + $0x38] sm:$0xff] %v1999_v7 }

// kernel: transformer_encoder3d_forward.7
= control target key start
LH: loop header
LB: loop body
LE: loop exit
PB: predicated region body
PF: predicated region fallthrough
CT: control target
= control target key end

     0   :  { %s4110_s0 = inlined_call_operand.vmem [shape: f32[64,128], index: 0, kind: input, shape index: {}]   ;;  %s4111_s1 = inlined_call_operand.vmem [shape: bf16[64,128], index: 1, kind: input, shape index: {}]   ;;  %s4112_s2 = inlined_call_operand.vmem [shape: bf16[128,128], index: 2, kind: input, shape index: {}]   ;;  %s4113_s3 = inlined_call_operand.vmem [shape: f32[1,128], index: 3, kind: input, shape index: {}]   ;;  %s4114_s4 = inlined_call_operand.vmem [shape: f32[1,128], index: 4, kind: input, shape index: {}]   ;;  %s4115_s5 = inlined_call_operand.vmem [shape: f32[1,128], index: 5, kind: input, shape index: {}]   ;;  %s4116_s6 = inlined_call_operand.vmem [shape: bf16[128,512], index: 6, kind: input, shape index: {}]   ;;  %s4117_s7 = inlined_call_operand.vmem [shape: f32[1,512], index: 7, kind: input, shape index: {}]   ;;  %s4118_s8 = inlined_call_operand.vmem [shape: bf16[512,128], index: 8, kind: input, shape index: {}]   ;;  %s4119_s9 = inlined_call_operand.vmem [shape: f32[1,128], index: 9, kind: input, shape index: {}]   ;;  %s4120_s10 = inlined_call_operand.vmem [shape: f32[1,128], index: 10, kind: input, shape index: {}]   ;;  %s4121_s11 = inlined_call_operand.vmem [shape: f32[1,128], index: 11, kind: input, shape index: {}]   ;;  %s4122_s12 = inlined_call_operand.hbm [shape: f32[64,128], index: 12, kind: output, shape index: {}]  }
   0x1   :  { %v2367_v0 = vld [vmem:[%s4112_s2] sm:$0xff]   ;;  %v2368_v1 = vld [vmem:[%s4112_s2 + $0x8] sm:$0xff]   ;;  %v2369_v2 = vld [vmem:[%s4112_s2 + $0x10] sm:$0xff]  }
   0x2   :  { %2323 = vmatprep.subr.bf16.mxu0 %v2367_v0  ;;  %v2370_v3 = vld [vmem:[%s4112_s2 + $0x18] sm:$0xff]   ;;  %v2375_v4 = vld [vmem:[%s4111_s1] sm:$0xff]   ;;  %v2372_v6 = vld [vmem:[%s4112_s2 + $0x28] sm:$0xff]  }
   0x3   :  { %2324 = vmatpush3.bf16.msra.mxu0 %v2367_v0  ;;  %2339 = vmatprep.mubr.bf16.mxu0 %v2375_v4  ;;  %v2371_v5 = vld [vmem:[%s4112_s2 + $0x20] sm:$0xff]   ;;  %v2373_v7 = vld [vmem:[%s4112_s2 + $0x30] sm:$0xff]   ;;  %v2374_v8 = vld [vmem:[%s4112_s2 + $0x38] sm:$0xff]  }
   0x4   :  { %2325 = vmatprep.subr.bf16.mxu0 %v2368_v1  ;;  %v2376_v9 = vld [vmem:[%s4111_s1 + $0x8] sm:$0xff]   ;;  %v2377_v10 = vld [vmem:[%s4111_s1 + $0x10] sm:$0xff]   ;;  %v2378_v11 = vld [vmem:[%s4111_s1 + $0x18] sm:$0xff]  }
   0x7   :  { %2326 = vmatpush3.bf16.msra.mxu0 %v2368_v1 }
   0x8   :  { %2327 = vmatprep.subr.bf16.mxu0 %v2369_v2 }
   0xb   :  { %2328 = vmatpush3.bf16.msra.mxu0 %v2369_v2 }
   0xc   :  { %2329 = vmatprep.subr.bf16.mxu0 %v2370_v3 }
   0xf   :  { %2330 = vmatpush3.bf16.msra.mxu0 %v2370_v3 }
  0x10   :  { %2331 = vmatprep.subr.bf16.mxu0 %v2371_v5 }
  0x13   :  { %2332 = vmatpush3.bf16.msra.mxu0 %v2371_v5 }
  0x14   :  { %2333 = vmatprep.subr.bf16.mxu0 %v2372_v6 }
  0x17   :  { %2334 = vmatpush3.bf16.msra.mxu0 %v2372_v6 }
  0x18   :  { %2335 = vmatprep.subr.bf16.mxu0 %v2373_v7 }
  0x1b   :  { %2336 = vmatpush3.bf16.msra.mxu0 %v2373_v7 }
  0x1c   :  { %2337 = vmatprep.subr.bf16.mxu0 %v2374_v8 }
  0x1f   :  { %2338 = vmatpush3.bf16.msra.mxu0 %v2374_v8 }
  0x22   :  { %2340 = vmatmul.mubr.bf16.vlgmr.msra.gmra.mrb[0].mxu0 %v2376_v9 }
  0x23   :  { %2343 = vmatprep.mubr.bf16.mxu0 %v2377_v10 }
  0x2a   :  { %2344 = vmatmul.mubr.bf16.gmra.mrb[4].mxu0 %v2378_v11 }
  0x2b   :  { %17 = vsyncpa [#allocation3], 0  ;;  %v45_v12 = vld [vmem:[%s4110_s0 + $0x10] sm:$0xff]  ;;  %v43_v13 = vld [vmem:[%s4110_s0] sm:$0xff] }
  0x2c   :  { %v2161_v15 = vld [vmem:[%s4113_s3] ss:$0 sm:$0xff]  ;;  %v46_v16 = vld [vmem:[%s4110_s0 + $0x18] sm:$0xff]  ;;  %v44_v19 = vld [vmem:[%s4110_s0 + $0x8] sm:$0xff] }
  0x2d   :  { %v49_v28 = vld [vmem:[%s4110_s0 + $0x30] sm:$0xff]  ;;  %v47_v29 = vld [vmem:[%s4110_s0 + $0x20] sm:$0xff]  ;;  %v50_v33 = vld [vmem:[%s4110_s0 + $0x38] sm:$0xff] }
  0x2e   :  { %v48_v34 = vld [vmem:[%s4110_s0 + $0x28] sm:$0xff]  ;;  %v2379_v45 = vld [vmem:[%s4116_s6 + $0x4] ss:$16 sps:$4 sm:$0xff]   ;;  %v2384_v48 = vld [vmem:[%s4116_s6] ss:$16 sps:$4 sm:$0xff]  }
  0x2f   :  { %v2381_v46 = vld [vmem:[%s4116_s6 + $0x8] ss:$16 sps:$4 sm:$0xff]   ;;  %v2383_v47 = vld [vmem:[%s4116_s6 + $0xc] ss:$16 sps:$4 sm:$0xff]   ;;  %v2385_v49 = vld [vmem:[%s4116_s6 + $0x24] ss:$16 sps:$4 sm:$0xff]   ;;  %572 = vmatprep.subr.bf16.mxu1 %v2379_v45 }
  0x30   :  { %645 = vmatprep.subr.bf16.mxu0 %v2383_v47  ;;  %v2389_v50 = vld [vmem:[%s4116_s6 + $0x2c] ss:$16 sps:$4 sm:$0xff]   ;;  %573 = vmatpush1.bf16.msra.mxu1 %v2384_v48  ;;  %v2387_v51 = vld [vmem:[%s4116_s6 + $0x28] ss:$16 sps:$4 sm:$0xff]   ;;  %v2415_v45 = vld [vmem:[%s4116_s6 + $0xc4] ss:$16 sps:$4 sm:$0xff]  }
  0x31   :  { %646 = vmatpush1.bf16.msra.mxu0 %v2381_v46  ;;  %574 = vmatprep.subr.bf16.mxu1 %v2385_v49  ;;  %v2419_v46 = vld [vmem:[%s4116_s6 + $0xcc] ss:$16 sps:$4 sm:$0xff]   ;;  %v2417_v47 = vld [vmem:[%s4116_s6 + $0xc8] ss:$16 sps:$4 sm:$0xff]   ;;  %v2420_v48 = vld [vmem:[%s4116_s6 + $0xc0] ss:$16 sps:$4 sm:$0xff]  }
  0x32   :  { %647 = vmatprep.subr.bf16.mxu0 %v2389_v50  ;;  %v2421_v49 = vld [vmem:[%s4116_s6 + $0xe4] ss:$16 sps:$4 sm:$0xff]   ;;  %v2425_v50 = vld [vmem:[%s4116_s6 + $0xec] ss:$16 sps:$4 sm:$0xff]  }
  0x35   :  { %648 = vmatpush1.bf16.msra.mxu0 %v2387_v51  ;;  %v2423_v51 = vld [vmem:[%s4116_s6 + $0xe8] ss:$16 sps:$4 sm:$0xff]  }
  0xf5   :  { %v2341_v14 = vpop.f32.mrb[0].mxu0 }
  0xf6   :  { %v214_v17 = vadd.f32 %v2341_v14, %v45_v12  ;;  %v181_v18 = vpop.f32.mrb[1].mxu0 }
  0xf7   :  { %v212_v20 = vadd.f32 %v181_v18, %v43_v13  ;;  %v2342_v21 = vpop.f32.mrb[2].mxu0 }
  0xf8   :  { %v2778_v22 = vadd.f32 %v2161_v15, %v214_v17  ;;  %v215_v23 = vadd.f32 %v2342_v21, %v46_v16  ;;  %v184_v24 = vpop.f32.mrb[3].mxu0  ;;  %v2391_v21 = vld [vmem:[%s4116_s6 + $0x44] ss:$16 sps:$4 sm:$0xff]  }
  0xf9   :  { %v2780_v25 = vadd.f32 %v2161_v15, %v212_v20  ;;  %v213_v26 = vadd.f32 %v184_v24, %v44_v19  ;;  %v2390_v19 = vld [vmem:[%s4116_s6 + $0x20] ss:$16 sps:$4 sm:$0xff]   ;;  %v2393_v24 = vld [vmem:[%s4116_s6 + $0x48] ss:$16 sps:$4 sm:$0xff]  }
  0xfa   :  { %4149 = vst [vmem:[#allocation5_spill] sm:$0xff] %v2778_v22  ;;  %241 = vadd.xlane.f32.xlu1 %v2778_v22  ;;  %v2784_v27 = vadd.f32 %v2161_v15, %v215_v23  ;;  %575 = vmatpush1.bf16.msra.mxu1 %v2390_v19  ;;  %v2395_v23 = vld [vmem:[%s4116_s6 + $0x4c] ss:$16 sps:$4 sm:$0xff]  }
  0xfb   :  { %4150 = vst [vmem:[#allocation6_spill] sm:$0xff] %v2780_v25  ;;  %237 = vadd.xlane.f32.xlu0 %v2780_v25  ;;  %v2792_v30 = vadd.f32 %v2161_v15, %v213_v26  ;;  %576 = vmatprep.subr.bf16.mxu1 %v2391_v21  ;;  %v2396_v26 = vld [vmem:[%s4116_s6 + $0x40] ss:$16 sps:$4 sm:$0xff]  }
  0xfc   :  { %4151 = vst [vmem:[#allocation7_spill] sm:$0xff] %v2784_v27  ;;  %649 = vmatprep.subr.bf16.mxu0 %v2395_v23  ;;  %v2162_v21 = vld [vmem:[%s4114_s4] ss:$0 sm:$0xff] }
  0xfd   :  { %4152 = vst [vmem:[#allocation8_spill] sm:$0xff] %v2792_v30  ;;  %v2345_v31 = vpop.f32.mrb[4].mxu0  ;;  %650 = vmatpush1.bf16.msra.mxu0 %v2393_v24 }
  0xfe   :  { %v197_v32 = vpop.f32.mrb[5].mxu0  ;;  %243 = vadd.xlane.f32.xlu1 %v2784_v27  ;;  %v218_v35 = vadd.f32 %v2345_v31, %v49_v28  ;;  %577 = vmatpush1.bf16.msra.mxu1 %v2396_v26  ;;  %v2397_v28 = vld [vmem:[%s4116_s6 + $0x64] ss:$16 sps:$4 sm:$0xff]   ;;  %v2399_v31 = vld [vmem:[%s4116_s6 + $0x68] ss:$16 sps:$4 sm:$0xff]  }
  0xff   :  { %v216_v36 = vadd.f32 %v197_v32, %v47_v29  ;;  %v2346_v37 = vpop.f32.mrb[6].mxu0  ;;  %239 = vadd.xlane.f32.xlu0 %v2792_v30  ;;  %v2401_v29 = vld [vmem:[%s4116_s6 + $0x6c] ss:$16 sps:$4 sm:$0xff]   ;;  %v2402_v32 = vld [vmem:[%s4116_s6 + $0x60] ss:$16 sps:$4 sm:$0xff]   ;;  %578 = vmatprep.subr.bf16.mxu1 %v2397_v28 }
 0x100   :  { %v200_v38 = vpop.f32.mrb[7].mxu0  ;;  %v219_v40 = vadd.f32 %v2346_v37, %v50_v33  ;;  %v2804_v42 = vadd.f32 %v2161_v15, %v218_v35  ;;  %651 = vmatprep.subr.bf16.mxu0 %v2401_v29  ;;  %v2403_v33 = vld [vmem:[%s4116_s6 + $0x84] ss:$16 sps:$4 sm:$0xff]   ;;  %v2405_v35 = vld [vmem:[%s4116_s6 + $0x88] ss:$16 sps:$4 sm:$0xff]  }
 0x101   :  { %v2802_v39 = vadd.f32 %v2161_v15, %v216_v36  ;;  %v217_v41 = vadd.f32 %v200_v38, %v48_v34  ;;  %652 = vmatpush1.bf16.msra.mxu0 %v2399_v31  ;;  %v2407_v34 = vld [vmem:[%s4116_s6 + $0x8c] ss:$16 sps:$4 sm:$0xff]   ;;  %v2408_v36 = vld [vmem:[%s4116_s6 + $0x80] ss:$16 sps:$4 sm:$0xff]   ;;  %v2409_v37 = vld [vmem:[%s4116_s6 + $0xa4] ss:$16 sps:$4 sm:$0xff]  }
 0x102   :  { %4154 = vst [vmem:[#allocation10_spill] sm:$0xff] %v2804_v42  ;;  %v2809_v44 = vadd.f32 %v2161_v15, %v219_v40  ;;  %579 = vmatpush1.bf16.msra.mxu1 %v2402_v32  ;;  %653 = vmatprep.subr.bf16.mxu0 %v2407_v34  ;;  %v2413_v38 = vld [vmem:[%s4116_s6 + $0xac] ss:$16 sps:$4 sm:$0xff]   ;;  %v2411_v40 = vld [vmem:[%s4116_s6 + $0xa8] ss:$16 sps:$4 sm:$0xff]  }
 0x103   :  { %4153 = vst [vmem:[#allocation9_spill] sm:$0xff] %v2802_v39  ;;  %v2806_v43 = vadd.f32 %v2161_v15, %v217_v41  ;;  %245 = vadd.xlane.f32.xlu0 %v2802_v39  ;;  %580 = vmatprep.subr.bf16.mxu1 %v2403_v33  ;;  %v2414_v41 = vld [vmem:[%s4116_s6 + $0xa0] ss:$16 sps:$4 sm:$0xff]  }
 0x104   :  { %4156 = vst [vmem:[#allocation12_spill] sm:$0xff] %v2809_v44  ;;  %v2163_v32 = vld [vmem:[%s4115_s5] ss:$0 sm:$0xff] }
 0x105   :  { %4155 = vst [vmem:[#allocation11_spill] sm:$0xff] %v2806_v43  ;;  %247 = vadd.xlane.f32.xlu1 %v2806_v43  ;;  %654 = vmatpush1.bf16.msra.mxu0 %v2405_v35 }
 0x106   :  { %581 = vmatpush1.bf16.msra.mxu1 %v2408_v36  ;;  %655 = vmatprep.subr.bf16.mxu0 %v2413_v38 }
 0x107   :  { %249 = vadd.xlane.f32.xlu0 %v2804_v42  ;;  %582 = vmatprep.subr.bf16.mxu1 %v2409_v37 }
 0x109   :  { %251 = vadd.xlane.f32.xlu1 %v2809_v44  ;;  %656 = vmatpush1.bf16.msra.mxu0 %v2411_v40 }
 0x10a   :  { %583 = vmatpush1.bf16.msra.mxu1 %v2414_v41  ;;  %657 = vmatprep.subr.bf16.mxu0 %v2419_v46 }
 0x10b   :  { %584 = vmatprep.subr.bf16.mxu1 %v2415_v45 }
 0x10d   :  { %658 = vmatpush1.bf16.msra.mxu0 %v2417_v47 }
 0x10e   :  { %585 = vmatpush1.bf16.msra.mxu1 %v2420_v48  ;;  %659 = vmatprep.subr.bf16.mxu0 %v2425_v50 }
 0x10f   :  { %586 = vmatprep.subr.bf16.mxu1 %v2421_v49 }
 0x111   :  { %660 = vmatpush1.bf16.msra.mxu0 %v2423_v51 }
 0x187   :  { %v242_v52 = vpop.xlane.xlu1 %241 }
 0x188   :  { %v238_v53 = vpop.xlane.xlu0 %237  ;;  %v256_v54 = vmul.f32 0.0078125, %v242_v52  ;;  %v2426_v52 = vld [vmem:[%s4116_s6 + $0xe0] ss:$16 sps:$4 sm:$0xff]  }
 0x189   :  { %v254_v55 = vmul.f32 0.0078125, %v238_v53  ;;  %v2658_v53 = vmov 0   ;;  %587 = vmatpush1.bf16.msra.mxu1 %v2426_v52 }
 0x18a   :  { %v2839_v59 = vsub.f32 %v2778_v22, %v256_v54  ;;  %604 = vmatprep.mubr.bf16.mxu1 %v2658_v53  ;;  %677 = vmatprep.mubr.bf16.mxu0 %v2658_v53 }
 0x18b   :  { %v2836_v56 = vsub.f32 %v2780_v25, %v254_v55  ;;  %v244_v57 = vpop.xlane.xlu1 %243 }
 0x18c   :  { %v240_v58 = vpop.xlane.xlu0 %239  ;;  %v257_v60 = vmul.f32 0.0078125, %v244_v57  ;;  %v272_v3 = vmul.f32 %v2839_v59, %v2839_v59 }
 0x18d   :  { %v255_v61 = vmul.f32 0.0078125, %v240_v58  ;;  %v270_v62 = vmul.f32 %v2836_v56, %v2836_v56 }
 0x18e   :  { %v2847_v1 = vsub.f32 %v2784_v27, %v257_v60 }
 0x18f   :  { %v2844_v63 = vsub.f32 %v2792_v30, %v255_v61  ;;  %278 = vadd.xlane.f32.xlu0 %v270_v62 }
 0x190   :  { %v246_v0 = vpop.xlane.xlu0 %245  ;;  %v273_v11 = vmul.f32 %v2847_v1, %v2847_v1 }
 0x191   :  { %v258_v2 = vmul.f32 0.0078125, %v246_v0  ;;  %v271_v4 = vmul.f32 %v2844_v63, %v2844_v63 }
 0x192   :  { %v248_v5 = vpop.xlane.xlu1 %247 }
 0x193   :  { %v2854_v6 = vsub.f32 %v2802_v39, %v258_v2  ;;  %v259_v7 = vmul.f32 0.0078125, %v248_v5  ;;  %282 = vadd.xlane.f32.xlu0 %v272_v3  ;;  %280 = vadd.xlane.f32.xlu1 %v271_v4 }
 0x194   :  { %v250_v8 = vpop.xlane.xlu0 %249 }
 0x195   :  { %v2857_v9 = vsub.f32 %v2806_v43, %v259_v7  ;;  %v260_v10 = vmul.f32 0.0078125, %v250_v8  ;;  %v274_v12 = vmul.f32 %v2854_v6, %v2854_v6 }
 0x196   :  { %v252_v13 = vpop.xlane.xlu1 %251 }
 0x197   :  { %v2864_v14 = vsub.f32 %v2804_v42, %v260_v10  ;;  %v261_v15 = vmul.f32 0.0078125, %v252_v13  ;;  %284 = vadd.xlane.f32.xlu1 %v273_v11  ;;  %286 = vadd.xlane.f32.xlu0 %v274_v12  ;;  %v275_v17 = vmul.f32 %v2857_v9, %v2857_v9 }
 0x199   :  { %v2867_v16 = vsub.f32 %v2809_v44, %v261_v15  ;;  %v276_v18 = vmul.f32 %v2864_v14, %v2864_v14 }
 0x19b   :  { %288 = vadd.xlane.f32.xlu1 %v275_v17  ;;  %290 = vadd.xlane.f32.xlu0 %v276_v18  ;;  %v277_v20 = vmul.f32 %v2867_v16, %v2867_v16 }
 0x19f   :  { %292 = vadd.xlane.f32.xlu1 %v277_v20 }
 0x21c   :  { %v279_v54 = vpop.xlane.xlu0 %278 }
 0x21d   :  { %v294_v55 = vmul.f32 0.0078125, %v279_v54 }
 0x21f   :  { %v302_v57 = vadd.f32 1e-05, %v294_v55 }
 0x220   :  { %v281_v58 = vpop.xlane.xlu1 %280  ;;  %v283_v60 = vpop.xlane.xlu0 %282 }
 0x221   :  { %2459 = vrsqrt.f32 %v302_v57  ;;  %v295_v61 = vmul.f32 0.0078125, %v281_v58  ;;  %v296_v62 = vmul.f32 0.0078125, %v283_v60 }
 0x223   :  { %v303_v0 = vadd.f32 1e-05, %v295_v61  ;;  %v304_v2 = vadd.f32 1e-05, %v296_v62 }
 0x224   :  { %v285_v3 = vpop.xlane.xlu1 %284  ;;  %v287_v4 = vpop.xlane.xlu0 %286 }
 0x225   :  { %2461 = vrsqrt.f32 %v303_v0  ;;  %v297_v5 = vmul.f32 0.0078125, %v285_v3  ;;  %v298_v8 = vmul.f32 0.0078125, %v287_v4  ;;  %v392_v3 = vlaneseq }
 0x226   :  { %2463 = vrsqrt.f32 %v304_v2 }
 0x227   :  { %v305_v7 = vadd.f32 1e-05, %v297_v5  ;;  %v306_v13 = vadd.f32 1e-05, %v298_v8  ;;  %v393_v4 = vshrl.u32 %v392_v3, 7 }
 0x228   :  { %v289_v10 = vpop.xlane.xlu1 %288  ;;  %v291_v17 = vpop.xlane.xlu0 %290 }
 0x229   :  { %2465 = vrsqrt.f32 %v305_v7  ;;  %v299_v11 = vmul.f32 0.0078125, %v289_v10  ;;  %v300_v24 = vmul.f32 0.0078125, %v291_v17  ;;  %v402_v5 = vsub.s32 2, %v393_v4 }
 0x22a   :  { %v398_v7 = vsub.s32 1, %v393_v4  ;;  %v406_v8 = vsub.s32 3, %v393_v4 }
 0x22b   :  { %v2460_v12 = vpop.eup %2459  ;;  %v307_v15 = vadd.f32 1e-05, %v299_v11  ;;  %v308_v34 = vadd.f32 1e-05, %v300_v24 }
 0x22c   :  { %v293_v18 = vpop.xlane.xlu1 %292  ;;  %v318_v19 = vmul.f32 %v2460_v12, %v2836_v56 }
 0x22d   :  { %2467 = vrsqrt.f32 %v307_v15  ;;  %v301_v20 = vmul.f32 0.0078125, %v293_v18 }
 0x22e   :  { %2469 = vrsqrt.f32 %v306_v13  ;;  %v332_v28 = vmul.f32 %v2162_v21, %v318_v19 }
 0x22f   :  { %v2462_v23 = vpop.eup %2461  ;;  %v309_v31 = vadd.f32 1e-05, %v301_v20 }
 0x230   :  { %v319_v26 = vmul.f32 %v2462_v23, %v2844_v63  ;;  %v2464_v29 = vpop.eup %2463  ;;  %v346_v35 = vadd.f32 %v2163_v32, %v332_v28 }
 0x231   :  { %v320_v37 = vmul.f32 %v2464_v29, %v2839_v59  ;;  %2471 = vrsqrt.f32 %v309_v31 }
 0x232   :  { %v333_v33 = vmul.f32 %v2162_v21, %v319_v26  ;;  %2473 = vrsqrt.f32 %v308_v34 }
 0x233   :  { %v2466_v56 = vpop.eup %2465  ;;  %v334_v45 = vmul.f32 %v2162_v21, %v320_v37 }
 0x234   :  { %v347_v36 = vadd.f32 %v2163_v32, %v333_v33  ;;  %v321_v38 = vmul.f32 %v2466_v56, %v2847_v1 }
 0x235   :  { %v348_v49 = vadd.f32 %v2163_v32, %v334_v45 }
 0x236   :  { %v386_v40 = vpack.c.bf16 %v347_v36, %v346_v35  ;;  %v335_v41 = vmul.f32 %v2162_v21, %v321_v38 }
 0x237   :  { %v2468_v63 = vpop.eup %2467 }
 0x238   :  { %605 = vmatmul.mubr.bf16.vlgmr.msra.gmra.mrb[0].mxu1 %v386_v40  ;;  %678 = vmatmul.mubr.bf16.vlgmr.msra.gmra.mrb[8].mxu0 %v386_v40  ;;  %v2470_v46 = vpop.eup %2469  ;;  %v349_v47 = vadd.f32 %v2163_v32, %v335_v41  ;;  %v323_v48 = vmul.f32 %v2468_v63, %v2857_v9 }
 0x239   :  { %614 = vmatprep.mubr.bf16.mxu1 %v2658_v53  ;;  %687 = vmatprep.mubr.bf16.mxu0 %v2658_v53  ;;  %v322_v59 = vmul.f32 %v2470_v46, %v2854_v6 }
 0x23a   :  { %v387_v1 = vpack.c.bf16 %v349_v47, %v348_v49  ;;  %v337_v50 = vmul.f32 %v2162_v21, %v323_v48 }
 0x23b   :  { %v2472_v51 = vpop.eup %2471  ;;  %v336_v52 = vmul.f32 %v2162_v21, %v322_v59 }
 0x23c   :  { %v2474_v54 = vpop.eup %2473  ;;  %v351_v55 = vadd.f32 %v2163_v32, %v337_v50  ;;  %v325_v57 = vmul.f32 %v2472_v51, %v2867_v16  ;;  %v394_v16 = vsub.s32 0, %v393_v4 }
 0x23d   :  { %v350_v58 = vadd.f32 %v2163_v32, %v336_v52  ;;  %v324_v9 = vmul.f32 %v2474_v54, %v2864_v14  ;;  %v390_v14 = vld [vmem:[%s4117_s7] sm:$0xf] }
 0x23e   :  { %v339_v61 = vmul.f32 %v2162_v21, %v325_v57  ;;  %v2975_v10 = vrot.slane %v390_v14, %v394_v16  ;;  %v2977_v11 = vrot.slane %v390_v14, %v402_v5  ;;  %v2981_v12 = vrot.slane %v390_v14, %v406_v8 }
 0x23f   :  { %v388_v60 = vpack.c.bf16 %v351_v55, %v350_v58  ;;  %v338_v6 = vmul.f32 %v2162_v21, %v324_v9 }
 0x240   :  { %615 = vmatmul.mubr.bf16.gmra.mrb[4].mxu1 %v387_v1  ;;  %688 = vmatmul.mubr.bf16.gmra.mrb[12].mxu0 %v387_v1  ;;  %v353_v62 = vadd.f32 %v2163_v32, %v339_v61 }
 0x241   :  { %624 = vmatprep.mubr.bf16.mxu1 %v2658_v53  ;;  %697 = vmatprep.mubr.bf16.mxu0 %v2658_v53  ;;  %v352_v0 = vadd.f32 %v2163_v32, %v338_v6 }
 0x243   :  { %v389_v2 = vpack.c.bf16 %v353_v62, %v352_v0 }
 0x248   :  { %625 = vmatmul.mubr.bf16.gmra.mrb[8].mxu1 %v388_v60  ;;  %698 = vmatmul.mubr.bf16.gmra.mrb[16].mxu0 %v388_v60 }
 0x249   :  { %634 = vmatprep.mubr.bf16.mxu1 %v2658_v53  ;;  %707 = vmatprep.mubr.bf16.mxu0 %v2658_v53  ;;  %v2979_v53 = vrot.slane %v390_v14, %v398_v7  ;;  %v2427_v14 = vld [vmem:[%s4118_s8 + $0x40] sm:$0xff]  }
 0x24a   :  { %2243 = vmatprep.subr.bf16.mxu1 %v2427_v14 }
 0x250   :  { %635 = vmatmul.mubr.bf16.gmra.mrb[12].mxu1 %v389_v2  ;;  %708 = vmatmul.mubr.bf16.gmra.mrb[20].mxu0 %v389_v2 }
 0x30b   :  { %v606_v13 = vpop.f32.mrb[0].mxu1  ;;  %v679_v15 = vpop.f32.mrb[8].mxu0 }
 0x30c   :  { %v2984_v17 = vadd.f32 %v606_v13, %v2975_v10  ;;  %v2987_v18 = vadd.f32 %v679_v15, %v2977_v11  ;;  %v608_v19 = vpop.f32.mrb[1].mxu1  ;;  %v681_v20 = vpop.f32.mrb[9].mxu0 }
 0x30d   :  { %v2990_v21 = vadd.f32 %v608_v19, %v2979_v53  ;;  %v2993_v23 = vadd.f32 %v681_v20, %v2981_v12  ;;  %v610_v24 = vpop.f32.mrb[2].mxu1  ;;  %v683_v26 = vpop.f32.mrb[10].mxu0 }
 0x30e   :  { %v2996_v28 = vmul.f32 0.70710677, %v2984_v17  ;;  %v2999_v29 = vmul.f32 0.70710677, %v2987_v18  ;;  %v612_v36 = vpop.f32.mrb[3].mxu1  ;;  %v685_v37 = vpop.f32.mrb[11].mxu0  ;;  %v3026_v1 = vadd.f32 %v610_v24, %v2975_v10  ;;  %v3034_v54 = vadd.f32 %v683_v26, %v2977_v11 }
 0x30f   :  { %v3002_v31 = vmul.f32 0.70710677, %v2990_v21  ;;  %v3007_v56 = vmul.f32 0.70710677, %v2993_v23  ;;  %v3040_v57 = vadd.f32 %v612_v36, %v2979_v53  ;;  %v3048_v61 = vadd.f32 %v685_v37, %v2981_v12 }
 0x310   :  { %v782_v32 = vand.u32 2147483647, %v2996_v28  ;;  %v784_v33 = vand.u32 2147483647, %v2999_v29  ;;  %v3037_v55 = vmul.f32 0.70710677, %v3026_v1 }
 0x311   :  { %v3010_v38 = vand.u32 2147483647, %v3002_v31  ;;  %v3023_v59 = vand.u32 2147483647, %v3007_v56  ;;  %v3043_v58 = vmul.f32 0.70710677, %v3034_v54 }
 0x312   :  { %v814_v34 = vmul.f32 0.3275911, %v782_v32  ;;  %v816_v35 = vmul.f32 0.3275911, %v784_v33  ;;  %v786_v60 = vand.u32 2147483647, %v3037_v55  ;;  %v1230_v6 = vmul.f32 %v782_v32, %v782_v32 }
 0x313   :  { %v616_v40 = vpop.f32.mrb[4].mxu1  ;;  %v3012_v41 = vpop.f32.mrb[12].mxu0  ;;  %v815_v52 = vmul.f32 0.3275911, %v3010_v38  ;;  %v817_v9 = vmul.f32 0.3275911, %v3023_v59  ;;  %v1232_v7 = vmul.f32 %v784_v33, %v784_v33 }
 0x314   :  { %v846_v63 = vadd.f32 1.0, %v814_v34  ;;  %v848_v45 = vadd.f32 1.0, %v816_v35  ;;  %v3014_v46 = vpop.f32.mrb[5].mxu1  ;;  %v3016_v47 = vpop.f32.mrb[13].mxu0  ;;  %v788_v0 = vand.u32 2147483647, %v3043_v58  ;;  %v1234_v30 = vmul.f32 %v786_v60, %v786_v60 }
 0x315   :  { %v3018_v48 = vpop.f32.mrb[6].mxu1  ;;  %v3020_v49 = vpop.f32.mrb[14].mxu0  ;;  %v847_v62 = vadd.f32 1.0, %v815_v52  ;;  %v3052_v2 = vmul.f32 0.70710677, %v3040_v57  ;;  %v1262_v32 = vsub.f32 0.0, %v1230_v6 }
 0x316   :  { %2475 = vrcp.f32 %v846_v63  ;;  %v3028_v50 = vpop.f32.mrb[7].mxu1  ;;  %v3030_v51 = vpop.f32.mrb[15].mxu0  ;;  %v818_v4 = vmul.f32 0.3275911, %v786_v60  ;;  %v820_v8 = vmul.f32 0.3275911, %v788_v0 }
 0x317   :  { %2477 = vrcp.f32 %v848_v45  ;;  %v3064_v13 = vand.u32 2147483647, %v3052_v2  ;;  %v3071_v24 = vmul.f32 0.70710677, %v3048_v61  ;;  %v849_v34 = vadd.f32 1.0, %v817_v9 }
 0x318   :  { %v850_v20 = vadd.f32 1.0, %v818_v4  ;;  %2479 = vrcp.f32 %v847_v62  ;;  %v852_v35 = vadd.f32 1.0, %v820_v8  ;;  %v1264_v44 = vsub.f32 0.0, %v1232_v7 }
 0x319   :  { %v819_v63 = vmul.f32 0.3275911, %v3064_v13  ;;  %v3081_v45 = vand.u32 2147483647, %v3071_v24  ;;  %v1294_v62 = vmul.f32 1.442695, %v1262_v32  ;;  %v3084_v9 = vadd.f32 %v616_v40, %v2975_v10 }
 0x31a   :  { %2481 = vrcp.f32 %v850_v20  ;;  %v1298_v7 = vmul.f32 1.442695, %v1264_v44  ;;  %v1236_v40 = vmul.f32 %v788_v0, %v788_v0  ;;  %v1266_v60 = vsub.f32 0.0, %v1234_v30 }
 0x31b   :  { %v3054_v3 = vpop.f32.mrb[8].mxu1  ;;  %v3056_v16 = vpop.f32.mrb[16].mxu0  ;;  %2483 = vrcp.f32 %v852_v35  ;;  %v851_v43 = vadd.f32 1.0, %v819_v63  ;;  %v821_v39 = vmul.f32 0.3275911, %v3081_v45  ;;  %vm1422_vm0 = vcmp.ge.f32.partialorder %v2996_v28, 0.0 }
 0x31c   :  { %4157 = vst [vmem:[#allocation13_spill] sm:$0xff] %v3056_v16  ;;  %v3058_v5 = vpop.f32.mrb[9].mxu1  ;;  %v3066_v15 = vpop.f32.mrb[17].mxu0  ;;  %2485 = vrcp.f32 %v849_v34  ;;  %v3094_v32 = vmul.f32 0.70710677, %v3084_v9  ;;  %v1268_v0 = vsub.f32 0.0, %v1236_v40 }
 0x31d   :  { %4158 = vst [vmem:[#allocation14_spill] sm:$0xff] %v3058_v5  ;;  %4159 = vst [vmem:[#allocation15_spill] sm:$0xff] %v3066_v15  ;;  %v3068_v19 = vpop.f32.mrb[10].mxu1  ;;  %v3073_v26 = vpop.f32.mrb[18].mxu0  ;;  %2487 = vpow2.f32 %v1294_v62  ;;  %v853_v25 = vadd.f32 1.0, %v821_v39  ;;  %vm1424_vm1 = vcmp.ge.f32.partialorder %v2999_v29, 0.0 }
 0x31e   :  { %4160 = vst [vmem:[#allocation16_spill] sm:$0xff] %v3068_v19  ;;  %4161 = vst [vmem:[#allocation17_spill] sm:$0xff] %v3073_v26  ;;  %v3075_v33 = vpop.f32.mrb[11].mxu1  ;;  %v3077_v36 = vpop.f32.mrb[19].mxu0  ;;  %2489 = vrcp.f32 %v851_v43  ;;  %vm1426_vm2 = vcmp.ge.f32.partialorder %v3037_v55, 0.0  ;;  %vm1428_vm3 = vcmp.ge.f32.partialorder %v3043_v58, 0.0 }
 0x31f   :  { %4162 = vst [vmem:[#allocation18_spill] sm:$0xff] %v3075_v33  ;;  %4163 = vst [vmem:[#allocation19_spill] sm:$0xff] %v3077_v36  ;;  %2491 = vpow2.f32 %v1298_v7  ;;  %v1302_v36 = vmul.f32 1.442695, %v1266_v60  ;;  %v1231_v60 = vmul.f32 %v3010_v38, %v3010_v38  ;;  %v3128_v38 = vld [vmem:[%s4118_s8 + $0xc0] sm:$0xff]   ;;  %vm1423_vm4 = vcmp.ge.f32.partialorder %v3002_v31, 0.0 }
 0x320   :  { %v2476_v37 = vpop.eup %2475  ;;  %4167 = vst [vmem:[#allocation23_spill] sm:$0xff] %v3094_v32  ;;  %2493 = vrcp.f32 %v853_v25  ;;  %2283 = vmatprep.subr.bf16.mxu0 %v3128_v38  ;;  %vm1425_vm5 = vcmp.ge.f32.partialorder %v3007_v56, 0.0  ;;  %vm1427_vm6 = vcmp.ge.f32.partialorder %v3052_v2, 0.0  ;;  %v2452_v56 = vld [vmem:[%s4118_s8 + $0x30] sm:$0xff]   ;;  %vm1429_vm7 = vcmp.ge.f32.partialorder %v3071_v24, 0.0 }
 0x321   :  { %v2478_v52 = vpop.eup %2477  ;;  %v942_v4 = vmul.f32 1.0614054, %v2476_v37  ;;  %2495 = vpow2.f32 %v1302_v36 }
 0x322   :  { %v944_v14 = vmul.f32 1.0614054, %v2478_v52 }
 0x323   :  { %v974_v6 = vadd.f32 -1.4531521, %v942_v4  ;;  %v3086_v8 = vpop.f32.mrb[12].mxu1  ;;  %v3088_v42 = vpop.f32.mrb[20].mxu0 }
 0x324   :  { %4164 = vst [vmem:[#allocation20_spill] sm:$0xff] %v3086_v8  ;;  %4165 = vst [vmem:[#allocation21_spill] sm:$0xff] %v3088_v42  ;;  %v976_v20 = vadd.f32 -1.4531521, %v944_v14  ;;  %v3091_v27 = vpop.f32.mrb[13].mxu1  ;;  %v3096_v42 = vpop.eup %2479 }
 0x325   :  { %4166 = vst [vmem:[#allocation22_spill] sm:$0xff] %v3091_v27  ;;  %v1006_v22 = vmul.f32 %v2476_v37, %v974_v6  ;;  %v3099_v14 = vand.u32 2147483647, %v3094_v32  ;;  %v3101_v6 = vpop.eup %2481  ;;  %v943_v39 = vmul.f32 1.0614054, %v3096_v42 }
 0x326   :  { %v1008_v35 = vmul.f32 %v2478_v52, %v976_v20  ;;  %v3103_v20 = vpop.eup %2483 }
 0x327   :  { %v1038_v34 = vadd.f32 1.4214138, %v1006_v22  ;;  %v946_v22 = vmul.f32 1.0614054, %v3101_v6  ;;  %v948_v43 = vmul.f32 1.0614054, %v3103_v20  ;;  %v3108_v7 = vpop.eup %2485 }
 0x328   :  { %v1040_v4 = vadd.f32 1.4214138, %v1008_v35  ;;  %v822_v8 = vmul.f32 0.3275911, %v3099_v14  ;;  %v975_v19 = vadd.f32 -1.4531521, %v943_v39  ;;  %v2488_v5 = vpop.eup %2487  ;;  %v1233_v39 = vmul.f32 %v3023_v59, %v3023_v59 }
 0x329   :  { %v1070_v63 = vmul.f32 %v2476_v37, %v1038_v34  ;;  %v978_v34 = vadd.f32 -1.4531521, %v946_v22  ;;  %v945_v15 = vmul.f32 1.0614054, %v3108_v7  ;;  %v3116_v16 = vpop.eup %2489  ;;  %v2428_v59 = vld [vmem:[%s4118_s8] sm:$0xff]  }
 0x32a   :  { %v1072_v44 = vmul.f32 %v2478_v52, %v1040_v4  ;;  %v3111_v4 = vpop.f32.mrb[21].mxu0  ;;  %v854_v32 = vadd.f32 1.0, %v822_v8  ;;  %2244 = vmatpush3.bf16.msra.mxu1 %v2428_v59 }
 0x32b   :  { %v1102_v27 = vadd.f32 -0.28449672, %v1070_v63  ;;  %4168 = vst [vmem:[#allocation24_spill] sm:$0xff] %v3111_v4  ;;  %v980_v63 = vadd.f32 -1.4531521, %v948_v43  ;;  %v1010_v40 = vmul.f32 %v3101_v6, %v978_v34  ;;  %v2492_v43 = vpop.eup %2491  ;;  %v3155_v59 = vpop.f32.mrb[22].mxu0 }
 0x32c   :  { %v1104_v62 = vadd.f32 -0.28449672, %v1072_v44  ;;  %v1306_v44 = vmul.f32 1.442695, %v1268_v0  ;;  %v3134_v36 = vpop.eup %2493  ;;  %4170 = vst [vmem:[#allocation26_spill] sm:$0xff] %v3155_v59 }
 0x32d   :  { %v1134_v35 = vmul.f32 %v2476_v37, %v1102_v27  ;;  %v1012_v25 = vmul.f32 %v3103_v20, %v980_v63  ;;  %v1042_v22 = vadd.f32 1.4214138, %v1010_v40  ;;  %v1265_v63 = vsub.f32 0.0, %v1233_v39  ;;  %v3144_v40 = vpop.f32.mrb[14].mxu1 }
 0x32e   :  { %v1136_v30 = vmul.f32 %v2478_v52, %v1104_v62  ;;  %2497 = vpow2.f32 %v1306_v44  ;;  %4169 = vst [vmem:[#allocation25_spill] sm:$0xff] %v3144_v40 }
 0x32f   :  { %v1166_v33 = vadd.f32 0.2548296, %v1134_v35  ;;  %v1044_v62 = vadd.f32 1.4214138, %v1012_v25  ;;  %v1074_v35 = vmul.f32 %v3101_v6, %v1042_v22  ;;  %2499 = vrcp.f32 %v854_v32 }
 0x330   :  { %v1168_v26 = vadd.f32 0.2548296, %v1136_v30  ;;  %v3141_v30 = vmul.f32 0.5, %v2987_v18  ;;  %v1300_v39 = vmul.f32 1.442695, %v1265_v63  ;;  %v3160_v63 = vadd.f32 %v3012_v41, %v2977_v11 }
 0x331   :  { %v1198_v27 = vmul.f32 %v2476_v37, %v1166_v33  ;;  %v1007_v33 = vmul.f32 %v3096_v42, %v975_v19  ;;  %v977_v37 = vadd.f32 -1.4531521, %v945_v15  ;;  %v1076_v8 = vmul.f32 %v3103_v20, %v1044_v62 }
 0x332   :  { %v1200_v4 = vmul.f32 %v2478_v52, %v1168_v26  ;;  %v1106_v26 = vadd.f32 -0.28449672, %v1074_v35  ;;  %v3137_v19 = vmul.f32 0.5, %v2984_v17  ;;  %v1263_v15 = vsub.f32 0.0, %v1231_v60 }
 0x333   :  { %v1358_v0 = vmul.f32 %v2488_v5, %v1198_v27  ;;  %v947_v5 = vmul.f32 1.0614054, %v3116_v16  ;;  %v1108_v52 = vadd.f32 -0.28449672, %v1076_v8  ;;  %v1039_v25 = vadd.f32 1.4214138, %v1007_v33  ;;  %v2496_v33 = vpop.eup %2495 }
 0x334   :  { %v1360_v34 = vmul.f32 %v2492_v43, %v1200_v4  ;;  %v1138_v32 = vmul.f32 %v3101_v6, %v1106_v26  ;;  %v1009_v27 = vmul.f32 %v3108_v7, %v977_v37  ;;  %v949_v62 = vmul.f32 1.0614054, %v3134_v36 }
 0x335   :  { %v1390_v4 = vsub.f32 1.0, %v1358_v0  ;;  %v1140_v17 = vmul.f32 %v3103_v20, %v1108_v52  ;;  %v979_v60 = vadd.f32 -1.4531521, %v947_v5  ;;  %v1296_v18 = vmul.f32 1.442695, %v1263_v15 }
 0x336   :  { %v1392_v44 = vsub.f32 1.0, %v1360_v34  ;;  %v1170_v22 = vadd.f32 0.2548296, %v1138_v32  ;;  %v722_v35 = vmul.f32 0.5, %v3026_v1  ;;  %v1071_v8 = vmul.f32 %v3096_v42, %v1039_v25 }
 0x337   :  { %v1172_v43 = vadd.f32 0.2548296, %v1140_v17  ;;  %v1454_v0 = vsub.f32 0.0, %v1390_v4  ;;  %v1041_v26 = vadd.f32 1.4214138, %v1009_v27  ;;  %v1011_v15 = vmul.f32 %v3116_v16, %v979_v60 }
 0x338   :  { %v1202_v34 = vmul.f32 %v3101_v6, %v1170_v22  ;;  %v1456_v37 = vsub.f32 0.0, %v1392_v44  ;;  %v2498_v52 = vpop.eup %2497  ;;  %v981_v17 = vadd.f32 -1.4531521, %v949_v62  ;;  %2501 = vpow2.f32 %v1296_v18 }
 0x339   :  { %v1204_v5 = vmul.f32 %v3103_v20, %v1172_v43  ;;  %v724_v1 = vmul.f32 0.5, %v3034_v54  ;;  %v3164_v25 = vpop.eup %2499  ;;  %v1486_v20 = vsel %vm1422_vm0, %v1390_v4, %v1454_v0  ;;  %v1235_v22 = vmul.f32 %v3064_v13, %v3064_v13  ;;  %v2430_v54 = vld [vmem:[%s4118_s8 + $0x80] sm:$0xff]  }
 0x33a   :  { %v1362_v32 = vmul.f32 %v2496_v33, %v1202_v34  ;;  %v1488_v41 = vsel %vm1424_vm1, %v1392_v44, %v1456_v37  ;;  %v1103_v60 = vadd.f32 -0.28449672, %v1071_v8  ;;  %v1073_v62 = vmul.f32 %v3108_v7, %v1041_v26  ;;  %2284 = vmatpush3.bf16.msra.mxu0 %v2430_v54 }
 0x33b   :  { %v1364_v6 = vmul.f32 %v2498_v52, %v1204_v5  ;;  %v1043_v28 = vadd.f32 1.4214138, %v1011_v15  ;;  %v1013_v4 = vmul.f32 %v3134_v36, %v981_v17  ;;  %v3179_v0 = vmul.f32 0.70710677, %v3160_v63  ;;  %v3193_v5 = vpop.f32.mrb[15].mxu1 }
 0x33c   :  { %v1394_v27 = vsub.f32 1.0, %v1362_v32  ;;  %v1518_v34 = vadd.f32 1.0, %v1486_v20  ;;  %v950_v29 = vmul.f32 1.0614054, %v3164_v25  ;;  %v3184_v44 = vadd.f32 %v3014_v46, %v2979_v53  ;;  %4171 = vst [vmem:[#allocation27_spill] sm:$0xff] %v3193_v5 }
 0x33d   :  { %v1396_v18 = vsub.f32 1.0, %v1364_v6  ;;  %v1520_v33 = vadd.f32 1.0, %v1488_v41  ;;  %v1237_v8 = vmul.f32 %v3081_v45, %v3081_v45  ;;  %v3191_v26 = vand.u32 2147483647, %v3179_v0 }
 0x33e   :  { %v1458_v43 = vsub.f32 0.0, %v1394_v27  ;;  %v1135_v52 = vmul.f32 %v3096_v42, %v1103_v60  ;;  %v1105_v32 = vadd.f32 -0.28449672, %v1073_v62  ;;  %v1075_v6 = vmul.f32 %v3116_v16, %v1043_v28  ;;  %v3208_v60 = vpop.f32.mrb[23].mxu0 }
 0x33f   :  { %v1460_v13 = vsub.f32 0.0, %v1396_v18  ;;  %v1045_v55 = vadd.f32 1.4214138, %v1013_v4  ;;  %v824_v20 = vmul.f32 0.3275911, %v3191_v26  ;;  %v3201_v45 = vmul.f32 %v1518_v34, %v3137_v19  ;;  %4174 = vst [vmem:[#allocation30_spill] sm:$0xff] %v3208_v60 }
 0x340   :  { %v1490_v37 = vsel %vm1426_vm2, %v1394_v27, %v1458_v43  ;;  %v982_v41 = vadd.f32 -1.4531521, %v950_v29  ;;  %v3206_v54 = vmul.f32 0.70710677, %v3184_v44  ;;  %v3211_v58 = vmul.f32 %v1520_v33, %v3141_v30 }
 0x341   :  { %v1522_v15 = vadd.f32 1.0, %v1490_v37  ;;  %v1492_v46 = vsel %vm1428_vm3, %v1396_v18, %v1460_v13  ;;  %4172 = vst [vmem:[#allocation28_spill] sm:$0xff] %v3201_v45  ;;  %v1267_v18 = vsub.f32 0.0, %v1235_v22  ;;  %v856_v43 = vadd.f32 1.0, %v824_v20  ;;  %v2431_v37 = vld [vmem:[%s4118_s8 + $0x48] sm:$0xff]  }
 0x342   :  { %v1524_v17 = vadd.f32 1.0, %v1492_v46  ;;  %4175 = vst [vmem:[#allocation31_spill] sm:$0xff] %v3211_v58  ;;  %v2502_v28 = vpop.eup %2501  ;;  %v1137_v4 = vmul.f32 %v3108_v7, %v1105_v32  ;;  %2503 = vpow2.f32 %v1300_v39  ;;  %v1167_v34 = vadd.f32 0.2548296, %v1135_v52  ;;  %v2433_v52 = vld [vmem:[%s4118_s8 + $0xc8] sm:$0xff]   ;;  %2245 = vmatprep.subr.bf16.mxu1 %v2431_v37 }
 0x343   :  { %v3203_v27 = vmul.f32 %v1522_v15, %v722_v35  ;;  %v3219_v35 = vand.u32 2147483647, %v3206_v54  ;;  %v1107_v30 = vadd.f32 -0.28449672, %v1075_v6  ;;  %v1269_v29 = vsub.f32 0.0, %v1237_v8  ;;  %v2432_v46 = vld [vmem:[%s4118_s8 + $0x8] sm:$0xff]   ;;  %2285 = vmatprep.subr.bf16.mxu0 %v2433_v52 }
 0x344   :  { %v3213_v62 = vmul.f32 %v1524_v17, %v724_v1  ;;  %v1077_v1 = vmul.f32 %v3134_v36, %v1045_v55  ;;  %v1014_v22 = vmul.f32 %v3164_v25, %v982_v41  ;;  %2505 = vrcp.f32 %v856_v43  ;;  %v2434_v17 = vld [vmem:[%s4118_s8 + $0x88] sm:$0xff]   ;;  %2246 = vmatpush3.bf16.msra.mxu1 %v2432_v46 }
 0x345   :  { %4173 = vst [vmem:[#allocation29_spill] sm:$0xff] %v3203_v27  ;;  %v823_v33 = vmul.f32 0.3275911, %v3219_v35  ;;  %v1304_v39 = vmul.f32 1.442695, %v1267_v18  ;;  %v3234_v8 = vadd.f32 %v3016_v47, %v2981_v12  ;;  %v1199_v6 = vmul.f32 %v3096_v42, %v1167_v34  ;;  %2286 = vmatpush3.bf16.msra.mxu0 %v2434_v17 }
 0x346   :  { %4176 = vst [vmem:[#allocation32_spill] sm:$0xff] %v3213_v62  ;;  %v1169_v32 = vadd.f32 0.2548296, %v1137_v4  ;;  %v1308_v55 = vmul.f32 1.442695, %v1269_v29  ;;  %v3245_v20 = vadd.f32 %v3018_v48, %v2975_v10  ;;  %v3249_v41 = vadd.f32 %v3020_v49, %v2977_v11  ;;  %v2435_v49 = vld [vmem:[%s4118_s8 + $0x50] sm:$0xff]  }
 0x347   :  { %v855_v15 = vadd.f32 1.0, %v823_v33  ;;  %v1139_v47 = vmul.f32 %v3116_v16, %v1107_v30  ;;  %v1109_v18 = vadd.f32 -0.28449672, %v1077_v1  ;;  %v1046_v43 = vadd.f32 1.4214138, %v1014_v22  ;;  %v2436_v29 = vld [vmem:[%s4118_s8 + $0x10] sm:$0xff]   ;;  %2247 = vmatprep.subr.bf16.mxu1 %v2435_v49 }
 0x348   :  { %v3253_v42 = vmul.f32 0.70710677, %v3234_v8  ;;  %v3256_v48 = vmul.f32 0.70710677, %v3245_v20  ;;  %v1201_v4 = vmul.f32 %v3108_v7, %v1169_v32  ;;  %v1238_v34 = vmul.f32 %v3099_v14, %v3099_v14  ;;  %v2437_v1 = vld [vmem:[%s4118_s8 + $0xd0] sm:$0xff]   ;;  %2248 = vmatpush3.bf16.msra.mxu1 %v2436_v29  ;;  %v2441_v29 = vld [vmem:[%s4118_s8 + $0xd8] sm:$0xff]  }
 0x349   :  { %2507 = vrcp.f32 %v855_v15  ;;  %v3265_v30 = vmul.f32 0.70710677, %v3249_v41  ;;  %v2438_v22 = vld [vmem:[%s4118_s8 + $0x90] sm:$0xff]   ;;  %v3276_v33 = vmul.f32 %v2502_v28, %v1199_v6  ;;  %v3285_v37 = vmul.f32 0.5, %v2990_v21  ;;  %2287 = vmatprep.subr.bf16.mxu0 %v2437_v1  ;;  %v2439_v21 = vld [vmem:[%s4118_s8 + $0x58] sm:$0xff]  }
 0x34a   :  { %2509 = vpow2.f32 %v1304_v39  ;;  %v3279_v7 = vand.u32 2147483647, %v3253_v42  ;;  %v3282_v14 = vand.u32 2147483647, %v3256_v48  ;;  %v1171_v52 = vadd.f32 0.2548296, %v1139_v47  ;;  %2288 = vmatpush3.bf16.msra.mxu0 %v2438_v22  ;;  %2249 = vmatprep.subr.bf16.mxu1 %v2439_v21 }
 0x34b   :  { %v1078_v32 = vmul.f32 %v3164_v25, %v1046_v43  ;;  %v3289_v15 = vand.u32 2147483647, %v3265_v30  ;;  %v3292_v28 = vmul.f32 0.5, %v2993_v23  ;;  %2511 = vpow2.f32 %v1308_v55  ;;  %v2440_v55 = vld [vmem:[%s4118_s8 + $0x18] sm:$0xff]   ;;  %2289 = vmatprep.subr.bf16.mxu0 %v2441_v29 }
 0x34c   :  { %v2504_v39 = vpop.eup %2503  ;;  %v825_v46 = vmul.f32 0.3275911, %v3279_v7  ;;  %v826_v17 = vmul.f32 0.3275911, %v3282_v14  ;;  %v1141_v43 = vmul.f32 %v3134_v36, %v1109_v18  ;;  %v1270_v49 = vsub.f32 0.0, %v1238_v34  ;;  %v2442_v1 = vld [vmem:[%s4118_s8 + $0x98] sm:$0xff]   ;;  %2250 = vmatpush3.bf16.msra.mxu1 %v2440_v55 }
 0x34d   :  { %v3301_v47 = vmul.f32 %v2504_v39, %v1201_v4  ;;  %v828_v23 = vmul.f32 0.3275911, %v3289_v15  ;;  %v1391_v4 = vsub.f32 1.0, %v3276_v33  ;;  %v3318_v34 = vadd.f32 %v3028_v50, %v2979_v53  ;;  %v2443_v50 = vld [vmem:[%s4118_s8 + $0x60] sm:$0xff]  }
 0x34e   :  { %v3299_v6 = vpop.eup %2505  ;;  %v857_v18 = vadd.f32 1.0, %v825_v46  ;;  %v1203_v39 = vmul.f32 %v3116_v16, %v1171_v52  ;;  %v1110_v13 = vadd.f32 -0.28449672, %v1078_v32  ;;  %v858_v19 = vadd.f32 1.0, %v826_v17  ;;  %2290 = vmatpush3.bf16.msra.mxu0 %v2442_v1  ;;  %v2445_v16 = vld [vmem:[%s4118_s8 + $0xe0] sm:$0xff]   ;;  %2251 = vmatprep.subr.bf16.mxu1 %v2443_v50 }
 0x34f   :  { %v952_v22 = vmul.f32 1.0614054, %v3299_v6  ;;  %v3324_v33 = vmul.f32 0.5, %v3040_v57  ;;  %v860_v46 = vadd.f32 1.0, %v828_v23  ;;  %v1393_v32 = vsub.f32 1.0, %v3301_v47  ;;  %v2444_v57 = vld [vmem:[%s4118_s8 + $0x20] sm:$0xff]   ;;  %2291 = vmatprep.subr.bf16.mxu0 %v2445_v16 }
 0x350   :  { %2513 = vrcp.f32 %v857_v18  ;;  %v1173_v17 = vadd.f32 0.2548296, %v1141_v43  ;;  %v1310_v21 = vmul.f32 1.442695, %v1270_v49  ;;  %v1455_v55 = vsub.f32 0.0, %v1391_v4  ;;  %v2446_v47 = vld [vmem:[%s4118_s8 + $0xa0] sm:$0xff]   ;;  %2252 = vmatpush3.bf16.msra.mxu1 %v2444_v57 }
 0x351   :  { %v984_v58 = vadd.f32 -1.4531521, %v952_v22  ;;  %2515 = vrcp.f32 %v858_v19  ;;  %v3340_v1 = vmul.f32 0.70710677, %v3318_v34  ;;  %v1142_v19 = vmul.f32 %v3164_v25, %v1110_v13 }
 0x352   :  { %v3350_v49 = vadd.f32 %v3030_v51, %v2981_v12  ;;  %v3354_v22 = vadd.f32 %v3054_v3, %v2975_v10  ;;  %2517 = vrcp.f32 %v860_v46  ;;  %2292 = vmatpush3.bf16.msra.mxu0 %v2446_v47  ;;  %v3361_v13 = vmul.f32 0.5, %v3048_v61  ;;  %v2447_v3 = vld [vmem:[%s4118_s8 + $0x68] sm:$0xff]  }
 0x353   :  { %v3332_v52 = vpop.eup %2507  ;;  %4177 = vst [vmem:[#allocation33_spill] sm:$0xff] %v3340_v1  ;;  %v1016_v18 = vmul.f32 %v3299_v6, %v984_v58  ;;  %v3358_v16 = vand.u32 2147483647, %v3340_v1  ;;  %v1205_v51 = vmul.f32 %v3134_v36, %v1173_v17  ;;  %v2448_v58 = vld [vmem:[%s4118_s8 + $0x28] sm:$0xff]   ;;  %v3374_v57 = vmul.f32 0.5, %v3084_v9  ;;  %2253 = vmatprep.subr.bf16.mxu1 %v2447_v3 }
 0x354   :  { %v2510_v23 = vpop.eup %2509  ;;  %v951_v29 = vmul.f32 1.0614054, %v3332_v52  ;;  %2519 = vpow2.f32 %v1310_v21  ;;  %v2449_v17 = vld [vmem:[%s4118_s8 + $0xe8] sm:$0xff]   ;;  %v1487_v47 = vsel %vm1423_vm4, %v1391_v4, %v1455_v55  ;;  %v3391_v21 = vmul.f32 0.70710677, %v3354_v22  ;;  %2254 = vmatpush3.bf16.msra.mxu1 %v2448_v58 }
 0x355   :  { %v3345_v43 = vmul.f32 %v2510_v23, %v1203_v39  ;;  %v1457_v39 = vsub.f32 0.0, %v1393_v32  ;;  %v3365_v23 = vmul.f32 0.70710677, %v3350_v49  ;;  %v2512_v46 = vpop.eup %2511  ;;  %v827_v36 = vmul.f32 0.3275911, %v3358_v16  ;;  %2293 = vmatprep.subr.bf16.mxu0 %v2449_v17 }
 0x356   :  { %v983_v50 = vadd.f32 -1.4531521, %v951_v29  ;;  %v2450_v29 = vld [vmem:[%s4118_s8 + $0xa8] sm:$0xff]   ;;  %4179 = vst [vmem:[#allocation35_spill] sm:$0xff] %v3391_v21  ;;  %v1048_v45 = vadd.f32 1.4214138, %v1016_v18  ;;  %v1240_v27 = vmul.f32 %v3191_v26, %v3191_v26  ;;  %v3398_v4 = vmul.f32 %v2512_v46, %v1205_v51 }
 0x357   :  { %4178 = vst [vmem:[#allocation34_spill] sm:$0xff] %v3365_v23  ;;  %v3388_v9 = vand.u32 2147483647, %v3365_v23  ;;  %v859_v60 = vadd.f32 1.0, %v827_v36  ;;  %v1489_v31 = vsel %vm1425_vm5, %v1393_v32, %v1457_v39  ;;  %v3402_v62 = vand.u32 2147483647, %v3391_v21  ;;  %2294 = vmatpush3.bf16.msra.mxu0 %v2450_v29 }
 0x358   :  { %v1015_v61 = vmul.f32 %v3332_v52, %v983_v50  ;;  %v1174_v50 = vadd.f32 0.2548296, %v1142_v19  ;;  %v2451_v19 = vld [vmem:[%s4118_s8 + $0x70] sm:$0xff]   ;;  %v1519_v26 = vadd.f32 1.0, %v1487_v47  ;;  %v1239_v58 = vmul.f32 %v3219_v35, %v3219_v35 }
 0x359   :  { %v829_v55 = vmul.f32 0.3275911, %v3388_v9  ;;  %2521 = vrcp.f32 %v859_v60  ;;  %v2453_v32 = vld [vmem:[%s4118_s8 + $0xf0] sm:$0xff]   ;;  %2255 = vmatprep.subr.bf16.mxu1 %v2451_v19  ;;  %v1521_v36 = vadd.f32 1.0, %v1489_v31  ;;  %v4180_v17 = vsub.f32 1.0, %v3345_v43 }
 0x35a   :  { %v3407_v18 = vpop.eup %2513  ;;  %v1047_v3 = vadd.f32 1.4214138, %v1015_v61  ;;  %v2454_v39 = vld [vmem:[%s4118_s8 + $0xb0] sm:$0xff]   ;;  %v830_v61 = vmul.f32 0.3275911, %v3402_v62  ;;  %v1272_v47 = vsub.f32 0.0, %v1240_v27  ;;  %2256 = vmatpush3.bf16.msra.mxu1 %v2452_v56  ;;  %2295 = vmatprep.subr.bf16.mxu0 %v2453_v32  ;;  %v1206_v40 = vmul.f32 %v3164_v25, %v1174_v50 }
 0x35b   :  { %v3418_v51 = vpop.eup %2515  ;;  %v953_v46 = vmul.f32 1.0614054, %v3407_v18  ;;  %v861_v60 = vadd.f32 1.0, %v829_v55  ;;  %v1459_v29 = vsub.f32 0.0, %v4180_v17  ;;  %v1397_v59 = vsub.f32 1.0, %v3398_v4  ;;  %2296 = vmatpush3.bf16.msra.mxu0 %v2454_v39  ;;  %v2455_v55 = vld [vmem:[%s4118_s8 + $0x78] sm:$0xff]  }
 0x35c   :  { %v954_v5 = vmul.f32 1.0614054, %v3418_v51  ;;  %v3432_v31 = vpop.eup %2517  ;;  %v1080_v27 = vmul.f32 %v3299_v6, %v1048_v45  ;;  %v1079_v19 = vmul.f32 %v3332_v52, %v1047_v3  ;;  %v862_v32 = vadd.f32 1.0, %v830_v61  ;;  %v2456_v25 = vld [vmem:[%s4118_s8 + $0x38] sm:$0xff]   ;;  %2257 = vmatprep.subr.bf16.mxu1 %v2455_v55 }
 0x35d   :  { %v985_v35 = vadd.f32 -1.4531521, %v953_v46  ;;  %2523 = vrcp.f32 %v861_v60  ;;  %v2457_v50 = vld [vmem:[%s4118_s8 + $0xf8] sm:$0xff]   ;;  %v1271_v39 = vsub.f32 0.0, %v1239_v58  ;;  %v956_v45 = vmul.f32 1.0614054, %v3432_v31 }
 0x35e   :  { %v986_v56 = vadd.f32 -1.4531521, %v954_v5  ;;  %v2458_v4 = vld [vmem:[%s4118_s8 + $0xb8] sm:$0xff]   ;;  %v4181_v5 = vld [vmem:[#allocation13_spill] sm:$0xff]  ;;  %v2520_v60 = vpop.eup %2519  ;;  %v3453_v61 = vmul.f32 %v1519_v26, %v3285_v37  ;;  %v3456_v17 = vmul.f32 %v1521_v36, %v3292_v28  ;;  %v3459_v21 = vmul.f32 0.5, %v3160_v63  ;;  %2258 = vmatpush3.bf16.msra.mxu1 %v2456_v25  ;;  %2297 = vmatprep.subr.bf16.mxu0 %v2457_v50 }
 0x35f   :  { %v1017_v46 = vmul.f32 %v3407_v18, %v985_v35  ;;  %v3450_v3 = vadd.f32 %v4181_v5, %v2977_v11  ;;  %v4182_v35 = vsub.f32 1.0, %v3345_v43  ;;  %v1366_v55 = vmul.f32 %v2520_v60, %v1206_v40  ;;  %2298 = vmatpush3.bf16.msra.mxu0 %v2458_v4  ;;  %2347 = vmatprep.subr.bf16.mxu1 %v3128_v38  ;;  %v4183_v40 = vld [vmem:[#allocation23_spill] sm:$0xff] }
 0x360   :  { %v1018_v58 = vmul.f32 %v3418_v51, %v986_v56  ;;  %v1314_v23 = vmul.f32 1.442695, %v1272_v47  ;;  %v988_v1 = vadd.f32 -1.4531521, %v956_v45  ;;  %v1112_v37 = vadd.f32 -0.28449672, %v1080_v27 }
 0x361   :  { %v1491_v5 = vsel %vm1427_vm6, %v4182_v35, %v1459_v29  ;;  %v1111_v28 = vadd.f32 -0.28449672, %v1079_v19  ;;  %2525 = vrcp.f32 %v862_v32  ;;  %v3468_v63 = vmul.f32 0.70710677, %v3450_v3 }
 0x362   :  { %v1461_v26 = vsub.f32 0.0, %v1397_v59  ;;  %v3471_v36 = vmul.f32 0.5, %v3184_v44  ;;  %v1312_v43 = vmul.f32 1.442695, %v1271_v39  ;;  %v1049_v56 = vadd.f32 1.4214138, %v1017_v46 }
 0x363   :  { %v3473_v2 = vpop.eup %2521  ;;  %vm1430_vm8 = vcmp.ge.f32.partialorder %v4183_v40, 0.0  ;;  %v1241_v29 = vmul.f32 %v3279_v7, %v3279_v7  ;;  %v1050_v38 = vadd.f32 1.4214138, %v1018_v58  ;;  %v1020_v47 = vmul.f32 %v3432_v31, %v988_v1  ;;  %v4184_v40 = vld [vmem:[#allocation14_spill] sm:$0xff] }
 0x364   :  { %v3480_v27 = vand.u32 2147483647, %v3468_v63  ;;  %v1523_v19 = vadd.f32 1.0, %v1491_v5  ;;  %v1398_v32 = vsub.f32 1.0, %v1366_v55  ;;  %v1242_v44 = vmul.f32 %v3282_v14, %v3282_v14 }
 0x365   :  { %v955_v25 = vmul.f32 1.0614054, %v3473_v2  ;;  %v1144_v50 = vmul.f32 %v3299_v6, %v1112_v37  ;;  %2527 = vpow2.f32 %v1314_v23  ;;  %v1143_v4 = vmul.f32 %v3332_v52, %v1111_v28 }
 0x366   :  { %v832_v7 = vmul.f32 0.3275911, %v3480_v27  ;;  %v1493_v1 = vsel %vm1429_vm7, %v1397_v59, %v1461_v26  ;;  %2529 = vpow2.f32 %v1312_v43  ;;  %v1081_v46 = vmul.f32 %v3407_v18, %v1049_v56 }
 0x367   :  { %v3488_v39 = vpop.eup %2523  ;;  %v987_v45 = vadd.f32 -1.4531521, %v955_v25  ;;  %v1273_v60 = vsub.f32 0.0, %v1241_v29  ;;  %v1082_v14 = vmul.f32 %v3418_v51, %v1050_v38  ;;  %v1052_v58 = vadd.f32 1.4214138, %v1020_v47 }
 0x368   :  { %v864_v35 = vadd.f32 1.0, %v832_v7  ;;  %v1462_v5 = vsub.f32 0.0, %v1398_v32  ;;  %v1274_v23 = vsub.f32 0.0, %v1242_v44  ;;  %v1244_v55 = vmul.f32 %v3289_v15, %v3289_v15 }
 0x369   :  { %v957_v37 = vmul.f32 1.0614054, %v3488_v39  ;;  %v3498_v28 = vmul.f32 %v1523_v19, %v3324_v33  ;;  %v1176_v24 = vadd.f32 0.2548296, %v1144_v50  ;;  %v1175_v59 = vadd.f32 0.2548296, %v1143_v4 }
 0x36a   :  { %v1019_v26 = vmul.f32 %v3473_v2, %v987_v45  ;;  %v1525_v43 = vadd.f32 1.0, %v1493_v1  ;;  %v3502_v56 = vmul.f32 0.5, %v3234_v8  ;;  %v1113_v29 = vadd.f32 -0.28449672, %v1081_v46 }
 0x36b   :  { %v3505_v38 = vmul.f32 0.5, %v3245_v20  ;;  %v3507_v47 = vpop.eup %2525  ;;  %v1316_v15 = vmul.f32 1.442695, %v1273_v60  ;;  %v1114_v44 = vadd.f32 -0.28449672, %v1082_v14  ;;  %v1084_v25 = vmul.f32 %v3432_v31, %v1052_v58 }
 0x36c   :  { %2531 = vrcp.f32 %v864_v35  ;;  %v1494_v33 = vsel %vm1430_vm8, %v1398_v32, %v1462_v5  ;;  %v1318_v19 = vmul.f32 1.442695, %v1274_v23  ;;  %v1276_v50 = vsub.f32 0.0, %v1244_v55 }
 0x36d   :  { %v989_v4 = vadd.f32 -1.4531521, %v957_v37  ;;  %v1208_v8 = vmul.f32 %v3299_v6, %v1176_v24  ;;  %v1207_v7 = vmul.f32 %v3332_v52, %v1175_v59  ;;  %v1051_v1 = vadd.f32 1.4214138, %v1019_v26 }
 0x36e   :  { %v1243_v20 = vmul.f32 %v3358_v16, %v3358_v16  ;;  %v1145_v46 = vmul.f32 %v3407_v18, %v1113_v29  ;;  %v3518_v45 = vmul.f32 0.5, %v3249_v41  ;;  %v958_v60 = vmul.f32 1.0614054, %v3507_v47 }
 0x36f   :  { %v3523_v32 = vadd.f32 %v4184_v40, %v2979_v53  ;;  %v2528_v14 = vpop.eup %2527  ;;  %v1526_v58 = vadd.f32 1.0, %v1494_v33  ;;  %2533 = vpow2.f32 %v1316_v15  ;;  %v1146_v6 = vmul.f32 %v3418_v51, %v1114_v44 }
 0x370   :  { %v1116_v52 = vadd.f32 -0.28449672, %v1084_v25  ;;  %v2530_v35 = vpop.eup %2529  ;;  %2535 = vpow2.f32 %v1318_v19  ;;  %v1322_v16 = vmul.f32 1.442695, %v1276_v50  ;;  %v1021_v5 = vmul.f32 %v3488_v39, %v989_v4 }
 0x371   :  { %v1245_v41 = vmul.f32 %v3388_v9, %v3388_v9  ;;  %v1368_v23 = vmul.f32 %v2528_v14, %v1208_v8  ;;  %v1367_v55 = vmul.f32 %v2530_v35, %v1207_v7  ;;  %v1083_v37 = vmul.f32 %v3473_v2, %v1051_v1 }
 0x372   :  { %v1275_v24 = vsub.f32 0.0, %v1243_v20  ;;  %v3531_v59 = vmul.f32 %v1525_v43, %v3361_v13  ;;  %v1177_v26 = vadd.f32 0.2548296, %v1145_v46  ;;  %v990_v29 = vadd.f32 -1.4531521, %v958_v60 }
 0x373   :  { %v3534_v15 = vmul.f32 0.70710677, %v3523_v32  ;;  %v3537_v44 = vmul.f32 %v1526_v58, %v3374_v57  ;;  %v1178_v25 = vadd.f32 0.2548296, %v1146_v6  ;;  %v1148_v33 = vmul.f32 %v3432_v31, %v1116_v52 }
 0x374   :  { %v3541_v9 = vmul.f32 0.5, %v3318_v34  ;;  %vm1432_vm9 = vcmp.ge.f32.partialorder %v3179_v0, 0.0  ;;  %vm1431_vm10 = vcmp.ge.f32.partialorder %v3206_v54, 0.0  ;;  %2537 = vpow2.f32 %v1322_v16 }
 0x375   :  { %4185 = vst [vmem:[#allocation13_spill] sm:$0xff] %v3537_v44  ;;  %v1053_v13 = vadd.f32 1.4214138, %v1021_v5  ;;  %v1277_v43 = vsub.f32 0.0, %v1245_v41  ;;  %v1246_v19 = vmul.f32 %v3402_v62, %v3402_v62  ;;  %v1400_v57 = vsub.f32 1.0, %v1368_v23 }
 0x376   :  { %v3547_v50 = vpop.eup %2531  ;;  %v1399_v4 = vsub.f32 1.0, %v1367_v55  ;;  %v1115_v8 = vadd.f32 -0.28449672, %v1083_v37  ;;  %v3550_v7 = vand.u32 2147483647, %v3534_v15  ;;  %v1209_v34 = vmul.f32 %v3407_v18, %v1177_v26 }
 0x377   :  { %v1320_v1 = vmul.f32 1.442695, %v1275_v24  ;;  %v3554_v20 = vmul.f32 0.5, %v3350_v49  ;;  %v1022_v46 = vmul.f32 %v3507_v47, %v990_v29  ;;  %v1210_v60 = vmul.f32 %v3418_v51, %v1178_v25  ;;  %v4187_v29 = vld [vmem:[#allocation16_spill] sm:$0xff] }
 0x378   :  { %v1180_v40 = vadd.f32 0.2548296, %v1148_v33  ;;  %v3559_v62 = vmul.f32 0.5, %v3354_v22  ;;  %v831_v14 = vmul.f32 0.3275911, %v3550_v7  ;;  %v1085_v58 = vmul.f32 %v3488_v39, %v1053_v13  ;;  %v4186_v22 = vld [vmem:[#allocation15_spill] sm:$0xff] }
 0x379   :  { %v1324_v6 = vmul.f32 1.442695, %v1277_v43  ;;  %v1278_v52 = vsub.f32 0.0, %v1246_v19  ;;  %v960_v18 = vmul.f32 1.0614054, %v3547_v50  ;;  %v2534_v35 = vpop.eup %2533  ;;  %v1464_v16 = vsub.f32 0.0, %v1400_v57 }
 0x37a   :  { %v1463_v49 = vsub.f32 0.0, %v1399_v4  ;;  %v1147_v5 = vmul.f32 %v3473_v2, %v1115_v8  ;;  %v863_v41 = vadd.f32 1.0, %v831_v14  ;;  %v2536_v23 = vpop.eup %2535  ;;  %v1369_v51 = vmul.f32 %v2534_v35, %v1209_v34 }
 0x37b   :  { %2539 = vpow2.f32 %v1320_v1  ;;  %v1054_v55 = vadd.f32 1.4214138, %v1022_v46  ;;  %v3567_v37 = vadd.f32 %v4186_v22, %v2981_v12  ;;  %v1370_v24 = vmul.f32 %v2536_v23, %v1210_v60  ;;  %v4188_v22 = vld [vmem:[#allocation17_spill] sm:$0xff] }
 0x37c   :  { %v1212_v26 = vmul.f32 %v3432_v31, %v1180_v40  ;;  %2541 = vrcp.f32 %v863_v41  ;;  %v3572_v25 = vadd.f32 %v4187_v29, %v2975_v10  ;;  %v1117_v33 = vadd.f32 -0.28449672, %v1085_v58 }
 0x37d   :  { %2543 = vpow2.f32 %v1324_v6  ;;  %v1326_v13 = vmul.f32 1.442695, %v1278_v52  ;;  %v992_v43 = vadd.f32 -1.4531521, %v960_v18  ;;  %v1496_v19 = vsel %vm1432_vm9, %v1400_v57, %v1464_v16 }
 0x37e   :  { %v1495_v8 = vsel %vm1431_vm10, %v1399_v4, %v1463_v49  ;;  %vm1433_vm11 = vcmp.ge.f32.partialorder %v3253_v42, 0.0  ;;  %v1179_v34 = vadd.f32 0.2548296, %v1147_v5  ;;  %v3580_v31 = vmul.f32 0.70710677, %v3567_v37  ;;  %v2538_v1 = vpop.eup %2537  ;;  %v4191_v42 = vld [vmem:[#allocation18_spill] sm:$0xff] }
 0x37f   :  { %v1401_v46 = vsub.f32 1.0, %v1369_v51  ;;  %vm1434_vm12 = vcmp.ge.f32.partialorder %v3256_v48, 0.0  ;;  %v1086_v60 = vmul.f32 %v3507_v47, %v1054_v55  ;;  %v1248_v40 = vmul.f32 %v3480_v27, %v3480_v27 }
 0x380   :  { %v3587_v0 = vmul.f32 0.70710677, %v3572_v25  ;;  %v1402_v54 = vsub.f32 1.0, %v1370_v24  ;;  %v1372_v57 = vmul.f32 %v2538_v1, %v1212_v26  ;;  %v3590_v4 = vmul.f32 0.5, %v3450_v3 }
 0x381   :  { %v3593_v14 = vand.u32 2147483647, %v3580_v31  ;;  %v1528_v58 = vadd.f32 1.0, %v1496_v19  ;;  %v1149_v6 = vmul.f32 %v3488_v39, %v1117_v33  ;;  %v1024_v52 = vmul.f32 %v3547_v50, %v992_v43 }
 0x382   :  { %v3598_v18 = vand.u32 2147483647, %v3587_v0  ;;  %v1527_v27 = vadd.f32 1.0, %v1495_v8  ;;  %v1211_v35 = vmul.f32 %v3473_v2, %v1179_v34  ;;  %2545 = vpow2.f32 %v1326_v13 }
 0x383   :  { %v833_v16 = vmul.f32 0.3275911, %v3593_v14  ;;  %v1465_v49 = vsub.f32 0.0, %v1401_v46  ;;  %v1118_v3 = vadd.f32 -0.28449672, %v1086_v60  ;;  %v1280_v5 = vsub.f32 0.0, %v1248_v40 }
 0x384   :  { %v834_v41 = vmul.f32 0.3275911, %v3598_v18  ;;  %v1466_v23 = vsub.f32 0.0, %v1402_v54  ;;  %v1404_v51 = vsub.f32 1.0, %v1372_v57  ;;  %vm1436_vm13 = vcmp.ge.f32.partialorder %v3265_v30, 0.0 }
 0x385   :  { %v865_v55 = vadd.f32 1.0, %v833_v16  ;;  %v3606_v24 = vadd.f32 %v4188_v22, %v2977_v11  ;;  %v2540_v26 = vpop.eup %2539  ;;  %v3609_v2 = vmul.f32 %v1528_v58, %v3459_v21  ;;  %v1181_v29 = vadd.f32 0.2548296, %v1149_v6  ;;  %v4192_v16 = vld [vmem:[#allocation19_spill] sm:$0xff] }
 0x386   :  { %v1056_v33 = vadd.f32 1.4214138, %v1024_v52  ;;  %v866_v13 = vadd.f32 1.0, %v834_v41  ;;  %v3611_v43 = vpop.eup %2541  ;;  %v3614_v19 = vmul.f32 %v1527_v27, %v3471_v36  ;;  %v1371_v8 = vmul.f32 %v2540_v26, %v1211_v35  ;;  %v4190_v52 = vld [vmem:[#allocation33_spill] sm:$0xff] }
 0x387   :  { %4189 = vst [vmem:[#allocation23_spill] sm:$0xff] %v3609_v2  ;;  %2547 = vrcp.f32 %v865_v55  ;;  %v3617_v34 = vmul.f32 0.70710677, %v3606_v24  ;;  %v2544_v1 = vpop.eup %2543  ;;  %v1497_v60 = vsel %vm1433_vm11, %v1401_v46, %v1465_v49  ;;  %v1150_v21 = vmul.f32 %v3507_v47, %v1118_v3 }
 0x388   :  { %v1330_v40 = vmul.f32 1.442695, %v1280_v5  ;;  %2549 = vrcp.f32 %v866_v13  ;;  %v1498_v57 = vsel %vm1434_vm12, %v1402_v54, %v1466_v23  ;;  %v1468_v58 = vsub.f32 0.0, %v1404_v51 }
 0x389   :  { %v959_v36 = vmul.f32 1.0614054, %v3611_v43  ;;  %v804_v6 = vand.u32 2147483647, %v3617_v34  ;;  %vm1435_vm14 = vcmp.ge.f32.partialorder %v4190_v52, 0.0  ;;  %v1213_v27 = vmul.f32 %v3488_v39, %v1181_v29 }
 0x38a   :  { %v1088_v35 = vmul.f32 %v3547_v50, %v1056_v33  ;;  %v3631_v46 = vadd.f32 %v4191_v42, %v2979_v53  ;;  %v3635_v49 = vadd.f32 %v4192_v16, %v2981_v12  ;;  %v1403_v48 = vsub.f32 1.0, %v1371_v8  ;;  %v4195_v42 = vld [vmem:[#allocation20_spill] sm:$0xff] }
 0x38b   :  { %v3638_v54 = vmul.f32 0.5, %v3523_v32  ;;  %v1247_v3 = vmul.f32 %v3550_v7, %v3550_v7  ;;  %v836_v5 = vmul.f32 0.3275911, %v804_v6  ;;  %v1529_v41 = vadd.f32 1.0, %v1497_v60 }
 0x38c   :  { %v1530_v39 = vadd.f32 1.0, %v1498_v57  ;;  %v1182_v23 = vadd.f32 0.2548296, %v1150_v21  ;;  %v3643_v55 = vmul.f32 0.70710677, %v3631_v46  ;;  %v2546_v22 = vpop.eup %2545  ;;  %2551 = vpow2.f32 %v1330_v40 }
 0x38d   :  { %v991_v26 = vadd.f32 -1.4531521, %v959_v36  ;;  %v868_v29 = vadd.f32 1.0, %v836_v5  ;;  %v3646_v33 = vmul.f32 0.70710677, %v3635_v49  ;;  %v1500_v32 = vsel %vm1436_vm13, %v1404_v51, %v1468_v58 }
 0x38e   :  { %v3650_v13 = vmul.f32 %v2544_v1, %v1213_v27  ;;  %v1120_v7 = vadd.f32 -0.28449672, %v1088_v35  ;;  %v3653_v8 = vand.u32 2147483647, %v3643_v55  ;;  %v1467_v60 = vsub.f32 0.0, %v1403_v48 }
 0x38f   :  { %v1279_v21 = vsub.f32 0.0, %v1247_v3  ;;  %2553 = vrcp.f32 %v868_v29  ;;  %v3656_v57 = vand.u32 2147483647, %v3646_v33  ;;  %v3659_v40 = vmul.f32 %v1529_v41, %v3502_v56  ;;  %v4197_v29 = vld [vmem:[#allocation34_spill] sm:$0xff] }
 0x390   :  { %v3662_v36 = vmul.f32 %v1530_v39, %v3505_v38  ;;  %v1214_v30 = vmul.f32 %v3507_v47, %v1182_v23  ;;  %v835_v51 = vmul.f32 0.3275911, %v3653_v8  ;;  %v1532_v58 = vadd.f32 1.0, %v1500_v32 }
 0x391   :  { %4193 = vst [vmem:[#allocation14_spill] sm:$0xff] %v3659_v40  ;;  %v3666_v1 = vpop.eup %2547  ;;  %v1023_v27 = vmul.f32 %v3611_v43, %v991_v26  ;;  %v837_v35 = vmul.f32 0.3275911, %v3656_v57  ;;  %v3672_v16 = vadd.f32 %v4195_v42, %v2975_v10  ;;  %v1405_v38 = vsub.f32 1.0, %v3650_v13 }
 0x392   :  { %4194 = vst [vmem:[#allocation15_spill] sm:$0xff] %v3662_v36  ;;  %v3674_v56 = vpop.eup %2549  ;;  %v1152_v3 = vmul.f32 %v3547_v50, %v1120_v7  ;;  %v961_v47 = vmul.f32 1.0614054, %v3666_v1  ;;  %v867_v5 = vadd.f32 1.0, %v835_v51  ;;  %v1499_v41 = vsel %vm1435_vm14, %v1403_v48, %v1467_v60 }
 0x393   :  { %4196 = vst [vmem:[#allocation16_spill] sm:$0xff] %v3672_v16  ;;  %v1328_v39 = vmul.f32 1.442695, %v1279_v21  ;;  %v962_v23 = vmul.f32 1.0614054, %v3674_v56  ;;  %v869_v26 = vadd.f32 1.0, %v837_v35  ;;  %v3683_v32 = vmul.f32 %v2546_v22, %v1214_v30 }
 0x394   :  { %vm1437_vm15 = vcmp.ge.f32.partialorder %v4197_v29, 0.0  ;;  %v993_v42 = vadd.f32 -1.4531521, %v961_v47  ;;  %v1252_v2 = vmul.f32 %v804_v6, %v804_v6  ;;  %2555 = vrcp.f32 %v867_v5  ;;  %v4200_v21 = vld [vmem:[#allocation21_spill] sm:$0xff] }
 0x395   :  { %v1055_v13 = vadd.f32 1.4214138, %v1023_v27  ;;  %v994_v36 = vadd.f32 -1.4531521, %v962_v23  ;;  %2557 = vrcp.f32 %v869_v26  ;;  %v3686_v7 = vmul.f32 0.70710677, %v3672_v16 }
 0x396   :  { %v3689_v52 = vmul.f32 %v1532_v58, %v3518_v45  ;;  %v1184_v48 = vadd.f32 0.2548296, %v1152_v3  ;;  %v3692_v60 = vmul.f32 0.5, %v3567_v37  ;;  %v3696_v22 = vadd.f32 %v4200_v21, %v2977_v11  ;;  %v2552_v30 = vpop.eup %2551 }
 0x397   :  { %4198 = vst [vmem:[#allocation17_spill] sm:$0xff] %v3686_v7  ;;  %v1531_v6 = vadd.f32 1.0, %v1499_v41  ;;  %v1025_v51 = vmul.f32 %v3666_v1, %v993_v42  ;;  %v1249_v27 = vmul.f32 %v3593_v14, %v3593_v14  ;;  %v3702_v35 = vand.u32 2147483647, %v3686_v7 }
 0x398   :  { %4199 = vst [vmem:[#allocation33_spill] sm:$0xff] %v3689_v52  ;;  %4201 = vst [vmem:[#allocation18_spill] sm:$0xff] %v3696_v22  ;;  %v1469_v45 = vsub.f32 0.0, %v1405_v38  ;;  %v1026_v58 = vmul.f32 %v3674_v56, %v994_v36  ;;  %v1284_v3 = vsub.f32 0.0, %v1252_v2  ;;  %v3706_v37 = vmul.f32 0.70710677, %v3696_v22 }
 0x399   :  { %v3708_v47 = vpop.eup %2553  ;;  %v1087_v41 = vmul.f32 %v3611_v43, %v1055_v13  ;;  %2559 = vpow2.f32 %v1328_v39  ;;  %v838_v23 = vmul.f32 0.3275911, %v3702_v35  ;;  %v1216_v14 = vmul.f32 %v3547_v50, %v1184_v48 }
 0x39a   :  { %4202 = vst [vmem:[#allocation19_spill] sm:$0xff] %v3706_v37  ;;  %v1250_v26 = vmul.f32 %v3598_v18, %v3598_v18  ;;  %v964_v36 = vmul.f32 1.0614054, %v3708_v47  ;;  %v3718_v2 = vand.u32 2147483647, %v3706_v37  ;;  %v1281_v21 = vsub.f32 0.0, %v1249_v27 }
 0x39b   :  { %v1057_v42 = vadd.f32 1.4214138, %v1025_v51  ;;  %v3721_v22 = vmul.f32 0.5, %v3572_v25  ;;  %v870_v5 = vadd.f32 1.0, %v838_v23  ;;  %v3724_v39 = vmul.f32 %v1531_v6, %v3541_v9 }
 0x39c   :  { %v1058_v13 = vadd.f32 1.4214138, %v1026_v58  ;;  %v996_v16 = vadd.f32 -1.4531521, %v964_v36  ;;  %v1338_v50 = vmul.f32 1.442695, %v1284_v3  ;;  %v3728_v18 = vsel %vm1437_vm15, %v1405_v38, %v1469_v45 }
 0x39d   :  { %4203 = vst [vmem:[#allocation20_spill] sm:$0xff] %v3724_v39  ;;  %v1119_v48 = vadd.f32 -0.28449672, %v1087_v41  ;;  %2561 = vrcp.f32 %v870_v5  ;;  %v840_v37 = vmul.f32 0.3275911, %v3718_v2  ;;  %v4204_v25 = vsub.f32 1.0, %v3683_v32 }
 0x39e   :  { %v3731_v51 = vpop.eup %2555  ;;  %v1376_v23 = vmul.f32 %v2552_v30, %v1216_v14  ;;  %v1282_v7 = vsub.f32 0.0, %v1250_v26  ;;  %v1028_v9 = vmul.f32 %v3708_v47, %v996_v16  ;;  %v1089_v58 = vmul.f32 %v3666_v1, %v1057_v42  ;;  %v4205_v30 = vld [vmem:[#allocation35_spill] sm:$0xff]  ;;  %v4206_v36 = vld [vmem:[#allocation22_spill] sm:$0xff] }
 0x39f   :  { %v1470_v27 = vsub.f32 0.0, %v4204_v25  ;;  %v3736_v6 = vpop.eup %2557  ;;  %v1332_v29 = vmul.f32 1.442695, %v1281_v21  ;;  %v963_v38 = vmul.f32 1.0614054, %v3731_v51  ;;  %v1251_v45 = vmul.f32 %v3653_v8, %v3653_v8 }
 0x3a0   :  { %v1090_v3 = vmul.f32 %v3674_v56, %v1058_v13  ;;  %v1060_v5 = vadd.f32 1.4214138, %v1028_v9  ;;  %2563 = vpow2.f32 %v1338_v50  ;;  %v965_v41 = vmul.f32 1.0614054, %v3736_v6 }
 0x3a1   :  { %vm1438_vm0 = vcmp.ge.f32.partialorder %v4205_v30, 0.0  ;;  %v1151_v16 = vmul.f32 %v3611_v43, %v1119_v48  ;;  %v995_v14 = vadd.f32 -1.4531521, %v963_v38  ;;  %v872_v26 = vadd.f32 1.0, %v840_v37 }
 0x3a2   :  { %v3748_v42 = vadd.f32 %v4206_v36, %v2979_v53  ;;  %v1408_v21 = vsub.f32 1.0, %v1376_v23  ;;  %vm1440_vm1 = vcmp.ge.f32.partialorder %v3468_v63, 0.0  ;;  %v1092_v8 = vmul.f32 %v3708_v47, %v1060_v5 }
 0x3a3   :  { %v997_v13 = vadd.f32 -1.4531521, %v965_v41  ;;  %v1253_v50 = vmul.f32 %v3656_v57, %v3656_v57  ;;  %v2560_v25 = vpop.eup %2559  ;;  %v1121_v9 = vadd.f32 -0.28449672, %v1089_v58  ;;  %2565 = vpow2.f32 %v1332_v29 }
 0x3a4   :  { %4207 = vst [vmem:[#allocation34_spill] sm:$0xff] %v3748_v42  ;;  %v1027_v48 = vmul.f32 %v3731_v51, %v995_v14  ;;  %v1283_v38 = vsub.f32 0.0, %v1251_v45  ;;  %v1122_v37 = vadd.f32 -0.28449672, %v1090_v3  ;;  %v1334_v52 = vmul.f32 1.442695, %v1282_v7 }
 0x3a5   :  { %v1124_v44 = vadd.f32 -0.28449672, %v1092_v8  ;;  %v1029_v36 = vmul.f32 %v3736_v6, %v997_v13  ;;  %v1183_v23 = vadd.f32 0.2548296, %v1151_v16  ;;  %2567 = vrcp.f32 %v872_v26 }
 0x3a6   :  { %v1059_v40 = vadd.f32 1.4214138, %v1027_v48  ;;  %v3757_v5 = vmul.f32 0.70710677, %v3748_v42  ;;  %v1472_v41 = vsub.f32 0.0, %v1408_v21  ;;  %v1285_v58 = vsub.f32 0.0, %v1253_v50 }
 0x3a7   :  { %v1156_v57 = vmul.f32 %v3708_v47, %v1124_v44  ;;  %v1061_v39 = vadd.f32 1.4214138, %v1029_v36  ;;  %v3760_v29 = vpop.eup %2561  ;;  %v1153_v45 = vmul.f32 %v3666_v1, %v1121_v9  ;;  %v1336_v3 = vmul.f32 1.442695, %v1283_v38 }
 0x3a8   :  { %4208 = vst [vmem:[#allocation21_spill] sm:$0xff] %v3757_v5  ;;  %v1091_v7 = vmul.f32 %v3731_v51, %v1059_v40  ;;  %v3765_v14 = vand.u32 2147483647, %v3757_v5  ;;  %v1154_v16 = vmul.f32 %v3674_v56, %v1122_v37  ;;  %2569 = vpow2.f32 %v1334_v52  ;;  %v4210_v5 = vld [vmem:[#allocation24_spill] sm:$0xff] }
 0x3a9   :  { %v1188_v26 = vadd.f32 0.2548296, %v1156_v57  ;;  %v1093_v8 = vmul.f32 %v3736_v6, %v1061_v39  ;;  %v1215_v44 = vmul.f32 %v3611_v43, %v1183_v23  ;;  %v966_v50 = vmul.f32 1.0614054, %v3760_v29 }
 0x3aa   :  { %v1123_v13 = vadd.f32 -0.28449672, %v1091_v7  ;;  %v839_v48 = vmul.f32 0.3275911, %v3765_v14  ;;  %v2564_v9 = vpop.eup %2563  ;;  %v4209_v40 = vsub.f32 1.0, %v3683_v32  ;;  %v1504_v39 = vsel %vm1440_vm1, %v1408_v21, %v1472_v41 }
 0x3ab   :  { %v1220_v36 = vmul.f32 %v3708_v47, %v1188_v26  ;;  %v1125_v37 = vadd.f32 -0.28449672, %v1093_v8  ;;  %v1340_v52 = vmul.f32 1.442695, %v1285_v58  ;;  %v1185_v57 = vadd.f32 0.2548296, %v1153_v45 }
 0x3ac   :  { %v1502_v38 = vsel %vm1438_vm0, %v4209_v40, %v1470_v27  ;;  %2571 = vpow2.f32 %v1336_v3  ;;  %v871_v43 = vadd.f32 1.0, %v839_v48  ;;  %v1186_v23 = vadd.f32 0.2548296, %v1154_v16 }
 0x3ad   :  { %v1380_v7 = vmul.f32 %v2564_v9, %v1220_v36  ;;  %v1155_v42 = vmul.f32 %v3731_v51, %v1123_v13  ;;  %v3782_v32 = vadd.f32 %v4210_v5, %v2981_v12  ;;  %v2566_v30 = vpop.eup %2565  ;;  %v1375_v27 = vmul.f32 %v2560_v25, %v1215_v44 }
 0x3ae   :  { %v1157_v47 = vmul.f32 %v3736_v6, %v1125_v37  ;;  %v998_v26 = vadd.f32 -1.4531521, %v966_v50  ;;  %2573 = vrcp.f32 %v871_v43  ;;  %v1533_v63 = vadd.f32 1.0, %v3728_v18 }
 0x3af   :  { %v1536_v21 = vadd.f32 1.0, %v1504_v39  ;;  %v1412_v41 = vsub.f32 1.0, %v1380_v7  ;;  %2575 = vpow2.f32 %v1340_v52  ;;  %v3786_v58 = vpop.eup %2567  ;;  %v1534_v45 = vadd.f32 1.0, %v1502_v38 }
 0x3b0   :  { %v1217_v3 = vmul.f32 %v3666_v1, %v1185_v57  ;;  %v740_v16 = vmul.f32 0.5, %v3606_v24  ;;  %v1254_v5 = vmul.f32 %v3702_v35, %v3702_v35  ;;  %vm1439_vm2 = vcmp.ge.f32.partialorder %v3534_v15, 0.0 }
 0x3b1   :  { %v1218_v25 = vmul.f32 %v3674_v56, %v1186_v23  ;;  %v1476_v8 = vsub.f32 0.0, %v1412_v41  ;;  %v1187_v44 = vadd.f32 0.2548296, %v1155_v42  ;;  %v3795_v18 = vmul.f32 0.70710677, %v3782_v32 }
 0x3b2   :  { %v1407_v13 = vsub.f32 1.0, %v1375_v27  ;;  %vm1444_vm3 = vcmp.ge.f32.partialorder %v3617_v34, 0.0  ;;  %v1189_v50 = vadd.f32 0.2548296, %v1157_v47  ;;  %v1030_v1 = vmul.f32 %v3760_v29, %v998_v26  ;;  %v2570_v48 = vpop.eup %2569  ;;  %v4211_v34 = vld [vmem:[#allocation25_spill] sm:$0xff] }
 0x3b3   :  { %v3800_v24 = vmul.f32 %v1536_v21, %v3590_v4  ;;  %v1508_v35 = vsel %vm1444_vm3, %v1412_v41, %v1476_v8  ;;  %v968_v9 = vmul.f32 1.0614054, %v3786_v58  ;;  %v3804_v56 = vand.u32 2147483647, %v3795_v18 }
 0x3b4   :  { %v1377_v42 = vmul.f32 %v2566_v30, %v1217_v3  ;;  %v1540_v40 = vadd.f32 1.0, %v1508_v35  ;;  %v1256_v38 = vmul.f32 %v3718_v2, %v3718_v2  ;;  %v3810_v36 = vadd.f32 %v4211_v34, %v2975_v10 }
 0x3b5   :  { %v1378_v37 = vmul.f32 %v2570_v48, %v1218_v25  ;;  %v1219_v52 = vmul.f32 %v3731_v51, %v1187_v44  ;;  %v1286_v4 = vsub.f32 0.0, %v1254_v5  ;;  %v841_v39 = vmul.f32 0.3275911, %v3804_v56 }
 0x3b6   :  { %v2572_v57 = vpop.eup %2571  ;;  %v1471_v43 = vsub.f32 0.0, %v1407_v13  ;;  %v3814_v23 = vmul.f32 %v1540_v40, %v740_v16  ;;  %v1221_v7 = vmul.f32 %v3736_v6, %v1189_v50  ;;  %v1062_v30 = vadd.f32 1.4214138, %v1030_v1 }
 0x3b7   :  { %v3818_v27 = vmul.f32 %v1533_v63, %v3554_v20  ;;  %vm1441_vm4 = vcmp.ge.f32.partialorder %v3580_v31, 0.0  ;;  %v1000_v10 = vadd.f32 -1.4531521, %v968_v9  ;;  %v873_v2 = vadd.f32 1.0, %v841_v39 }
 0x3b8   :  { %v3821_v47 = vpop.eup %2573  ;;  %v1409_v51 = vsub.f32 1.0, %v1377_v42  ;;  %vm1442_vm5 = vcmp.ge.f32.partialorder %v3587_v0, 0.0  ;;  %v1656_v26 = vpack.c.bf16 %v3814_v23, %v3800_v24  ;;  %v1288_v21 = vsub.f32 0.0, %v1256_v38  ;;  %v4212_v38 = vld [vmem:[#allocation26_spill] sm:$0xff]  ;;  %v4050_v24 = vld [vmem:[%s4119_s9] ss:$0 sm:$0xff] }
 0x3b9   :  { %v3827_v41 = vmul.f32 0.70710677, %v3810_v36  ;;  %v2576_v6 = vpop.eup %2575  ;;  %v3830_v20 = vmul.f32 %v1534_v45, %v3559_v62  ;;  %v1410_v63 = vsub.f32 1.0, %v1378_v37  ;;  %v1379_v3 = vmul.f32 %v2572_v57, %v1219_v52 }
 0x3ba   :  { %v1342_v16 = vmul.f32 1.442695, %v1286_v4  ;;  %v1503_v5 = vsel %vm1439_vm2, %v1407_v13, %v1471_v43  ;;  %v1381_v25 = vmul.f32 %v2576_v6, %v1221_v7  ;;  %v1094_v8 = vmul.f32 %v3760_v29, %v1062_v30 }
 0x3bb   :  { %2577 = vrcp.f32 %v873_v2  ;;  %v3836_v44 = vmul.f32 0.5, %v3631_v46  ;;  %v1032_v50 = vmul.f32 %v3786_v58, %v1000_v10  ;;  %v967_v1 = vmul.f32 1.0614054, %v3821_v47 }
 0x3bc   :  { %v810_v62 = vand.u32 2147483647, %v3827_v41  ;;  %v1473_v45 = vsub.f32 0.0, %v1409_v51  ;;  %vm1443_vm6 = vcmp.ge.f32.partialorder %v3643_v55, 0.0  ;;  %v3843_v48 = vmul.f32 0.5, %v3635_v49  ;;  %v4213_v49 = vld [vmem:[#allocation27_spill] sm:$0xff] }
 0x3bd   :  { %v1346_v15 = vmul.f32 1.442695, %v1288_v21  ;;  %v1535_v13 = vadd.f32 1.0, %v1503_v5  ;;  %v1474_v35 = vsub.f32 0.0, %v1410_v63  ;;  %v1411_v9 = vsub.f32 1.0, %v1379_v3 }
 0x3be   :  { %vm1445_vm7 = vcmp.ge.f32.partialorder %v3646_v33, 0.0  ;;  %v842_v46 = vmul.f32 0.3275911, %v810_v62  ;;  %v1413_v42 = vsub.f32 1.0, %v1381_v25  ;;  %v1126_v40 = vadd.f32 -0.28449672, %v1094_v8 }
 0x3bf   :  { %2579 = vpow2.f32 %v1342_v16  ;;  %v3848_v34 = vadd.f32 %v4212_v38, %v2977_v11  ;;  %v1064_v37 = vadd.f32 1.4214138, %v1032_v50  ;;  %v999_v52 = vadd.f32 -1.4531521, %v967_v1 }
 0x3c0   :  { %v874_v4 = vadd.f32 1.0, %v842_v46  ;;  %v3852_v39 = vadd.f32 %v4213_v49, %v2979_v53  ;;  %v1505_v57 = vsel %vm1441_vm4, %v1409_v51, %v1473_v45  ;;  %2581 = vpow2.f32 %v1346_v15  ;;  %v4214_v51 = vld [vmem:[#allocation30_spill] sm:$0xff] }
 0x3c1   :  { %v1255_v43 = vmul.f32 %v3765_v14, %v3765_v14  ;;  %v3859_v7 = vmul.f32 0.70710677, %v3848_v34  ;;  %v3862_v11 = vmul.f32 %v1535_v13, %v3638_v54  ;;  %v1506_v30 = vsel %vm1442_vm5, %v1410_v63, %v1474_v35 }
 0x3c2   :  { %v1475_v10 = vsub.f32 0.0, %v1411_v9  ;;  %2583 = vrcp.f32 %v874_v4  ;;  %v1477_v53 = vsub.f32 0.0, %v1413_v42  ;;  %v1158_v2 = vmul.f32 %v3760_v29, %v1126_v40 }
 0x3c3   :  { %v812_v31 = vand.u32 2147483647, %v3859_v7  ;;  %v3870_v21 = vadd.f32 %v4214_v51, %v2981_v12  ;;  %v1537_v14 = vadd.f32 1.0, %v1505_v57  ;;  %v1096_v6 = vmul.f32 %v3786_v58, %v1064_v37 }
 0x3c4   :  { %v1031_v54 = vmul.f32 %v3821_v47, %v999_v52  ;;  %v3875_v3 = vmul.f32 0.70710677, %v3852_v39  ;;  %v1538_v63 = vadd.f32 1.0, %v1506_v30  ;;  %v1287_v16 = vsub.f32 0.0, %v1255_v43 }
 0x3c5   :  { %v3877_v0 = vpop.eup %2577  ;;  %v3881_v5 = vmul.f32 %v3804_v56, %v3804_v56  ;;  %v844_v25 = vmul.f32 0.3275911, %v812_v31  ;;  %v1507_v12 = vsel %vm1443_vm6, %v1411_v9, %v1475_v10  ;;  %v1258_v50 = vmul.f32 %v810_v62, %v810_v62 }
 0x3c6   :  { %v969_v8 = vmul.f32 1.0614054, %v3877_v0  ;;  %v811_v1 = vand.u32 2147483647, %v3875_v3  ;;  %v1509_v45 = vsel %vm1445_vm7, %v1413_v42, %v1477_v53  ;;  %v1190_v15 = vadd.f32 0.2548296, %v1158_v2 }
 0x3c7   :  { %v876_v13 = vadd.f32 1.0, %v844_v25  ;;  %v3890_v35 = vmul.f32 0.70710677, %v3870_v21  ;;  %v3893_v56 = vmul.f32 %v1537_v14, %v3692_v60  ;;  %v1128_v46 = vadd.f32 -0.28449672, %v1096_v6 }
 0x3c8   :  { %v1063_v40 = vadd.f32 1.4214138, %v1031_v54  ;;  %v1001_v55 = vadd.f32 -1.4531521, %v969_v8  ;;  %v1539_v38 = vadd.f32 1.0, %v1507_v12  ;;  %v3897_v33 = vmul.f32 %v1538_v63, %v3721_v22 }
 0x3c9   :  { %v2580_v9 = vpop.eup %2579  ;;  %2585 = vrcp.f32 %v876_v13  ;;  %v843_v62 = vmul.f32 0.3275911, %v811_v1  ;;  %v813_v37 = vand.u32 2147483647, %v3890_v35  ;;  %v1541_v42 = vadd.f32 1.0, %v1509_v45  ;;  %v4215_v45 = vld [vmem:[#allocation20_spill] sm:$0xff] }
 0x3ca   :  { %v1033_v52 = vmul.f32 %v3877_v0, %v1001_v55  ;;  %v1290_v4 = vsub.f32 0.0, %v1258_v50  ;;  %v3900_v49 = vpop.eup %2581  ;;  %v1344_v60 = vmul.f32 1.442695, %v1287_v16  ;;  %v1289_v57 = vsub.f32 0.0, %v3881_v5  ;;  %v4220_v55 = vld [vmem:[#allocation13_spill] sm:$0xff] }
 0x3cb   :  { %v875_v43 = vadd.f32 1.0, %v843_v62  ;;  %v845_v30 = vmul.f32 0.3275911, %v813_v37  ;;  %v1222_v53 = vmul.f32 %v3760_v29, %v1190_v15  ;;  %v1160_v2 = vmul.f32 %v3786_v58, %v1128_v46 }
 0x3cc   :  { %v3903_v10 = vpop.eup %2583  ;;  %v1095_v22 = vmul.f32 %v3821_v47, %v1063_v40  ;;  %v1065_v51 = vadd.f32 1.4214138, %v1033_v52  ;;  %v3909_v14 = vmul.f32 %v1539_v38, %v3836_v44  ;;  %v3913_v63 = vmul.f32 %v1541_v42, %v3843_v48  ;;  %v4216_v48 = vld [vmem:[#allocation14_spill] sm:$0xff]  ;;  %v4221_v38 = vld [vmem:[#allocation15_spill] sm:$0xff]  ;;  %v4224_v52 = vld [vmem:[#allocation32_spill] sm:$0xff] }
 0x3cd   :  { %v970_v6 = vmul.f32 1.0614054, %v3903_v10  ;;  %2587 = vrcp.f32 %v875_v43  ;;  %v877_v54 = vadd.f32 1.0, %v845_v30  ;;  %v1350_v16 = vmul.f32 1.442695, %v1290_v4  ;;  %v4225_v4 = vld [vmem:[#allocation31_spill] sm:$0xff] }
 0x3ce   :  { %v1260_v5 = vmul.f32 %v812_v31, %v812_v31  ;;  %v1647_v29 = vpack.c.bf16 %v3498_v28, %v3453_v61  ;;  %v1097_v25 = vmul.f32 %v3877_v0, %v1065_v51  ;;  %v1649_v44 = vpack.c.bf16 %v3531_v59, %v3456_v17  ;;  %v4217_v61 = vld [vmem:[#allocation29_spill] sm:$0xff]  ;;  %v4218_v28 = vld [vmem:[#allocation28_spill] sm:$0xff]  ;;  %v4222_v59 = vld [vmem:[#allocation23_spill] sm:$0xff] }
 0x3cf   :  { %v1002_v12 = vadd.f32 -1.4531521, %v970_v6  ;;  %2589 = vrcp.f32 %v877_v54  ;;  %v1127_v8 = vadd.f32 -0.28449672, %v1095_v22  ;;  %v1259_v50 = vmul.f32 %v811_v1, %v811_v1  ;;  %v4223_v1 = vld [vmem:[#allocation33_spill] sm:$0xff] }
 0x3d0   :  { %1886 = vmatprep.mubr.bf16.mxu1 %v1647_v29  ;;  %v1651_v15 = vpack.c.bf16 %v4215_v45, %v3614_v19  ;;  %v1653_v13 = vpack.c.bf16 %v3818_v27, %v4216_v48  ;;  %v1192_v31 = vadd.f32 0.2548296, %v1160_v2  ;;  %1951 = vmatprep.mubr.bf16.mxu0 %v1649_v44  ;;  %v4219_v40 = vpack.c.bf16 %v4217_v61, %v4218_v28  ;;  %v2619_v27 = vld [vmem:[%s4118_s8 + $0x80] sm:$0xff]  }
 0x3d1   :  { %v1034_v46 = vmul.f32 %v3903_v10, %v1002_v12  ;;  %v1650_v17 = vpack.c.bf16 %v4221_v38, %v4220_v55  ;;  %v1652_v62 = vpack.c.bf16 %v4223_v1, %v4222_v59  ;;  %v3932_v42 = vmul.f32 %v2580_v9, %v1222_v53  ;;  %v2620_v9 = vld [vmem:[%s4118_s8 + $0xc8] sm:$0xff]   ;;  %v2623_v59 = vld [vmem:[%s4118_s8 + $0x90] sm:$0xff]  }
 0x3d2   :  { %1887 = vmatmul.mubr.bf16.vlgmr.msra.gmra.mrb[16].mxu1 %v4219_v40  ;;  %v1292_v19 = vsub.f32 0.0, %v1260_v5  ;;  %v4226_v43 = vpack.c.bf16 %v4224_v52, %v4225_v4  ;;  %v1655_v30 = vpack.c.bf16 %v3909_v14, %v3862_v11  ;;  %v1129_v22 = vadd.f32 -0.28449672, %v1097_v25  ;;  %v4227_v4 = vld [vmem:[#allocation17_spill] sm:$0xff] }
 0x3d3   :  { %2355 = vmatpush3.bf16.msra.mxu1 %v2619_v27  ;;  %v3942_v2 = vpop.eup %2585  ;;  %v1066_v51 = vadd.f32 1.4214138, %v1034_v46  ;;  %1894 = vmatprep.mubr.bf16.mxu1 %v1651_v15  ;;  %v1654_v53 = vpack.c.bf16 %v3897_v33, %v3830_v20  ;;  %v1657_v6 = vpack.c.bf16 %v3913_v63, %v3893_v56  ;;  %v1159_v54 = vmul.f32 %v3821_v47, %v1127_v8  ;;  %v2621_v15 = vld [vmem:[%s4118_s8 + $0x88] sm:$0xff]  }
 0x3d4   :  { %1952 = vmatmul.mubr.bf16.vlgmr.msra.gmra.mrb[24].mxu0 %v4226_v43  ;;  %2348 = vmatprep.subr.bf16.mxu1 %v2620_v9  ;;  %v1348_v5 = vmul.f32 1.442695, %v1289_v57  ;;  %2591 = vpow2.f32 %v1350_v16  ;;  %v972_v11 = vmul.f32 1.0614054, %v3942_v2  ;;  %v1224_v14 = vmul.f32 %v3786_v58, %v1192_v31  ;;  %v2622_v58 = vld [vmem:[%s4118_s8 + $0xd0] sm:$0xff]   ;;  %v2628_v20 = vld [vmem:[%s4118_s8 + $0xe8] sm:$0xff]  }
 0x3d5   :  { %1959 = vmatprep.mubr.bf16.mxu0 %v1653_v13  ;;  %2593 = vpow2.f32 %v1344_v60  ;;  %v1098_v29 = vmul.f32 %v3903_v10, %v1066_v51  ;;  %v1291_v25 = vsub.f32 0.0, %v1259_v50  ;;  %v1414_v12 = vsub.f32 1.0, %v3932_v42 }
 0x3d6   :  { %v1004_v44 = vadd.f32 -1.4531521, %v972_v11  ;;  %v1261_v45 = vmul.f32 %v813_v37, %v813_v37  ;;  %v1161_v16 = vmul.f32 %v3877_v0, %v1129_v22  ;;  %v1354_v48 = vmul.f32 1.442695, %v1292_v19  ;;  %v2624_v19 = vld [vmem:[%s4118_s8 + $0xd8] sm:$0xff]  }
 0x3d7   :  { %2356 = vmatpush3.bf16.msra.mxu1 %v2621_v15  ;;  %v3959_v57 = vpop.eup %2587  ;;  %v1130_v8 = vadd.f32 -0.28449672, %v1098_v29  ;;  %v1191_v60 = vadd.f32 0.2548296, %v1159_v54  ;;  %2595 = vpow2.f32 %v1348_v5  ;;  %v3970_v31 = vmul.f32 %v3900_v49, %v1224_v14 }
 0x3d8   :  { %2349 = vmatprep.subr.bf16.mxu1 %v2622_v58  ;;  %v1036_v37 = vmul.f32 %v3942_v2, %v1004_v44  ;;  %v971_v50 = vmul.f32 1.0614054, %v3959_v57  ;;  %v1352_v61 = vmul.f32 1.442695, %v1291_v25  ;;  %v1478_v28 = vsub.f32 0.0, %v1414_v12 }
 0x3d9   :  { %v3967_v13 = vpop.eup %2589  ;;  %v1162_v46 = vmul.f32 %v3903_v10, %v1130_v8  ;;  %v1293_v38 = vsub.f32 0.0, %v1261_v45  ;;  %v1193_v1 = vadd.f32 0.2548296, %v1161_v16  ;;  %2597 = vpow2.f32 %v1354_v48 }
 0x3da   :  { %1895 = vmatmul.mubr.bf16.gmra.mrb[20].mxu1 %v1650_v17  ;;  %v1068_v40 = vadd.f32 1.4214138, %v1036_v37  ;;  %v1003_v55 = vadd.f32 -1.4531521, %v971_v50  ;;  %v973_v49 = vmul.f32 1.0614054, %v3967_v13  ;;  %v1223_v17 = vmul.f32 %v3821_v47, %v1191_v60 }
 0x3db   :  { %2357 = vmatpush3.bf16.msra.mxu1 %v2623_v59  ;;  %v1194_v42 = vadd.f32 0.2548296, %v1162_v46  ;;  %1902 = vmatprep.mubr.bf16.mxu1 %v1655_v30  ;;  %vm1446_vm8 = vcmp.ge.f32.partialorder %v4227_v4, 0.0  ;;  %v1356_v11 = vmul.f32 1.442695, %v1293_v38  ;;  %v2625_v47 = vld [vmem:[%s4118_s8 + $0x98] sm:$0xff]   ;;  %v1225_v14 = vmul.f32 %v3877_v0, %v1193_v1 }
 0x3dc   :  { %1960 = vmatmul.mubr.bf16.gmra.mrb[28].mxu0 %v1652_v62  ;;  %2350 = vmatprep.subr.bf16.mxu1 %v2624_v19  ;;  %v1100_v27 = vmul.f32 %v3942_v2, %v1068_v40  ;;  %v1035_v52 = vmul.f32 %v3959_v57, %v1003_v55  ;;  %v1416_v62 = vsub.f32 1.0, %v3970_v31  ;;  %v1005_v22 = vadd.f32 -1.4531521, %v973_v49  ;;  %v2627_v60 = vld [vmem:[%s4118_s8 + $0xa0] sm:$0xff]   ;;  %v4228_v40 = vld [vmem:[#allocation16_spill] sm:$0xff]  ;;  %v4229_v38 = vld [vmem:[#allocation19_spill] sm:$0xff] }
 0x3dd   :  { %v1226_v43 = vmul.f32 %v3903_v10, %v1194_v42  ;;  %v1510_v9 = vsel %vm1446_vm8, %v1414_v12, %v1478_v28  ;;  %2599 = vpow2.f32 %v1352_v61  ;;  %v2626_v10 = vld [vmem:[%s4118_s8 + $0xe0] sm:$0xff]   ;;  %vm1450_vm9 = vcmp.ge.f32.partialorder %v3827_v41, 0.0  ;;  %v2629_v41 = vld [vmem:[%s4118_s8 + $0xa8] sm:$0xff]  }
 0x3de   :  { %v2592_v51 = vpop.eup %2591  ;;  %v1132_v54 = vadd.f32 -0.28449672, %v1100_v27  ;;  %v1067_v5 = vadd.f32 1.4214138, %v1035_v52  ;;  %v1037_v25 = vmul.f32 %v3967_v13, %v1005_v22  ;;  %v1542_v8 = vadd.f32 1.0, %v1510_v9 }
 0x3df   :  { %2358 = vmatpush3.bf16.msra.mxu1 %v2625_v47  ;;  %v2594_v30 = vpop.eup %2593  ;;  %v1386_v29 = vmul.f32 %v2592_v51, %v1226_v43  ;;  %2601 = vpow2.f32 %v1356_v11  ;;  %v1480_v37 = vsub.f32 0.0, %v1416_v62  ;;  %v742_v55 = vmul.f32 0.5, %v4228_v40  ;;  %v2630_v43 = vld [vmem:[%s4118_s8 + $0xf0] sm:$0xff]  }
 0x3e0   :  { %2351 = vmatprep.subr.bf16.mxu1 %v2626_v10  ;;  %v1383_v12 = vmul.f32 %v2594_v30, %v1223_v17  ;;  %v1164_v44 = vmul.f32 %v3942_v2, %v1132_v54  ;;  %v1099_v45 = vmul.f32 %v3959_v57, %v1067_v5  ;;  %v1069_v16 = vadd.f32 1.4214138, %v1037_v25 }
 0x3e1   :  { %v1418_v15 = vsub.f32 1.0, %v1386_v29  ;;  %v2596_v0 = vpop.eup %2595  ;;  %vm1448_vm10 = vcmp.ge.f32.partialorder %v4229_v38, 0.0  ;;  %v746_v42 = vmul.f32 0.5, %v3810_v36  ;;  %v4230_v29 = vld [vmem:[#allocation21_spill] sm:$0xff]  ;;  %vm1452_vm12 = vcmp.ge.f32.partialorder %v3859_v7, 0.0 }
 0x3e2   :  { %1903 = vmatmul.mubr.bf16.gmra.mrb[24].mxu1 %v1654_v53  ;;  %v1196_v48 = vadd.f32 0.2548296, %v1164_v44  ;;  %v1131_v58 = vadd.f32 -0.28449672, %v1099_v45  ;;  %v1385_v50 = vmul.f32 %v2596_v0, %v1225_v14  ;;  %v1101_v46 = vmul.f32 %v3967_v13, %v1069_v16  ;;  %v4231_v44 = vld [vmem:[#allocation18_spill] sm:$0xff] }
 0x3e3   :  { %2359 = vmatpush3.bf16.msra.mxu1 %v2627_v60  ;;  %v1482_v31 = vsub.f32 0.0, %v1418_v15  ;;  %v1415_v33 = vsub.f32 1.0, %v1383_v12  ;;  %v2598_v28 = vpop.eup %2597  ;;  %v1512_v27 = vsel %vm1448_vm10, %v1416_v62, %v1480_v37  ;;  %v2631_v62 = vld [vmem:[%s4118_s8 + $0xb0] sm:$0xff]   ;;  %vm1447_vm11 = vcmp.ge.f32.partialorder %v4230_v29, 0.0 }
 0x3e4   :  { %2352 = vmatprep.subr.bf16.mxu1 %v2628_v20  ;;  %v1228_v53 = vmul.f32 %v3942_v2, %v1196_v48  ;;  %v1163_v61 = vmul.f32 %v3959_v57, %v1131_v58  ;;  %v1133_v1 = vadd.f32 -0.28449672, %v1101_v46  ;;  %v1574_v2 = vmul.f32 %v1542_v8, %v742_v55  ;;  %v4232_v20 = vld [vmem:[#allocation34_spill] sm:$0xff] }
 0x3e5   :  { %v1514_v59 = vsel %vm1450_vm9, %v1418_v15, %v1482_v31  ;;  %v1417_v52 = vsub.f32 1.0, %v1385_v50  ;;  %v1479_v22 = vsub.f32 0.0, %v1415_v33  ;;  %v1544_v11 = vadd.f32 1.0, %v1512_v27 }
 0x3e6   :  { %v1546_v49 = vadd.f32 1.0, %v1514_v59  ;;  %v1388_v19 = vmul.f32 %v2598_v28, %v1228_v53  ;;  %v1195_v17 = vadd.f32 0.2548296, %v1163_v61  ;;  %v1165_v4 = vmul.f32 %v3967_v13, %v1133_v1 }
 0x3e7   :  { %2360 = vmatpush3.bf16.msra.mxu1 %v2629_v41  ;;  %v2600_v54 = vpop.eup %2599  ;;  %v1481_v25 = vsub.f32 0.0, %v1417_v52  ;;  %v744_v45 = vmul.f32 0.5, %v4231_v44  ;;  %v1511_v15 = vsel %vm1447_vm11, %v1415_v33, %v1479_v22  ;;  %v748_v8 = vmul.f32 0.5, %v3848_v34 }
 0x3e8   :  { %2353 = vmatprep.subr.bf16.mxu1 %v2630_v43  ;;  %v1578_v36 = vmul.f32 %v1546_v49, %v746_v42  ;;  %v1420_v51 = vsub.f32 1.0, %v1388_v19  ;;  %v1227_v9 = vmul.f32 %v3959_v57, %v1195_v17  ;;  %v1197_v5 = vadd.f32 0.2548296, %v1165_v4  ;;  %v2632_v57 = vld [vmem:[%s4118_s8 + $0xf8] sm:$0xff]  }
 0x3e9   :  { %v2602_v12 = vpop.eup %2601  ;;  %v1576_v60 = vmul.f32 %v1544_v11, %v744_v45  ;;  %vm1449_vm13 = vcmp.ge.f32.partialorder %v3795_v18, 0.0  ;;  %vm1451_vm14 = vcmp.ge.f32.partialorder %v3875_v3, 0.0  ;;  %v1543_v37 = vadd.f32 1.0, %v1511_v15  ;;  %v4234_v11 = vld [vmem:[#allocation8_spill] sm:$0xff] }
 0x3ea   :  { %v1484_v47 = vsub.f32 0.0, %v1420_v51  ;;  %v1387_v30 = vmul.f32 %v2600_v54, %v1227_v9  ;;  %v1658_v14 = vpack.c.bf16 %v1578_v36, %v1574_v2  ;;  %v1229_v10 = vmul.f32 %v3967_v13, %v1197_v5  ;;  %v2633_v13 = vld [vmem:[%s4118_s8 + $0xb8] sm:$0xff]  }
 0x3eb   :  { %2361 = vmatpush3.bf16.msra.mxu1 %v2631_v62  ;;  %v1513_v50 = vsel %vm1449_vm13, %v1417_v52, %v1481_v25  ;;  %v743_v33 = vmul.f32 0.5, %v4232_v20  ;;  %v747_v53 = vmul.f32 0.5, %v3852_v39  ;;  %vm1453_vm15 = vcmp.ge.f32.partialorder %v3890_v35, 0.0 }
 0x3ec   :  { %2354 = vmatprep.subr.bf16.mxu1 %v2632_v57  ;;  %v1516_v16 = vsel %vm1452_vm12, %v1420_v51, %v1484_v47  ;;  %v1419_v0 = vsub.f32 1.0, %v1387_v30  ;;  %v1389_v58 = vmul.f32 %v2602_v12, %v1229_v10  ;;  %v1545_v40 = vadd.f32 1.0, %v1513_v50 }
 0x3ed   :  { %v1548_v48 = vadd.f32 1.0, %v1516_v16  ;;  %v1575_v3 = vmul.f32 %v1543_v37, %v743_v33  ;;  %v745_v59 = vmul.f32 0.5, %v3782_v32  ;;  %v749_v1 = vmul.f32 0.5, %v3870_v21 }
 0x3ee   :  { %v1483_v7 = vsub.f32 0.0, %v1419_v0  ;;  %v1421_v46 = vsub.f32 1.0, %v1389_v58 }
 0x3ef   :  { %2362 = vmatpush3.bf16.msra.mxu1 %v2633_v13  ;;  %v1580_v31 = vmul.f32 %v1548_v48, %v748_v8  ;;  %v1577_v19 = vmul.f32 %v1545_v40, %v745_v59 }
 0x3f0   :  { %v1515_v34 = vsel %vm1451_vm14, %v1419_v0, %v1483_v7  ;;  %v1485_v28 = vsub.f32 0.0, %v1421_v46  ;;  %v4235_v0 = vld [vmem:[#allocation5_spill] sm:$0xff]  ;;  %v4236_v7 = vld [vmem:[#allocation7_spill] sm:$0xff] }
 0x3f1   :  { %v1547_v61 = vadd.f32 1.0, %v1515_v34  ;;  %v1660_v18 = vpack.c.bf16 %v1580_v31, %v1576_v60 }
 0x3f2   :  { %v1517_v38 = vsel %vm1453_vm15, %v1421_v46, %v1485_v28 }
 0x3f3   :  { %v1579_v55 = vmul.f32 %v1547_v61, %v747_v53  ;;  %v1549_v42 = vadd.f32 1.0, %v1517_v38 }
 0x3f5   :  { %v1659_v49 = vpack.c.bf16 %v1579_v55, %v1575_v3  ;;  %v1581_v17 = vmul.f32 %v1549_v42, %v749_v1 }
 0x3f7   :  { %1910 = vmatprep.mubr.bf16.mxu1 %v1659_v49  ;;  %v1661_v39 = vpack.c.bf16 %v1581_v17, %v1577_v19  ;;  %v4237_v19 = vld [vmem:[#allocation9_spill] sm:$0xff] }
 0x3f8   :  { %1911 = vmatmul.mubr.bf16.gmra.mrb[28].mxu1 %v1658_v14 }
 0x3f9   :  { %1967 = vmatprep.mubr.bf16.mxu1 %v1657_v6 }
 0x400   :  { %1968 = vmatmul.mubr.bf16.vlgmr.msra.gmra.mrb[32].mxu1 %v1656_v26  ;;  %v4233_v26 = vld [vmem:[#allocation6_spill] sm:$0xff] }
 0x401   :  { %1975 = vmatprep.mubr.bf16.mxu1 %v1661_v39 }
 0x408   :  { %1976 = vmatmul.mubr.bf16.gmra.mrb[36].mxu1 %v1660_v18 }
 0x4a5   :  { %v2259_v32 = vpop.f32.mrb[16].mxu1 }
 0x4a6   :  { %v2260_v21 = vpop.f32.mrb[17].mxu1 }
 0x4a7   :  { %v2299_v35 = vpop.f32.mrb[24].mxu0  ;;  %v2261_v41 = vadd.f32 %v2260_v21, %v2259_v32  ;;  %v2262_v27 = vpop.f32.mrb[18].mxu1 }
 0x4a8   :  { %v2300_v2 = vpop.f32.mrb[25].mxu0  ;;  %v2263_v43 = vpop.f32.mrb[19].mxu1 }
 0x4a9   :  { %v2301_v52 = vadd.f32 %v2300_v2, %v2299_v35  ;;  %v2302_v4 = vpop.f32.mrb[26].mxu0  ;;  %v2264_v22 = vadd.f32 %v2263_v43, %v2262_v27  ;;  %v4238_v35 = vld [vmem:[#allocation11_spill] sm:$0xff] }
 0x4aa   :  { %v2303_v36 = vpop.f32.mrb[27].mxu0 }
 0x4ab   :  { %v1954_v51 = vadd.f32 %v2301_v52, %v2261_v41  ;;  %v2304_v56 = vadd.f32 %v2303_v36, %v2302_v4 }
 0x4ad   :  { %v1957_v23 = vadd.f32 %v2304_v56, %v2264_v22  ;;  %v1984_v63 = vadd.f32 %v1954_v51, %v4233_v26  ;;  %v2265_v6 = vpop.f32.mrb[20].mxu1  ;;  %v4239_v51 = vld [vmem:[#allocation10_spill] sm:$0xff]  ;;  %v4240_v26 = vld [vmem:[#allocation12_spill] sm:$0xff] }
 0x4ae   :  { %v2266_v54 = vpop.f32.mrb[21].mxu1 }
 0x4af   :  { %v2305_v9 = vpop.f32.mrb[28].mxu0  ;;  %v4054_v5 = vadd.f32 %v4050_v24, %v1984_v63  ;;  %v1985_v47 = vadd.f32 %v1957_v23, %v4234_v11  ;;  %v2267_v30 = vadd.f32 %v2266_v54, %v2265_v6  ;;  %v2268_v62 = vpop.f32.mrb[22].mxu1 }
 0x4b0   :  { %v2306_v14 = vpop.f32.mrb[29].mxu0  ;;  %v2269_v10 = vpop.f32.mrb[23].mxu1 }
 0x4b1   :  { %v2307_v29 = vadd.f32 %v2306_v14, %v2305_v9  ;;  %v2308_v25 = vpop.f32.mrb[30].mxu0  ;;  %2009 = vadd.xlane.f32.xlu0 %v4054_v5  ;;  %v2000_v57 = vadd.f32 %v4050_v24, %v1985_v47  ;;  %v2270_v12 = vadd.f32 %v2269_v10, %v2268_v62 }
 0x4b2   :  { %v2309_v44 = vpop.f32.mrb[31].mxu0 }
 0x4b3   :  { %v1962_v45 = vadd.f32 %v2307_v29, %v2267_v30  ;;  %v2310_v15 = vadd.f32 %v2309_v44, %v2308_v25  ;;  %2011 = vadd.xlane.f32.xlu1 %v2000_v57 }
 0x4b5   :  { %v1965_v16 = vadd.f32 %v2310_v15, %v2270_v12  ;;  %v1986_v8 = vadd.f32 %v1962_v45, %v4235_v0  ;;  %v2271_v48 = vpop.f32.mrb[24].mxu1 }
 0x4b6   :  { %v2272_v58 = vpop.f32.mrb[25].mxu1 }
 0x4b7   :  { %v2001_v60 = vadd.f32 %v4050_v24, %v1986_v8  ;;  %v1987_v13 = vadd.f32 %v1965_v16, %v4236_v7  ;;  %v2273_v37 = vadd.f32 %v2272_v58, %v2271_v48  ;;  %v2274_v50 = vpop.f32.mrb[26].mxu1 }
 0x4b8   :  { %v2275_v31 = vpop.f32.mrb[27].mxu1 }
 0x4b9   :  { %2013 = vadd.xlane.f32.xlu0 %v2001_v60  ;;  %v2002_v46 = vadd.f32 %v4050_v24, %v1987_v13  ;;  %v2276_v20 = vadd.f32 %v2275_v31, %v2274_v50 }
 0x4bb   :  { %2015 = vadd.xlane.f32.xlu1 %v2002_v46 }
 0x4cb   :  { %v2277_v33 = vpop.f32.mrb[28].mxu1 }
 0x4cc   :  { %v2278_v34 = vpop.f32.mrb[29].mxu1 }
 0x4cd   :  { %v2279_v53 = vadd.f32 %v2278_v34, %v2277_v33  ;;  %v2280_v61 = vpop.f32.mrb[30].mxu1 }
 0x4ce   :  { %v2281_v28 = vpop.f32.mrb[31].mxu1 }
 0x4cf   :  { %v2282_v18 = vadd.f32 %v2281_v28, %v2280_v61 }
 0x4d3   :  { %v2311_v40 = vpop.f32.mrb[32].mxu1 }
 0x4d4   :  { %v2312_v3 = vpop.f32.mrb[33].mxu1 }
 0x4d5   :  { %v2313_v55 = vadd.f32 %v2312_v3, %v2311_v40  ;;  %v2314_v38 = vpop.f32.mrb[34].mxu1 }
 0x4d6   :  { %v2315_v59 = vpop.f32.mrb[35].mxu1 }
 0x4d7   :  { %v1970_v1 = vadd.f32 %v2313_v55, %v2273_v37  ;;  %v2316_v42 = vadd.f32 %v2315_v59, %v2314_v38 }
 0x4d9   :  { %v1973_v49 = vadd.f32 %v2316_v42, %v2276_v20  ;;  %v1988_v17 = vadd.f32 %v1970_v1, %v4237_v19 }
 0x4db   :  { %v2317_v39 = vpop.f32.mrb[36].mxu1  ;;  %v2003_v32 = vadd.f32 %v4050_v24, %v1988_v17  ;;  %v1989_v21 = vadd.f32 %v1973_v49, %v4238_v35  ;;  %v2229_v17 = vld [vmem:[%s4120_s10] ss:$0 sm:$0xff]  ;;  %s2659_s10 = smov [#allocation2]  }
 0x4dc   :  { %v2318_v41 = vpop.f32.mrb[37].mxu1  ;;  %v2230_v35 = vld [vmem:[%s4121_s11] ss:$0 sm:$0xff]  ;;  %s2138_s11 = sshll.u32 %s2659_s10, 4  ;;  %s2139_s11 = int_to_ptr.vmem [resolvable:$true] %s2138_s11 }
 0x4dd   :  { %v2319_v2 = vadd.f32 %v2318_v41, %v2317_v39  ;;  %v2320_v27 = vpop.f32.mrb[38].mxu1  ;;  %2017 = vadd.xlane.f32.xlu0 %v2003_v32  ;;  %v2004_v52 = vadd.f32 %v4050_v24, %v1989_v21  ;;  %s2634_s6 = scalar_lea.vmem %s2139_s11, 1024  ;;  %p2639_p1 = scmp.lt.s32.totalorder %s2139_s11, %s2139_s11 }
 0x4de   :  { %v2321_v4 = vpop.f32.mrb[39].mxu1  ;;  %p2635_p0 = scmp.ne.s32.totalorder %s2139_s11, %s2634_s6  ;;  %p2640_p2 = scmp.lt.s32.totalorder %s2634_s6, %s2634_s6 }
 0x4df   :  { %v1978_v43 = vadd.f32 %v2319_v2, %v2279_v53  ;;  %v2322_v22 = vadd.f32 %v2321_v4, %v2320_v27  ;;  %2019 = vadd.xlane.f32.xlu1 %v2004_v52 }
 0x4e0   :  { %p2641_p3 = por %p2640_p2, %p2639_p1 }
 0x4e1   :  { %v1981_v36 = vadd.f32 %v2322_v22, %v2282_v18  ;;  %v1990_v56 = vadd.f32 %v1978_v43, %v4239_v51 }
 0x4e2   :  { %p2642_p4 = pnand %p2641_p3, %p2635_p0 }
 0x4e3   :  { %v2005_v23 = vadd.f32 %v4050_v24, %v1990_v56  ;;  %v1991_v63 = vadd.f32 %v1981_v36, %v4240_v26 }
 0x4e5   :  { %2021 = vadd.xlane.f32.xlu0 %v2005_v23  ;;  %v2006_v6 = vadd.f32 %v4050_v24, %v1991_v63 }
 0x4e7   :  { %2023 = vadd.xlane.f32.xlu1 %v2006_v6 }
 0x53e   :  { %v2010_v9 = vpop.xlane.xlu0 %2009 }
 0x53f   :  { %v2025_v54 = vmul.f32 0.0078125, %v2010_v9 }
 0x540   :  { %v2012_v11 = vpop.xlane.xlu1 %2011 }
 0x541   :  { %v2033_v47 = vsub.f32 %v4054_v5, %v2025_v54  ;;  %v2026_v30 = vmul.f32 0.0078125, %v2012_v11 }
 0x543   :  { %v2034_v14 = vsub.f32 %v2000_v57, %v2026_v30  ;;  %v2041_v62 = vmul.f32 %v2033_v47, %v2033_v47 }
 0x545   :  { %2049 = vadd.xlane.f32.xlu0 %v2041_v62  ;;  %v2042_v29 = vmul.f32 %v2034_v14, %v2034_v14 }
 0x546   :  { %v2014_v25 = vpop.xlane.xlu0 %2013 }
 0x547   :  { %v2027_v10 = vmul.f32 0.0078125, %v2014_v25  ;;  %2051 = vadd.xlane.f32.xlu1 %v2042_v29 }
 0x548   :  { %v2016_v12 = vpop.xlane.xlu1 %2015 }
 0x549   :  { %v2035_v44 = vsub.f32 %v2001_v60, %v2027_v10  ;;  %v2028_v45 = vmul.f32 0.0078125, %v2016_v12 }
 0x54b   :  { %v2036_v15 = vsub.f32 %v2002_v46, %v2028_v45  ;;  %v2043_v16 = vmul.f32 %v2035_v44, %v2035_v44 }
 0x54d   :  { %2053 = vadd.xlane.f32.xlu0 %v2043_v16  ;;  %v2044_v24 = vmul.f32 %v2036_v15, %v2036_v15 }
 0x54f   :  { %2055 = vadd.xlane.f32.xlu1 %v2044_v24 }
 0x56a   :  { %v2018_v0 = vpop.xlane.xlu0 %2017 }
 0x56b   :  { %v2029_v8 = vmul.f32 0.0078125, %v2018_v0 }
 0x56c   :  { %v2020_v48 = vpop.xlane.xlu1 %2019 }
 0x56d   :  { %v4072_v5 = vsub.f32 %v2003_v32, %v2029_v8  ;;  %v2030_v57 = vmul.f32 0.0078125, %v2020_v48 }
 0x56f   :  { %v4074_v58 = vsub.f32 %v2004_v52, %v2030_v57  ;;  %v2045_v7 = vmul.f32 %v4072_v5, %v4072_v5 }
 0x571   :  { %2057 = vadd.xlane.f32.xlu0 %v2045_v7  ;;  %v2046_v60 = vmul.f32 %v4074_v58, %v4074_v58 }
 0x572   :  { %v2022_v13 = vpop.xlane.xlu0 %2021 }
 0x573   :  { %v2031_v37 = vmul.f32 0.0078125, %v2022_v13  ;;  %2059 = vadd.xlane.f32.xlu1 %v2046_v60 }
 0x574   :  { %v2024_v50 = vpop.xlane.xlu1 %2023 }
 0x575   :  { %v4080_v31 = vsub.f32 %v2005_v23, %v2031_v37  ;;  %v2032_v46 = vmul.f32 0.0078125, %v2024_v50 }
 0x577   :  { %v4082_v20 = vsub.f32 %v2006_v6, %v2032_v46  ;;  %v2047_v33 = vmul.f32 %v4080_v31, %v4080_v31 }
 0x579   :  { %2061 = vadd.xlane.f32.xlu0 %v2047_v33  ;;  %v2048_v34 = vmul.f32 %v4082_v20, %v4082_v20 }
 0x57b   :  { %2063 = vadd.xlane.f32.xlu1 %v2048_v34 }
 0x5d2   :  { %v2050_v53 = vpop.xlane.xlu0 %2049 }
 0x5d3   :  { %v2065_v61 = vmul.f32 0.0078125, %v2050_v53 }
 0x5d4   :  { %v2052_v28 = vpop.xlane.xlu1 %2051 }
 0x5d5   :  { %v2073_v18 = vadd.f32 1e-05, %v2065_v61  ;;  %v2066_v40 = vmul.f32 0.0078125, %v2052_v28 }
 0x5d7   :  { %2603 = vrsqrt.f32 %v2073_v18  ;;  %v2074_v3 = vadd.f32 1e-05, %v2066_v40 }
 0x5d9   :  { %2605 = vrsqrt.f32 %v2074_v3 }
 0x5da   :  { %v2054_v55 = vpop.xlane.xlu0 %2053 }
 0x5db   :  { %v2067_v38 = vmul.f32 0.0078125, %v2054_v55 }
 0x5dc   :  { %v2056_v59 = vpop.xlane.xlu1 %2055 }
 0x5dd   :  { %v2075_v1 = vadd.f32 1e-05, %v2067_v38  ;;  %v2068_v42 = vmul.f32 0.0078125, %v2056_v59 }
 0x5df   :  { %2607 = vrsqrt.f32 %v2075_v1  ;;  %v2076_v49 = vadd.f32 1e-05, %v2068_v42 }
 0x5e1   :  { %v2604_v19 = vpop.eup %2603  ;;  %2609 = vrsqrt.f32 %v2076_v49 }
 0x5e2   :  { %v2089_v39 = vmul.f32 %v2604_v19, %v2033_v47 }
 0x5e3   :  { %v2606_v32 = vpop.eup %2605 }
 0x5e4   :  { %v2103_v21 = vmul.f32 %v2229_v17, %v2089_v39  ;;  %v2090_v41 = vmul.f32 %v2606_v32, %v2034_v14 }
 0x5e6   :  { %v2117_v2 = vadd.f32 %v2230_v35, %v2103_v21  ;;  %v2104_v27 = vmul.f32 %v2229_v17, %v2090_v41 }
 0x5e8   :  { %2125 = vst [vmem:[#allocation2] sm:$0xff] %v2117_v2  ;;  %v2118_v52 = vadd.f32 %v2230_v35, %v2104_v27 }
 0x5e9   :  { %v2608_v4 = vpop.eup %2607 }
 0x5ea   :  { %2126 = vst [vmem:[#allocation2 + $0x8] sm:$0xff] %v2118_v52  ;;  %v2091_v43 = vmul.f32 %v2608_v4, %v2035_v44 }
 0x5eb   :  { %v2610_v22 = vpop.eup %2609 }
 0x5ec   :  { %v2105_v36 = vmul.f32 %v2229_v17, %v2091_v43  ;;  %v2092_v51 = vmul.f32 %v2610_v22, %v2036_v15 }
 0x5ee   :  { %v2119_v56 = vadd.f32 %v2230_v35, %v2105_v36  ;;  %v2106_v23 = vmul.f32 %v2229_v17, %v2092_v51 }
 0x5f0   :  { %2127 = vst [vmem:[#allocation2 + $0x10] sm:$0xff] %v2119_v56  ;;  %v2120_v26 = vadd.f32 %v2230_v35, %v2106_v23 }
 0x5f2   :  { %2128 = vst [vmem:[#allocation2 + $0x18] sm:$0xff] %v2120_v26 }
 0x5fe   :  { %v2058_v63 = vpop.xlane.xlu0 %2057 }
 0x5ff   :  { %v2069_v6 = vmul.f32 0.0078125, %v2058_v63 }
 0x600   :  { %v2060_v9 = vpop.xlane.xlu1 %2059 }
 0x601   :  { %v2077_v54 = vadd.f32 1e-05, %v2069_v6  ;;  %v2070_v11 = vmul.f32 0.0078125, %v2060_v9 }
 0x603   :  { %2611 = vrsqrt.f32 %v2077_v54  ;;  %v2078_v47 = vadd.f32 1e-05, %v2070_v11 }
 0x605   :  { %2613 = vrsqrt.f32 %v2078_v47 }
 0x606   :  { %v2062_v30 = vpop.xlane.xlu0 %2061 }
 0x607   :  { %v2071_v14 = vmul.f32 0.0078125, %v2062_v30 }
 0x608   :  { %v2064_v62 = vpop.xlane.xlu1 %2063 }
 0x609   :  { %v2079_v29 = vadd.f32 1e-05, %v2071_v14  ;;  %v2072_v25 = vmul.f32 0.0078125, %v2064_v62 }
 0x60b   :  { %2615 = vrsqrt.f32 %v2079_v29  ;;  %v2080_v10 = vadd.f32 1e-05, %v2072_v25 }
 0x60d   :  { %v2612_v12 = vpop.eup %2611  ;;  %2617 = vrsqrt.f32 %v2080_v10 }
 0x60e   :  { %v2093_v44 = vmul.f32 %v2612_v12, %v4072_v5 }
 0x60f   :  { %v2614_v45 = vpop.eup %2613 }
 0x610   :  { %v2107_v15 = vmul.f32 %v2229_v17, %v2093_v44  ;;  %v2094_v16 = vmul.f32 %v2614_v45, %v4074_v58 }
 0x612   :  { %v2121_v24 = vadd.f32 %v2230_v35, %v2107_v15  ;;  %v2108_v0 = vmul.f32 %v2229_v17, %v2094_v16 }
 0x614   :  { %2129 = vst [vmem:[#allocation2 + $0x20] sm:$0xff] %v2121_v24  ;;  %v2122_v8 = vadd.f32 %v2230_v35, %v2108_v0 }
 0x615   :  { %v2616_v48 = vpop.eup %2615 }
 0x616   :  { %2130 = vst [vmem:[#allocation2 + $0x28] sm:$0xff] %v2122_v8  ;;  %v2095_v57 = vmul.f32 %v2616_v48, %v4080_v31 }
 0x617   :  { %v2618_v7 = vpop.eup %2617 }
 0x618   :  { %v2109_v60 = vmul.f32 %v2229_v17, %v2095_v57  ;;  %v2096_v13 = vmul.f32 %v2618_v7, %v4082_v20 }
 0x61a   :  { %v2123_v37 = vadd.f32 %v2230_v35, %v2109_v60  ;;  %v2110_v5 = vmul.f32 %v2229_v17, %v2096_v13 }
 0x61c   :  { %2131 = vst [vmem:[#allocation2 + $0x30] sm:$0xff] %v2123_v37  ;;  %v2124_v50 = vadd.f32 %v2230_v35, %v2110_v5 }
 0x61e   :  { %2132 = vst [vmem:[#allocation2 + $0x38] sm:$0xff] %v2124_v50 }
 0x61f   :  { %2645 = shalt.err (!%p2642_p4)
}
 0x620   :  { %s2646_s0 = scalar_lea.hbm %s4122_s12, 1024 }
 0x621   :  { %p2647_p5 = scmp.ne.s32.totalorder %s4122_s12, %s2646_s0  ;;  %p2650_p6 = scmp.lt.u32.totalorder %s2646_s0, %s4122_s12 }
 0x623   :  { %p2652_p7 = pnand %p2650_p6, %p2647_p5 }
 0x625   :  { %2655 = shalt.err (!%p2652_p7)
}
 0x626   :  { %s2660_s25 = smov 128   ;;  %s2661_s26 = smov 8  }
 0x627   :  { %2144 = dma.vmem_to_hbm [thread:$0]  %s2139_s11, 1024, %s4122_s12, [#allocation3], %s2660_s25, %s2660_s25, %s2661_s26  }
 0x628   :  { %2656 = dma.done.wait [#allocation3], 1024  }
 0x629   :  { %2657 = vsyncadd [#allocation3], 4294966272 }
 0x62a   :  { %2148 = vsyncpa [#allocation3], 1 }

</bundles_post_ra>
